<compile_context>
chip_gen: v7x
topology: tpu7x:2x2x1
jax: 0.10.0
libtpu: 0.0.40
codegen_flags: <defaults>
</compile_context>

<pallas_src>
import functools

import jax
import jax.numpy as jnp
from jax.experimental import pallas as pl
from jax.experimental.pallas import tpu as pltpu

# ---------------- synthetic config (small shapes) ----------------
B            = 2
IMG_PATCHES  = 8
MAX_TEXT_LEN = 8
S            = IMG_PATCHES + MAX_TEXT_LEN          # 16
D            = 32                                  # img_patch_embedding == text_token_embedding
NUM_HEADS    = 4
HEAD_DIM     = D // NUM_HEADS
FFN          = 4 * D                               # 128
NUM_LAYERS   = 2
VOCAB        = 128
LN_EPS       = 1e-5
NEG_INF      = -1e30


def _layernorm(x, gamma, beta):
    mu = jnp.mean(x, axis=-1, keepdims=True)
    var = jnp.mean((x - mu) ** 2, axis=-1, keepdims=True)
    return (x - mu) * jax.lax.rsqrt(var + LN_EPS) * gamma + beta


# ---------------- single fused Pallas kernel: transformer stack + lm_head + CE ----------------
def _fused_forward_kernel(img_ref, txt_ref,
                          g1_ref, b1_ref, wq_ref, wk_ref, wv_ref, wo_ref,
                          g2_ref, b2_ref, w1_ref, w2_ref,
                          gf_ref, bf_ref, wh_ref,
                          onehot_ref, tokw_ref,
                          logits_ref, loss_ref):
    # concat image + text tokens, fold batch into sublanes: (B*S, D)
    x = jnp.concatenate([img_ref[...], txt_ref[...]], axis=1).reshape(B * S, D)
    x = x.astype(jnp.float32)

    # additive prefix/causal mask (0 or -1e30), built once and hoisted out of all loops
    row = jax.lax.broadcasted_iota(jnp.int32, (S, S), 0)
    col = jax.lax.broadcasted_iota(jnp.int32, (S, S), 1)
    allow = jnp.logical_or(row < IMG_PATCHES, col <= row)
    addmask = jnp.where(allow, 0.0, NEG_INF).astype(jnp.float32)
    addmask = jnp.broadcast_to(addmask[None], (B, S, S))

    scale = jnp.float32(1.0 / (HEAD_DIM ** 0.5))

    for l in range(NUM_LAYERS):                       # static, unrolled layer loop
        # ---- masked multi-head attention (pre-LN) ----
        h = _layernorm(x, g1_ref[l], b1_ref[l]).astype(jnp.bfloat16)
        attn = jnp.zeros((B * S, D), jnp.float32)
        for hh in range(NUM_HEADS):                   # static; per-head weights pre-split,
            # so there is no lane slicing of q/k/v and no concat of head outputs.
            q = jnp.dot(h, wq_ref[l, hh], preferred_element_type=jnp.float32)  # (B*S, Dh)
            k = jnp.dot(h, wk_ref[l, hh], preferred_element_type=jnp.float32)
            v = jnp.dot(h, wv_ref[l, hh], preferred_element_type=jnp.float32)
            qb = q.reshape(B, S, HEAD_DIM).astype(jnp.bfloat16)
            kb = k.reshape(B, S, HEAD_DIM).astype(jnp.bfloat16)
            vb = v.reshape(B, S, HEAD_DIM).astype(jnp.bfloat16)
            s = jnp.einsum('bqd,bkd->bqk', qb, kb,
                           preferred_element_type=jnp.float32) * scale + addmask
            s = s - jnp.max(s, axis=-1, keepdims=True)
            p = jnp.exp(s)
            p = p * pl.reciprocal(jnp.sum(p, axis=-1, keepdims=True), approx=True)
            ob = jnp.einsum('bqk,bkd->bqd', p.astype(jnp.bfloat16), vb,
                            preferred_element_type=jnp.float32)                 # (B, S, Dh)
            attn = attn + jnp.dot(ob.reshape(B * S, HEAD_DIM).astype(jnp.bfloat16),
                                  wo_ref[l, hh], preferred_element_type=jnp.float32)
        x = x + attn

        # ---- GELU MLP (pre-LN) ----
        h2 = _layernorm(x, g2_ref[l], b2_ref[l]).astype(jnp.bfloat16)
        m = jnp.dot(h2, w1_ref[l], preferred_element_type=jnp.float32)
        m = jax.nn.gelu(m, approximate=True)          # TODO(synk): torch nn.GELU default is exact erf
        m = jnp.dot(m.astype(jnp.bfloat16), w2_ref[l], preferred_element_type=jnp.float32)
        x = x + m

    # ---- final LN + lm_head over the text window actually consumed downstream ----
    xn = _layernorm(x, gf_ref[...], bf_ref[...])
    xt = xn.reshape(B, S, D)[:, S - MAX_TEXT_LEN - 1: S - 1, :]    # (B, T, D)
    xt = xt.reshape(B * MAX_TEXT_LEN, D).astype(jnp.bfloat16)
    logits = jnp.dot(xt, wh_ref[...], preferred_element_type=jnp.float32)      # (B*T, V)
    logits_ref[...] = logits.reshape(B, MAX_TEXT_LEN, VOCAB)       # lane-dense (VOCAB=128)

    # ---- fused masked cross-entropy; token weights already fold in 1/len and 1/B ----
    mx = jnp.max(logits, axis=-1, keepdims=True)
    lse = jnp.log(jnp.sum(jnp.exp(logits - mx), axis=-1, keepdims=True)) + mx  # (B*T, 1)
    tgt_logit = jnp.sum(logits * onehot_ref[...], axis=-1, keepdims=True)      # (B*T, 1)
    nll = lse - tgt_logit
    loss = jnp.sum(nll * tokw_ref[...])
    loss_ref[...] = jnp.full((1, 1), loss, dtype=jnp.float32)


def fused_forward(img, txt, onehot, tokw, p):
    ins = [img, txt,
           p["g1"], p["b1"], p["wq"], p["wk"], p["wv"], p["wo"],
           p["g2"], p["b2"], p["w1"], p["w2"],
           p["gf"], p["bf"], p["wh"],
           onehot, tokw]
    vmem = lambda: pl.BlockSpec(memory_space=pltpu.MemorySpace.VMEM)
    return pl.pallas_call(
        _fused_forward_kernel,
        out_shape=(jax.ShapeDtypeStruct((B, MAX_TEXT_LEN, VOCAB), jnp.float32),
                   jax.ShapeDtypeStruct((1, 1), jnp.float32)),
        in_specs=[vmem() for _ in ins],
        out_specs=(vmem(), vmem()),
    )(*ins)


# ---------------- parameter init (deterministic, synthetic, stacked per layer) ----------------
def init_params(key):
    def nrm(k, shape):
        return 0.02 * jax.random.normal(k, shape, jnp.float32)

    kq, kk, kv, ko, k1, k2, kh = jax.random.split(key, 7)

    wq = nrm(kq, (NUM_LAYERS, D, D))
    wk = nrm(kk, (NUM_LAYERS, D, D))
    wv = nrm(kv, (NUM_LAYERS, D, D))
    wo = nrm(ko, (NUM_LAYERS, D, D))
    # pre-split per head so the kernel never lane-slices or concatenates:
    #   q/k/v: (L,D,D) -> (L,H,D,Dh)   (output-column split)
    #   wo   : (L,D,D) -> (L,H,Dh,D)   (input-row split; per-head contributions are summed)
    split_cols = lambda w: w.reshape(NUM_LAYERS, D, NUM_HEADS, HEAD_DIM).transpose(0, 2, 1, 3)
    split_rows = lambda w: w.reshape(NUM_LAYERS, NUM_HEADS, HEAD_DIM, D)

    return {
        "g1": jnp.ones((NUM_LAYERS, 1, D), jnp.float32),
        "b1": jnp.zeros((NUM_LAYERS, 1, D), jnp.float32),
        "wq": split_cols(wq).astype(jnp.bfloat16),
        "wk": split_cols(wk).astype(jnp.bfloat16),
        "wv": split_cols(wv).astype(jnp.bfloat16),
        "wo": split_rows(wo).astype(jnp.bfloat16),
        "g2": jnp.ones((NUM_LAYERS, 1, D), jnp.float32),
        "b2": jnp.zeros((NUM_LAYERS, 1, D), jnp.float32),
        "w1": nrm(k1, (NUM_LAYERS, D, FFN)).astype(jnp.bfloat16),
        "w2": nrm(k2, (NUM_LAYERS, FFN, D)).astype(jnp.bfloat16),
        "gf": jnp.ones((1, D), jnp.float32),
        "bf": jnp.zeros((1, D), jnp.float32),
        "wh": nrm(kh, (D, VOCAB)).astype(jnp.bfloat16),
    }


# ---------------- full forward (tiny glue in JAX, everything hot in one Pallas kernel) ----------------
def img_caption_forward(params, img_feature, text_feature, text_mask,
                        batch_target_text_token, target_text_mask_tensor, bos_embedding):
    # bos_embedding is viewed/expanded in the reference forward but never consumed afterwards.
    _ = jnp.broadcast_to(bos_embedding.reshape(1, 1, -1), (img_feature.shape[0], 1, D))
    del text_mask  # not used in the reference forward path

    Bq = img_feature.shape[0]
    lengths = jnp.max(target_text_mask_tensor, axis=1).astype(jnp.int32)        # (B,)
    tgt = batch_target_text_token.astype(jnp.int32)                             # (B, T)
    onehot = (tgt[..., None] == jnp.arange(VOCAB, dtype=jnp.int32)).astype(jnp.float32)
    pos = jnp.arange(MAX_TEXT_LEN, dtype=jnp.int32)[None, :]
    valid = (pos < lengths[:, None]).astype(jnp.float32)                        # (B, T)
    denom = jnp.maximum(lengths, 1).astype(jnp.float32)
    # per-token weight folds in the per-sample 1/len mean and the final 1/B mean;
    # samples with length == 0 get zero weight (the torch `continue` branch, then /B).
    tokw = valid / denom[:, None] / jnp.float32(Bq)

    batch_text_logits, loss = fused_forward(
        img_feature, text_feature,
        onehot.reshape(Bq * MAX_TEXT_LEN, VOCAB),
        tokw.reshape(Bq * MAX_TEXT_LEN, 1),
        params)
    return batch_text_logits, loss[0, 0]


if __name__ == "__main__":
    key = jax.random.PRNGKey(0)
    k_img, k_txt, k_tok, k_bos, k_par = jax.random.split(key, 5)

    img_feature = jax.random.normal(k_img, (B, IMG_PATCHES, D), jnp.float32)
    text_feature = jax.random.normal(k_txt, (B, MAX_TEXT_LEN, D), jnp.float32)
    text_mask_in = jnp.ones((B, MAX_TEXT_LEN, 1), jnp.float32)
    batch_target_text_token = jax.random.randint(k_tok, (B, MAX_TEXT_LEN), 0, VOCAB).astype(jnp.int32)
    # target_text_mask_tensor rows hold running positions 1..n (so max() == valid length)
    lengths_true = jnp.array([6, 3], dtype=jnp.int32)
    pos_row = jnp.arange(1, MAX_TEXT_LEN + 1, dtype=jnp.int32)[None, :]
    target_text_mask_tensor = jnp.where(
        jnp.arange(MAX_TEXT_LEN)[None, :] < lengths_true[:, None], pos_row, 0)
    bos_embedding = jax.random.normal(k_bos, (D,), jnp.float32)

    params = init_params(k_par)

    fwd = jax.jit(functools.partial(img_caption_forward, params))
    batch_text_logits, batch_text_loss = fwd(
        img_feature, text_feature, text_mask_in,
        batch_target_text_token, target_text_mask_tensor, bos_embedding)
    jax.block_until_ready((batch_text_logits, batch_text_loss))

    assert batch_text_logits.shape == (B, MAX_TEXT_LEN, VOCAB)
    assert batch_text_loss.shape == ()
    print("KERNEL_OK")
</pallas_src>

<mosaic_0001>
module attributes {stable_mosaic.version = 11 : i64} {
  func.func @_fused_forward_kernel(%arg0: memref<2x8x32xf32, #tpu.memory_space<vmem>>, %arg1: memref<2x8x32xf32, #tpu.memory_space<vmem>>, %arg2: memref<2x1x32xf32, #tpu.memory_space<vmem>>, %arg3: memref<2x1x32xf32, #tpu.memory_space<vmem>>, %arg4: memref<2x4x32x8xbf16, #tpu.memory_space<vmem>>, %arg5: memref<2x4x32x8xbf16, #tpu.memory_space<vmem>>, %arg6: memref<2x4x32x8xbf16, #tpu.memory_space<vmem>>, %arg7: memref<2x4x8x32xbf16, #tpu.memory_space<vmem>>, %arg8: memref<2x1x32xf32, #tpu.memory_space<vmem>>, %arg9: memref<2x1x32xf32, #tpu.memory_space<vmem>>, %arg10: memref<2x32x128xbf16, #tpu.memory_space<vmem>>, %arg11: memref<2x128x32xbf16, #tpu.memory_space<vmem>>, %arg12: memref<1x32xf32, #tpu.memory_space<vmem>>, %arg13: memref<1x32xf32, #tpu.memory_space<vmem>>, %arg14: memref<32x128xbf16, #tpu.memory_space<vmem>>, %arg15: memref<16x128xf32, #tpu.memory_space<vmem>>, %arg16: memref<16x1xf32, #tpu.memory_space<vmem>>, %arg17: memref<2x8x128xf32, #tpu.memory_space<vmem>>, %arg18: memref<1x1xf32, #tpu.memory_space<vmem>>) attributes {dimension_semantics = [], scalar_prefetch = 0 : i64, scratch_operands = 0 : i64, tpu.core_type = #tpu.core_type<tc>} {
    %c0 = arith.constant 0 : index
    %c0_0 = arith.constant 0 : index
    %c0_1 = arith.constant 0 : index
    %0 = vector.load %arg0[%c0, %c0_0, %c0_1] : memref<2x8x32xf32, #tpu.memory_space<vmem>>, vector<2x8x32xf32>
    %c0_2 = arith.constant 0 : index
    %c0_3 = arith.constant 0 : index
    %c0_4 = arith.constant 0 : index
    %1 = vector.load %arg1[%c0_2, %c0_3, %c0_4] : memref<2x8x32xf32, #tpu.memory_space<vmem>>, vector<2x8x32xf32>
    %2 = tpu.concatenate %0, %1 in 1 : vector<2x8x32xf32>, vector<2x8x32xf32> -> vector<2x16x32xf32>
    %3 = vector.shape_cast %2 : vector<2x16x32xf32> to vector<32x32xf32>
    %4 = tpu.iota {dimensions = array<i32: 0>} : vector<16x16xi32>
    %5 = tpu.iota {dimensions = array<i32: 1>} : vector<16x16xi32>
    %c8_i32 = arith.constant 8 : i32
    %6 = vector.broadcast %c8_i32 : i32 to vector<16x16xi32>
    %7 = arith.cmpi slt, %4, %6 : vector<16x16xi32>
    %8 = arith.cmpi sle, %5, %4 : vector<16x16xi32>
    %9 = arith.ori %7, %8 : vector<16x16xi1>
    %cst = arith.constant 0.000000e+00 : f32
    %cst_5 = arith.constant -1.000000e+30 : f32
    %10 = vector.broadcast %cst : f32 to vector<16x16xf32>
    %11 = vector.broadcast %cst_5 : f32 to vector<16x16xf32>
    %12 = arith.select %9, %10, %11 : vector<16x16xi1>, vector<16x16xf32>
    %13 = vector.shape_cast %12 : vector<16x16xf32> to vector<1x16x16xf32>
    %14 = vector.shape_cast %13 : vector<1x16x16xf32> to vector<1x16x16xf32>
    %15 = vector.broadcast %14 : vector<1x16x16xf32> to vector<2x16x16xf32>
    %c0_6 = arith.constant 0 : index
    %c0_7 = arith.constant 0 : index
    %c0_8 = arith.constant 0 : index
    %16 = vector.load %arg2[%c0_6, %c0_7, %c0_8] : memref<2x1x32xf32, #tpu.memory_space<vmem>>, vector<1x1x32xf32>
    %17 = vector.shape_cast %16 : vector<1x1x32xf32> to vector<1x32xf32>
    %c0_9 = arith.constant 0 : index
    %c0_10 = arith.constant 0 : index
    %c0_11 = arith.constant 0 : index
    %18 = vector.load %arg3[%c0_9, %c0_10, %c0_11] : memref<2x1x32xf32, #tpu.memory_space<vmem>>, vector<1x1x32xf32>
    %19 = vector.shape_cast %18 : vector<1x1x32xf32> to vector<1x32xf32>
    %cst_12 = arith.constant dense<0.000000e+00> : vector<32xf32>
    %20 = vector.multi_reduction <add>, %3, %cst_12 [1] : vector<32x32xf32> to vector<32xf32>
    %21 = vector.shape_cast %20 : vector<32xf32> to vector<32x1xf32>
    %cst_13 = arith.constant 3.200000e+01 : f32
    %22 = vector.broadcast %cst_13 : f32 to vector<32x1xf32>
    %23 = arith.divf %21, %22 : vector<32x1xf32>
    %24 = vector.broadcast %23 : vector<32x1xf32> to vector<32x32xf32>
    %25 = arith.subf %3, %24 : vector<32x32xf32>
    %26 = arith.mulf %25, %25 : vector<32x32xf32>
    %cst_14 = arith.constant dense<0.000000e+00> : vector<32xf32>
    %27 = vector.multi_reduction <add>, %26, %cst_14 [1] : vector<32x32xf32> to vector<32xf32>
    %28 = vector.shape_cast %27 : vector<32xf32> to vector<32x1xf32>
    %cst_15 = arith.constant 3.200000e+01 : f32
    %29 = vector.broadcast %cst_15 : f32 to vector<32x1xf32>
    %30 = arith.divf %28, %29 : vector<32x1xf32>
    %31 = vector.broadcast %23 : vector<32x1xf32> to vector<32x32xf32>
    %32 = arith.subf %3, %31 : vector<32x32xf32>
    %cst_16 = arith.constant 9.99999974E-6 : f32
    %33 = vector.broadcast %cst_16 : f32 to vector<32x1xf32>
    %34 = arith.addf %30, %33 : vector<32x1xf32>
    %35 = math.rsqrt %34 : vector<32x1xf32>
    %36 = vector.broadcast %35 : vector<32x1xf32> to vector<32x32xf32>
    %37 = arith.mulf %32, %36 : vector<32x32xf32>
    %38 = vector.broadcast %17 : vector<1x32xf32> to vector<32x32xf32>
    %39 = arith.mulf %37, %38 : vector<32x32xf32>
    %40 = vector.broadcast %19 : vector<1x32xf32> to vector<32x32xf32>
    %41 = arith.addf %39, %40 : vector<32x32xf32>
    %42 = arith.truncf %41 : vector<32x32xf32> to vector<32x32xbf16>
    %cst_17 = arith.constant 0.000000e+00 : f32
    %43 = vector.broadcast %cst_17 : f32 to vector<32x32xf32>
    %c0_18 = arith.constant 0 : index
    %c0_19 = arith.constant 0 : index
    %c0_20 = arith.constant 0 : index
    %c0_21 = arith.constant 0 : index
    %44 = vector.load %arg4[%c0_18, %c0_19, %c0_20, %c0_21] : memref<2x4x32x8xbf16, #tpu.memory_space<vmem>>, vector<1x1x32x8xbf16>
    %45 = vector.shape_cast %44 : vector<1x1x32x8xbf16> to vector<32x8xbf16>
    %cst_22 = arith.constant dense<0.000000e+00> : vector<32x8xf32>
    %46 = tpu.matmul %42, %45, %cst_22 {dimension_numbers = #tpu.dot_dimension_numbers<[1], [0], [0], [1], [0, 0, 1, 1], [], []>} : vector<32x32xbf16>, vector<32x8xbf16>, vector<32x8xf32> -> vector<32x8xf32>
    %c0_23 = arith.constant 0 : index
    %c0_24 = arith.constant 0 : index
    %c0_25 = arith.constant 0 : index
    %c0_26 = arith.constant 0 : index
    %47 = vector.load %arg5[%c0_23, %c0_24, %c0_25, %c0_26] : memref<2x4x32x8xbf16, #tpu.memory_space<vmem>>, vector<1x1x32x8xbf16>
    %48 = vector.shape_cast %47 : vector<1x1x32x8xbf16> to vector<32x8xbf16>
    %cst_27 = arith.constant dense<0.000000e+00> : vector<32x8xf32>
    %49 = tpu.matmul %42, %48, %cst_27 {dimension_numbers = #tpu.dot_dimension_numbers<[1], [0], [0], [1], [0, 0, 1, 1], [], []>} : vector<32x32xbf16>, vector<32x8xbf16>, vector<32x8xf32> -> vector<32x8xf32>
    %c0_28 = arith.constant 0 : index
    %c0_29 = arith.constant 0 : index
    %c0_30 = arith.constant 0 : index
    %c0_31 = arith.constant 0 : index
    %50 = vector.load %arg6[%c0_28, %c0_29, %c0_30, %c0_31] : memref<2x4x32x8xbf16, #tpu.memory_space<vmem>>, vector<1x1x32x8xbf16>
    %51 = vector.shape_cast %50 : vector<1x1x32x8xbf16> to vector<32x8xbf16>
    %cst_32 = arith.constant dense<0.000000e+00> : vector<32x8xf32>
    %52 = tpu.matmul %42, %51, %cst_32 {dimension_numbers = #tpu.dot_dimension_numbers<[1], [0], [0], [1], [0, 0, 1, 1], [], []>} : vector<32x32xbf16>, vector<32x8xbf16>, vector<32x8xf32> -> vector<32x8xf32>
    %53 = vector.shape_cast %46 : vector<32x8xf32> to vector<2x16x8xf32>
    %54 = arith.truncf %53 : vector<2x16x8xf32> to vector<2x16x8xbf16>
    %55 = vector.shape_cast %49 : vector<32x8xf32> to vector<2x16x8xf32>
    %56 = arith.truncf %55 : vector<2x16x8xf32> to vector<2x16x8xbf16>
    %57 = vector.shape_cast %52 : vector<32x8xf32> to vector<2x16x8xf32>
    %58 = arith.truncf %57 : vector<2x16x8xf32> to vector<2x16x8xbf16>
    "tpu.trace_start"() <{level = 10 : i32, message = "bqd,bkd->bqk"}> : () -> ()
    %cst_33 = arith.constant dense<0.000000e+00> : vector<2x16x16xf32>
    %59 = tpu.matmul %54, %56, %cst_33 {dimension_numbers = #tpu.dot_dimension_numbers<[2], [2], [1], [1], [0, 0, 0, 1, 1, 1], [0], [0]>} : vector<2x16x8xbf16>, vector<2x16x8xbf16>, vector<2x16x16xf32> -> vector<2x16x16xf32>
    "tpu.trace_stop"() : () -> ()
    %cst_34 = arith.constant 0.353553385 : f32
    %60 = vector.broadcast %cst_34 : f32 to vector<2x16x16xf32>
    %61 = arith.mulf %59, %60 : vector<2x16x16xf32>
    %62 = arith.addf %61, %15 : vector<2x16x16xf32>
    %cst_35 = arith.constant dense<0xFF800000> : vector<2x16xf32>
    %63 = vector.multi_reduction <maximumf>, %62, %cst_35 [2] : vector<2x16x16xf32> to vector<2x16xf32>
    %64 = vector.shape_cast %63 : vector<2x16xf32> to vector<2x16x1xf32>
    %65 = vector.broadcast %64 : vector<2x16x1xf32> to vector<2x16x16xf32>
    %66 = arith.subf %62, %65 : vector<2x16x16xf32>
    %67 = math.exp %66 : vector<2x16x16xf32>
    %cst_36 = arith.constant dense<0.000000e+00> : vector<2x16xf32>
    %68 = vector.multi_reduction <add>, %67, %cst_36 [2] : vector<2x16x16xf32> to vector<2x16xf32>
    %69 = vector.shape_cast %68 : vector<2x16xf32> to vector<2x16x1xf32>
    %70 = tpu.reciprocal %69 {approx = true} : vector<2x16x1xf32> -> vector<2x16x1xf32>
    %71 = vector.broadcast %70 : vector<2x16x1xf32> to vector<2x16x16xf32>
    %72 = arith.mulf %67, %71 : vector<2x16x16xf32>
    %73 = arith.truncf %72 : vector<2x16x16xf32> to vector<2x16x16xbf16>
    "tpu.trace_start"() <{level = 10 : i32, message = "bqk,bkd->bqd"}> : () -> ()
    %cst_37 = arith.constant dense<0.000000e+00> : vector<2x16x8xf32>
    %74 = tpu.matmul %73, %58, %cst_37 {dimension_numbers = #tpu.dot_dimension_numbers<[2], [1], [1], [2], [0, 0, 0, 1, 1, 2], [0], [0]>} : vector<2x16x16xbf16>, vector<2x16x8xbf16>, vector<2x16x8xf32> -> vector<2x16x8xf32>
    "tpu.trace_stop"() : () -> ()
    %75 = vector.shape_cast %74 : vector<2x16x8xf32> to vector<32x8xf32>
    %76 = arith.truncf %75 : vector<32x8xf32> to vector<32x8xbf16>
    %c0_38 = arith.constant 0 : index
    %c0_39 = arith.constant 0 : index
    %c0_40 = arith.constant 0 : index
    %c0_41 = arith.constant 0 : index
    %77 = vector.load %arg7[%c0_38, %c0_39, %c0_40, %c0_41] : memref<2x4x8x32xbf16, #tpu.memory_space<vmem>>, vector<1x1x8x32xbf16>
    %78 = vector.shape_cast %77 : vector<1x1x8x32xbf16> to vector<8x32xbf16>
    %cst_42 = arith.constant dense<0.000000e+00> : vector<32x32xf32>
    %79 = tpu.matmul %76, %78, %cst_42 {dimension_numbers = #tpu.dot_dimension_numbers<[1], [0], [0], [1], [0, 0, 1, 1], [], []>} : vector<32x8xbf16>, vector<8x32xbf16>, vector<32x32xf32> -> vector<32x32xf32>
    %80 = arith.addf %43, %79 : vector<32x32xf32>
    %c0_43 = arith.constant 0 : index
    %c1 = arith.constant 1 : index
    %c0_44 = arith.constant 0 : index
    %c0_45 = arith.constant 0 : index
    %81 = vector.load %arg4[%c0_43, %c1, %c0_44, %c0_45] : memref<2x4x32x8xbf16, #tpu.memory_space<vmem>>, vector<1x1x32x8xbf16>
    %82 = vector.shape_cast %81 : vector<1x1x32x8xbf16> to vector<32x8xbf16>
    %cst_46 = arith.constant dense<0.000000e+00> : vector<32x8xf32>
    %83 = tpu.matmul %42, %82, %cst_46 {dimension_numbers = #tpu.dot_dimension_numbers<[1], [0], [0], [1], [0, 0, 1, 1], [], []>} : vector<32x32xbf16>, vector<32x8xbf16>, vector<32x8xf32> -> vector<32x8xf32>
    %c0_47 = arith.constant 0 : index
    %c1_48 = arith.constant 1 : index
    %c0_49 = arith.constant 0 : index
    %c0_50 = arith.constant 0 : index
    %84 = vector.load %arg5[%c0_47, %c1_48, %c0_49, %c0_50] : memref<2x4x32x8xbf16, #tpu.memory_space<vmem>>, vector<1x1x32x8xbf16>
    %85 = vector.shape_cast %84 : vector<1x1x32x8xbf16> to vector<32x8xbf16>
    %cst_51 = arith.constant dense<0.000000e+00> : vector<32x8xf32>
    %86 = tpu.matmul %42, %85, %cst_51 {dimension_numbers = #tpu.dot_dimension_numbers<[1], [0], [0], [1], [0, 0, 1, 1], [], []>} : vector<32x32xbf16>, vector<32x8xbf16>, vector<32x8xf32> -> vector<32x8xf32>
    %c0_52 = arith.constant 0 : index
    %c1_53 = arith.constant 1 : index
    %c0_54 = arith.constant 0 : index
    %c0_55 = arith.constant 0 : index
    %87 = vector.load %arg6[%c0_52, %c1_53, %c0_54, %c0_55] : memref<2x4x32x8xbf16, #tpu.memory_space<vmem>>, vector<1x1x32x8xbf16>
    %88 = vector.shape_cast %87 : vector<1x1x32x8xbf16> to vector<32x8xbf16>
    %cst_56 = arith.constant dense<0.000000e+00> : vector<32x8xf32>
    %89 = tpu.matmul %42, %88, %cst_56 {dimension_numbers = #tpu.dot_dimension_numbers<[1], [0], [0], [1], [0, 0, 1, 1], [], []>} : vector<32x32xbf16>, vector<32x8xbf16>, vector<32x8xf32> -> vector<32x8xf32>
    %90 = vector.shape_cast %83 : vector<32x8xf32> to vector<2x16x8xf32>
    %91 = arith.truncf %90 : vector<2x16x8xf32> to vector<2x16x8xbf16>
    %92 = vector.shape_cast %86 : vector<32x8xf32> to vector<2x16x8xf32>
    %93 = arith.truncf %92 : vector<2x16x8xf32> to vector<2x16x8xbf16>
    %94 = vector.shape_cast %89 : vector<32x8xf32> to vector<2x16x8xf32>
    %95 = arith.truncf %94 : vector<2x16x8xf32> to vector<2x16x8xbf16>
    "tpu.trace_start"() <{level = 10 : i32, message = "bqd,bkd->bqk"}> : () -> ()
    %cst_57 = arith.constant dense<0.000000e+00> : vector<2x16x16xf32>
    %96 = tpu.matmul %91, %93, %cst_57 {dimension_numbers = #tpu.dot_dimension_numbers<[2], [2], [1], [1], [0, 0, 0, 1, 1, 1], [0], [0]>} : vector<2x16x8xbf16>, vector<2x16x8xbf16>, vector<2x16x16xf32> -> vector<2x16x16xf32>
    "tpu.trace_stop"() : () -> ()
    %cst_58 = arith.constant 0.353553385 : f32
    %97 = vector.broadcast %cst_58 : f32 to vector<2x16x16xf32>
    %98 = arith.mulf %96, %97 : vector<2x16x16xf32>
    %99 = arith.addf %98, %15 : vector<2x16x16xf32>
    %cst_59 = arith.constant dense<0xFF800000> : vector<2x16xf32>
    %100 = vector.multi_reduction <maximumf>, %99, %cst_59 [2] : vector<2x16x16xf32> to vector<2x16xf32>
    %101 = vector.shape_cast %100 : vector<2x16xf32> to vector<2x16x1xf32>
    %102 = vector.broadcast %101 : vector<2x16x1xf32> to vector<2x16x16xf32>
    %103 = arith.subf %99, %102 : vector<2x16x16xf32>
    %104 = math.exp %103 : vector<2x16x16xf32>
    %cst_60 = arith.constant dense<0.000000e+00> : vector<2x16xf32>
    %105 = vector.multi_reduction <add>, %104, %cst_60 [2] : vector<2x16x16xf32> to vector<2x16xf32>
    %106 = vector.shape_cast %105 : vector<2x16xf32> to vector<2x16x1xf32>
    %107 = tpu.reciprocal %106 {approx = true} : vector<2x16x1xf32> -> vector<2x16x1xf32>
    %108 = vector.broadcast %107 : vector<2x16x1xf32> to vector<2x16x16xf32>
    %109 = arith.mulf %104, %108 : vector<2x16x16xf32>
    %110 = arith.truncf %109 : vector<2x16x16xf32> to vector<2x16x16xbf16>
    "tpu.trace_start"() <{level = 10 : i32, message = "bqk,bkd->bqd"}> : () -> ()
    %cst_61 = arith.constant dense<0.000000e+00> : vector<2x16x8xf32>
    %111 = tpu.matmul %110, %95, %cst_61 {dimension_numbers = #tpu.dot_dimension_numbers<[2], [1], [1], [2], [0, 0, 0, 1, 1, 2], [0], [0]>} : vector<2x16x16xbf16>, vector<2x16x8xbf16>, vector<2x16x8xf32> -> vector<2x16x8xf32>
    "tpu.trace_stop"() : () -> ()
    %112 = vector.shape_cast %111 : vector<2x16x8xf32> to vector<32x8xf32>
    %113 = arith.truncf %112 : vector<32x8xf32> to vector<32x8xbf16>
    %c0_62 = arith.constant 0 : index
    %c1_63 = arith.constant 1 : index
    %c0_64 = arith.constant 0 : index
    %c0_65 = arith.constant 0 : index
    %114 = vector.load %arg7[%c0_62, %c1_63, %c0_64, %c0_65] : memref<2x4x8x32xbf16, #tpu.memory_space<vmem>>, vector<1x1x8x32xbf16>
    %115 = vector.shape_cast %114 : vector<1x1x8x32xbf16> to vector<8x32xbf16>
    %cst_66 = arith.constant dense<0.000000e+00> : vector<32x32xf32>
    %116 = tpu.matmul %113, %115, %cst_66 {dimension_numbers = #tpu.dot_dimension_numbers<[1], [0], [0], [1], [0, 0, 1, 1], [], []>} : vector<32x8xbf16>, vector<8x32xbf16>, vector<32x32xf32> -> vector<32x32xf32>
    %117 = arith.addf %80, %116 : vector<32x32xf32>
    %c0_67 = arith.constant 0 : index
    %c2 = arith.constant 2 : index
    %c0_68 = arith.constant 0 : index
    %c0_69 = arith.constant 0 : index
    %118 = vector.load %arg4[%c0_67, %c2, %c0_68, %c0_69] : memref<2x4x32x8xbf16, #tpu.memory_space<vmem>>, vector<1x1x32x8xbf16>
    %119 = vector.shape_cast %118 : vector<1x1x32x8xbf16> to vector<32x8xbf16>
    %cst_70 = arith.constant dense<0.000000e+00> : vector<32x8xf32>
    %120 = tpu.matmul %42, %119, %cst_70 {dimension_numbers = #tpu.dot_dimension_numbers<[1], [0], [0], [1], [0, 0, 1, 1], [], []>} : vector<32x32xbf16>, vector<32x8xbf16>, vector<32x8xf32> -> vector<32x8xf32>
    %c0_71 = arith.constant 0 : index
    %c2_72 = arith.constant 2 : index
    %c0_73 = arith.constant 0 : index
    %c0_74 = arith.constant 0 : index
    %121 = vector.load %arg5[%c0_71, %c2_72, %c0_73, %c0_74] : memref<2x4x32x8xbf16, #tpu.memory_space<vmem>>, vector<1x1x32x8xbf16>
    %122 = vector.shape_cast %121 : vector<1x1x32x8xbf16> to vector<32x8xbf16>
    %cst_75 = arith.constant dense<0.000000e+00> : vector<32x8xf32>
    %123 = tpu.matmul %42, %122, %cst_75 {dimension_numbers = #tpu.dot_dimension_numbers<[1], [0], [0], [1], [0, 0, 1, 1], [], []>} : vector<32x32xbf16>, vector<32x8xbf16>, vector<32x8xf32> -> vector<32x8xf32>
    %c0_76 = arith.constant 0 : index
    %c2_77 = arith.constant 2 : index
    %c0_78 = arith.constant 0 : index
    %c0_79 = arith.constant 0 : index
    %124 = vector.load %arg6[%c0_76, %c2_77, %c0_78, %c0_79] : memref<2x4x32x8xbf16, #tpu.memory_space<vmem>>, vector<1x1x32x8xbf16>
    %125 = vector.shape_cast %124 : vector<1x1x32x8xbf16> to vector<32x8xbf16>
    %cst_80 = arith.constant dense<0.000000e+00> : vector<32x8xf32>
    %126 = tpu.matmul %42, %125, %cst_80 {dimension_numbers = #tpu.dot_dimension_numbers<[1], [0], [0], [1], [0, 0, 1, 1], [], []>} : vector<32x32xbf16>, vector<32x8xbf16>, vector<32x8xf32> -> vector<32x8xf32>
    %127 = vector.shape_cast %120 : vector<32x8xf32> to vector<2x16x8xf32>
    %128 = arith.truncf %127 : vector<2x16x8xf32> to vector<2x16x8xbf16>
    %129 = vector.shape_cast %123 : vector<32x8xf32> to vector<2x16x8xf32>
    %130 = arith.truncf %129 : vector<2x16x8xf32> to vector<2x16x8xbf16>
    %131 = vector.shape_cast %126 : vector<32x8xf32> to vector<2x16x8xf32>
    %132 = arith.truncf %131 : vector<2x16x8xf32> to vector<2x16x8xbf16>
    "tpu.trace_start"() <{level = 10 : i32, message = "bqd,bkd->bqk"}> : () -> ()
    %cst_81 = arith.constant dense<0.000000e+00> : vector<2x16x16xf32>
    %133 = tpu.matmul %128, %130, %cst_81 {dimension_numbers = #tpu.dot_dimension_numbers<[2], [2], [1], [1], [0, 0, 0, 1, 1, 1], [0], [0]>} : vector<2x16x8xbf16>, vector<2x16x8xbf16>, vector<2x16x16xf32> -> vector<2x16x16xf32>
    "tpu.trace_stop"() : () -> ()
    %cst_82 = arith.constant 0.353553385 : f32
    %134 = vector.broadcast %cst_82 : f32 to vector<2x16x16xf32>
    %135 = arith.mulf %133, %134 : vector<2x16x16xf32>
    %136 = arith.addf %135, %15 : vector<2x16x16xf32>
    %cst_83 = arith.constant dense<0xFF800000> : vector<2x16xf32>
    %137 = vector.multi_reduction <maximumf>, %136, %cst_83 [2] : vector<2x16x16xf32> to vector<2x16xf32>
    %138 = vector.shape_cast %137 : vector<2x16xf32> to vector<2x16x1xf32>
    %139 = vector.broadcast %138 : vector<2x16x1xf32> to vector<2x16x16xf32>
    %140 = arith.subf %136, %139 : vector<2x16x16xf32>
    %141 = math.exp %140 : vector<2x16x16xf32>
    %cst_84 = arith.constant dense<0.000000e+00> : vector<2x16xf32>
    %142 = vector.multi_reduction <add>, %141, %cst_84 [2] : vector<2x16x16xf32> to vector<2x16xf32>
    %143 = vector.shape_cast %142 : vector<2x16xf32> to vector<2x16x1xf32>
    %144 = tpu.reciprocal %143 {approx = true} : vector<2x16x1xf32> -> vector<2x16x1xf32>
    %145 = vector.broadcast %144 : vector<2x16x1xf32> to vector<2x16x16xf32>
    %146 = arith.mulf %141, %145 : vector<2x16x16xf32>
    %147 = arith.truncf %146 : vector<2x16x16xf32> to vector<2x16x16xbf16>
    "tpu.trace_start"() <{level = 10 : i32, message = "bqk,bkd->bqd"}> : () -> ()
    %cst_85 = arith.constant dense<0.000000e+00> : vector<2x16x8xf32>
    %148 = tpu.matmul %147, %132, %cst_85 {dimension_numbers = #tpu.dot_dimension_numbers<[2], [1], [1], [2], [0, 0, 0, 1, 1, 2], [0], [0]>} : vector<2x16x16xbf16>, vector<2x16x8xbf16>, vector<2x16x8xf32> -> vector<2x16x8xf32>
    "tpu.trace_stop"() : () -> ()
    %149 = vector.shape_cast %148 : vector<2x16x8xf32> to vector<32x8xf32>
    %150 = arith.truncf %149 : vector<32x8xf32> to vector<32x8xbf16>
    %c0_86 = arith.constant 0 : index
    %c2_87 = arith.constant 2 : index
    %c0_88 = arith.constant 0 : index
    %c0_89 = arith.constant 0 : index
    %151 = vector.load %arg7[%c0_86, %c2_87, %c0_88, %c0_89] : memref<2x4x8x32xbf16, #tpu.memory_space<vmem>>, vector<1x1x8x32xbf16>
    %152 = vector.shape_cast %151 : vector<1x1x8x32xbf16> to vector<8x32xbf16>
    %cst_90 = arith.constant dense<0.000000e+00> : vector<32x32xf32>
    %153 = tpu.matmul %150, %152, %cst_90 {dimension_numbers = #tpu.dot_dimension_numbers<[1], [0], [0], [1], [0, 0, 1, 1], [], []>} : vector<32x8xbf16>, vector<8x32xbf16>, vector<32x32xf32> -> vector<32x32xf32>
    %154 = arith.addf %117, %153 : vector<32x32xf32>
    %c0_91 = arith.constant 0 : index
    %c3 = arith.constant 3 : index
    %c0_92 = arith.constant 0 : index
    %c0_93 = arith.constant 0 : index
    %155 = vector.load %arg4[%c0_91, %c3, %c0_92, %c0_93] : memref<2x4x32x8xbf16, #tpu.memory_space<vmem>>, vector<1x1x32x8xbf16>
    %156 = vector.shape_cast %155 : vector<1x1x32x8xbf16> to vector<32x8xbf16>
    %cst_94 = arith.constant dense<0.000000e+00> : vector<32x8xf32>
    %157 = tpu.matmul %42, %156, %cst_94 {dimension_numbers = #tpu.dot_dimension_numbers<[1], [0], [0], [1], [0, 0, 1, 1], [], []>} : vector<32x32xbf16>, vector<32x8xbf16>, vector<32x8xf32> -> vector<32x8xf32>
    %c0_95 = arith.constant 0 : index
    %c3_96 = arith.constant 3 : index
    %c0_97 = arith.constant 0 : index
    %c0_98 = arith.constant 0 : index
    %158 = vector.load %arg5[%c0_95, %c3_96, %c0_97, %c0_98] : memref<2x4x32x8xbf16, #tpu.memory_space<vmem>>, vector<1x1x32x8xbf16>
    %159 = vector.shape_cast %158 : vector<1x1x32x8xbf16> to vector<32x8xbf16>
    %cst_99 = arith.constant dense<0.000000e+00> : vector<32x8xf32>
    %160 = tpu.matmul %42, %159, %cst_99 {dimension_numbers = #tpu.dot_dimension_numbers<[1], [0], [0], [1], [0, 0, 1, 1], [], []>} : vector<32x32xbf16>, vector<32x8xbf16>, vector<32x8xf32> -> vector<32x8xf32>
    %c0_100 = arith.constant 0 : index
    %c3_101 = arith.constant 3 : index
    %c0_102 = arith.constant 0 : index
    %c0_103 = arith.constant 0 : index
    %161 = vector.load %arg6[%c0_100, %c3_101, %c0_102, %c0_103] : memref<2x4x32x8xbf16, #tpu.memory_space<vmem>>, vector<1x1x32x8xbf16>
    %162 = vector.shape_cast %161 : vector<1x1x32x8xbf16> to vector<32x8xbf16>
    %cst_104 = arith.constant dense<0.000000e+00> : vector<32x8xf32>
    %163 = tpu.matmul %42, %162, %cst_104 {dimension_numbers = #tpu.dot_dimension_numbers<[1], [0], [0], [1], [0, 0, 1, 1], [], []>} : vector<32x32xbf16>, vector<32x8xbf16>, vector<32x8xf32> -> vector<32x8xf32>
    %164 = vector.shape_cast %157 : vector<32x8xf32> to vector<2x16x8xf32>
    %165 = arith.truncf %164 : vector<2x16x8xf32> to vector<2x16x8xbf16>
    %166 = vector.shape_cast %160 : vector<32x8xf32> to vector<2x16x8xf32>
    %167 = arith.truncf %166 : vector<2x16x8xf32> to vector<2x16x8xbf16>
    %168 = vector.shape_cast %163 : vector<32x8xf32> to vector<2x16x8xf32>
    %169 = arith.truncf %168 : vector<2x16x8xf32> to vector<2x16x8xbf16>
    "tpu.trace_start"() <{level = 10 : i32, message = "bqd,bkd->bqk"}> : () -> ()
    %cst_105 = arith.constant dense<0.000000e+00> : vector<2x16x16xf32>
    %170 = tpu.matmul %165, %167, %cst_105 {dimension_numbers = #tpu.dot_dimension_numbers<[2], [2], [1], [1], [0, 0, 0, 1, 1, 1], [0], [0]>} : vector<2x16x8xbf16>, vector<2x16x8xbf16>, vector<2x16x16xf32> -> vector<2x16x16xf32>
    "tpu.trace_stop"() : () -> ()
    %cst_106 = arith.constant 0.353553385 : f32
    %171 = vector.broadcast %cst_106 : f32 to vector<2x16x16xf32>
    %172 = arith.mulf %170, %171 : vector<2x16x16xf32>
    %173 = arith.addf %172, %15 : vector<2x16x16xf32>
    %cst_107 = arith.constant dense<0xFF800000> : vector<2x16xf32>
    %174 = vector.multi_reduction <maximumf>, %173, %cst_107 [2] : vector<2x16x16xf32> to vector<2x16xf32>
    %175 = vector.shape_cast %174 : vector<2x16xf32> to vector<2x16x1xf32>
    %176 = vector.broadcast %175 : vector<2x16x1xf32> to vector<2x16x16xf32>
    %177 = arith.subf %173, %176 : vector<2x16x16xf32>
    %178 = math.exp %177 : vector<2x16x16xf32>
    %cst_108 = arith.constant dense<0.000000e+00> : vector<2x16xf32>
    %179 = vector.multi_reduction <add>, %178, %cst_108 [2] : vector<2x16x16xf32> to vector<2x16xf32>
    %180 = vector.shape_cast %179 : vector<2x16xf32> to vector<2x16x1xf32>
    %181 = tpu.reciprocal %180 {approx = true} : vector<2x16x1xf32> -> vector<2x16x1xf32>
    %182 = vector.broadcast %181 : vector<2x16x1xf32> to vector<2x16x16xf32>
    %183 = arith.mulf %178, %182 : vector<2x16x16xf32>
    %184 = arith.truncf %183 : vector<2x16x16xf32> to vector<2x16x16xbf16>
    "tpu.trace_start"() <{level = 10 : i32, message = "bqk,bkd->bqd"}> : () -> ()
    %cst_109 = arith.constant dense<0.000000e+00> : vector<2x16x8xf32>
    %185 = tpu.matmul %184, %169, %cst_109 {dimension_numbers = #tpu.dot_dimension_numbers<[2], [1], [1], [2], [0, 0, 0, 1, 1, 2], [0], [0]>} : vector<2x16x16xbf16>, vector<2x16x8xbf16>, vector<2x16x8xf32> -> vector<2x16x8xf32>
    "tpu.trace_stop"() : () -> ()
    %186 = vector.shape_cast %185 : vector<2x16x8xf32> to vector<32x8xf32>
    %187 = arith.truncf %186 : vector<32x8xf32> to vector<32x8xbf16>
    %c0_110 = arith.constant 0 : index
    %c3_111 = arith.constant 3 : index
    %c0_112 = arith.constant 0 : index
    %c0_113 = arith.constant 0 : index
    %188 = vector.load %arg7[%c0_110, %c3_111, %c0_112, %c0_113] : memref<2x4x8x32xbf16, #tpu.memory_space<vmem>>, vector<1x1x8x32xbf16>
    %189 = vector.shape_cast %188 : vector<1x1x8x32xbf16> to vector<8x32xbf16>
    %cst_114 = arith.constant dense<0.000000e+00> : vector<32x32xf32>
    %190 = tpu.matmul %187, %189, %cst_114 {dimension_numbers = #tpu.dot_dimension_numbers<[1], [0], [0], [1], [0, 0, 1, 1], [], []>} : vector<32x8xbf16>, vector<8x32xbf16>, vector<32x32xf32> -> vector<32x32xf32>
    %191 = arith.addf %154, %190 : vector<32x32xf32>
    %192 = arith.addf %3, %191 : vector<32x32xf32>
    %c0_115 = arith.constant 0 : index
    %c0_116 = arith.constant 0 : index
    %c0_117 = arith.constant 0 : index
    %193 = vector.load %arg8[%c0_115, %c0_116, %c0_117] : memref<2x1x32xf32, #tpu.memory_space<vmem>>, vector<1x1x32xf32>
    %194 = vector.shape_cast %193 : vector<1x1x32xf32> to vector<1x32xf32>
    %c0_118 = arith.constant 0 : index
    %c0_119 = arith.constant 0 : index
    %c0_120 = arith.constant 0 : index
    %195 = vector.load %arg9[%c0_118, %c0_119, %c0_120] : memref<2x1x32xf32, #tpu.memory_space<vmem>>, vector<1x1x32xf32>
    %196 = vector.shape_cast %195 : vector<1x1x32xf32> to vector<1x32xf32>
    %cst_121 = arith.constant dense<0.000000e+00> : vector<32xf32>
    %197 = vector.multi_reduction <add>, %192, %cst_121 [1] : vector<32x32xf32> to vector<32xf32>
    %198 = vector.shape_cast %197 : vector<32xf32> to vector<32x1xf32>
    %cst_122 = arith.constant 3.200000e+01 : f32
    %199 = vector.broadcast %cst_122 : f32 to vector<32x1xf32>
    %200 = arith.divf %198, %199 : vector<32x1xf32>
    %201 = vector.broadcast %200 : vector<32x1xf32> to vector<32x32xf32>
    %202 = arith.subf %192, %201 : vector<32x32xf32>
    %203 = arith.mulf %202, %202 : vector<32x32xf32>
    %cst_123 = arith.constant dense<0.000000e+00> : vector<32xf32>
    %204 = vector.multi_reduction <add>, %203, %cst_123 [1] : vector<32x32xf32> to vector<32xf32>
    %205 = vector.shape_cast %204 : vector<32xf32> to vector<32x1xf32>
    %cst_124 = arith.constant 3.200000e+01 : f32
    %206 = vector.broadcast %cst_124 : f32 to vector<32x1xf32>
    %207 = arith.divf %205, %206 : vector<32x1xf32>
    %208 = vector.broadcast %200 : vector<32x1xf32> to vector<32x32xf32>
    %209 = arith.subf %192, %208 : vector<32x32xf32>
    %cst_125 = arith.constant 9.99999974E-6 : f32
    %210 = vector.broadcast %cst_125 : f32 to vector<32x1xf32>
    %211 = arith.addf %207, %210 : vector<32x1xf32>
    %212 = math.rsqrt %211 : vector<32x1xf32>
    %213 = vector.broadcast %212 : vector<32x1xf32> to vector<32x32xf32>
    %214 = arith.mulf %209, %213 : vector<32x32xf32>
    %215 = vector.broadcast %194 : vector<1x32xf32> to vector<32x32xf32>
    %216 = arith.mulf %214, %215 : vector<32x32xf32>
    %217 = vector.broadcast %196 : vector<1x32xf32> to vector<32x32xf32>
    %218 = arith.addf %216, %217 : vector<32x32xf32>
    %219 = arith.truncf %218 : vector<32x32xf32> to vector<32x32xbf16>
    %c0_126 = arith.constant 0 : index
    %c0_127 = arith.constant 0 : index
    %c0_128 = arith.constant 0 : index
    %220 = vector.load %arg10[%c0_126, %c0_127, %c0_128] : memref<2x32x128xbf16, #tpu.memory_space<vmem>>, vector<1x32x128xbf16>
    %221 = vector.shape_cast %220 : vector<1x32x128xbf16> to vector<32x128xbf16>
    %cst_129 = arith.constant dense<0.000000e+00> : vector<32x128xf32>
    %222 = tpu.matmul %219, %221, %cst_129 {dimension_numbers = #tpu.dot_dimension_numbers<[1], [0], [0], [1], [0, 0, 1, 1], [], []>} : vector<32x32xbf16>, vector<32x128xbf16>, vector<32x128xf32> -> vector<32x128xf32>
    %223 = arith.mulf %222, %222 : vector<32x128xf32>
    %224 = arith.mulf %222, %223 : vector<32x128xf32>
    %cst_130 = arith.constant 4.471500e-02 : f32
    %225 = vector.broadcast %cst_130 : f32 to vector<32x128xf32>
    %226 = arith.mulf %225, %224 : vector<32x128xf32>
    %227 = arith.addf %222, %226 : vector<32x128xf32>
    %cst_131 = arith.constant 0.797884583 : f32
    %228 = vector.broadcast %cst_131 : f32 to vector<32x128xf32>
    %229 = arith.mulf %228, %227 : vector<32x128xf32>
    %230 = math.tanh %229 : vector<32x128xf32>
    %cst_132 = arith.constant 1.000000e+00 : f32
    %231 = vector.broadcast %cst_132 : f32 to vector<32x128xf32>
    %232 = arith.addf %231, %230 : vector<32x128xf32>
    %cst_133 = arith.constant 5.000000e-01 : f32
    %233 = vector.broadcast %cst_133 : f32 to vector<32x128xf32>
    %234 = arith.mulf %233, %232 : vector<32x128xf32>
    %235 = arith.mulf %222, %234 : vector<32x128xf32>
    %236 = arith.truncf %235 : vector<32x128xf32> to vector<32x128xbf16>
    %c0_134 = arith.constant 0 : index
    %c0_135 = arith.constant 0 : index
    %c0_136 = arith.constant 0 : index
    %237 = vector.load %arg11[%c0_134, %c0_135, %c0_136] : memref<2x128x32xbf16, #tpu.memory_space<vmem>>, vector<1x128x32xbf16>
    %238 = vector.shape_cast %237 : vector<1x128x32xbf16> to vector<128x32xbf16>
    %cst_137 = arith.constant dense<0.000000e+00> : vector<32x32xf32>
    %239 = tpu.matmul %236, %238, %cst_137 {dimension_numbers = #tpu.dot_dimension_numbers<[1], [0], [0], [1], [0, 0, 1, 1], [], []>} : vector<32x128xbf16>, vector<128x32xbf16>, vector<32x32xf32> -> vector<32x32xf32>
    %240 = arith.addf %192, %239 : vector<32x32xf32>
    %c1_138 = arith.constant 1 : index
    %c0_139 = arith.constant 0 : index
    %c0_140 = arith.constant 0 : index
    %241 = vector.load %arg2[%c1_138, %c0_139, %c0_140] : memref<2x1x32xf32, #tpu.memory_space<vmem>>, vector<1x1x32xf32>
    %242 = vector.shape_cast %241 : vector<1x1x32xf32> to vector<1x32xf32>
    %c1_141 = arith.constant 1 : index
    %c0_142 = arith.constant 0 : index
    %c0_143 = arith.constant 0 : index
    %243 = vector.load %arg3[%c1_141, %c0_142, %c0_143] : memref<2x1x32xf32, #tpu.memory_space<vmem>>, vector<1x1x32xf32>
    %244 = vector.shape_cast %243 : vector<1x1x32xf32> to vector<1x32xf32>
    %cst_144 = arith.constant dense<0.000000e+00> : vector<32xf32>
    %245 = vector.multi_reduction <add>, %240, %cst_144 [1] : vector<32x32xf32> to vector<32xf32>
    %246 = vector.shape_cast %245 : vector<32xf32> to vector<32x1xf32>
    %cst_145 = arith.constant 3.200000e+01 : f32
    %247 = vector.broadcast %cst_145 : f32 to vector<32x1xf32>
    %248 = arith.divf %246, %247 : vector<32x1xf32>
    %249 = vector.broadcast %248 : vector<32x1xf32> to vector<32x32xf32>
    %250 = arith.subf %240, %249 : vector<32x32xf32>
    %251 = arith.mulf %250, %250 : vector<32x32xf32>
    %cst_146 = arith.constant dense<0.000000e+00> : vector<32xf32>
    %252 = vector.multi_reduction <add>, %251, %cst_146 [1] : vector<32x32xf32> to vector<32xf32>
    %253 = vector.shape_cast %252 : vector<32xf32> to vector<32x1xf32>
    %cst_147 = arith.constant 3.200000e+01 : f32
    %254 = vector.broadcast %cst_147 : f32 to vector<32x1xf32>
    %255 = arith.divf %253, %254 : vector<32x1xf32>
    %256 = vector.broadcast %248 : vector<32x1xf32> to vector<32x32xf32>
    %257 = arith.subf %240, %256 : vector<32x32xf32>
    %cst_148 = arith.constant 9.99999974E-6 : f32
    %258 = vector.broadcast %cst_148 : f32 to vector<32x1xf32>
    %259 = arith.addf %255, %258 : vector<32x1xf32>
    %260 = math.rsqrt %259 : vector<32x1xf32>
    %261 = vector.broadcast %260 : vector<32x1xf32> to vector<32x32xf32>
    %262 = arith.mulf %257, %261 : vector<32x32xf32>
    %263 = vector.broadcast %242 : vector<1x32xf32> to vector<32x32xf32>
    %264 = arith.mulf %262, %263 : vector<32x32xf32>
    %265 = vector.broadcast %244 : vector<1x32xf32> to vector<32x32xf32>
    %266 = arith.addf %264, %265 : vector<32x32xf32>
    %267 = arith.truncf %266 : vector<32x32xf32> to vector<32x32xbf16>
    %cst_149 = arith.constant 0.000000e+00 : f32
    %268 = vector.broadcast %cst_149 : f32 to vector<32x32xf32>
    %c1_150 = arith.constant 1 : index
    %c0_151 = arith.constant 0 : index
    %c0_152 = arith.constant 0 : index
    %c0_153 = arith.constant 0 : index
    %269 = vector.load %arg4[%c1_150, %c0_151, %c0_152, %c0_153] : memref<2x4x32x8xbf16, #tpu.memory_space<vmem>>, vector<1x1x32x8xbf16>
    %270 = vector.shape_cast %269 : vector<1x1x32x8xbf16> to vector<32x8xbf16>
    %cst_154 = arith.constant dense<0.000000e+00> : vector<32x8xf32>
    %271 = tpu.matmul %267, %270, %cst_154 {dimension_numbers = #tpu.dot_dimension_numbers<[1], [0], [0], [1], [0, 0, 1, 1], [], []>} : vector<32x32xbf16>, vector<32x8xbf16>, vector<32x8xf32> -> vector<32x8xf32>
    %c1_155 = arith.constant 1 : index
    %c0_156 = arith.constant 0 : index
    %c0_157 = arith.constant 0 : index
    %c0_158 = arith.constant 0 : index
    %272 = vector.load %arg5[%c1_155, %c0_156, %c0_157, %c0_158] : memref<2x4x32x8xbf16, #tpu.memory_space<vmem>>, vector<1x1x32x8xbf16>
    %273 = vector.shape_cast %272 : vector<1x1x32x8xbf16> to vector<32x8xbf16>
    %cst_159 = arith.constant dense<0.000000e+00> : vector<32x8xf32>
    %274 = tpu.matmul %267, %273, %cst_159 {dimension_numbers = #tpu.dot_dimension_numbers<[1], [0], [0], [1], [0, 0, 1, 1], [], []>} : vector<32x32xbf16>, vector<32x8xbf16>, vector<32x8xf32> -> vector<32x8xf32>
    %c1_160 = arith.constant 1 : index
    %c0_161 = arith.constant 0 : index
    %c0_162 = arith.constant 0 : index
    %c0_163 = arith.constant 0 : index
    %275 = vector.load %arg6[%c1_160, %c0_161, %c0_162, %c0_163] : memref<2x4x32x8xbf16, #tpu.memory_space<vmem>>, vector<1x1x32x8xbf16>
    %276 = vector.shape_cast %275 : vector<1x1x32x8xbf16> to vector<32x8xbf16>
    %cst_164 = arith.constant dense<0.000000e+00> : vector<32x8xf32>
    %277 = tpu.matmul %267, %276, %cst_164 {dimension_numbers = #tpu.dot_dimension_numbers<[1], [0], [0], [1], [0, 0, 1, 1], [], []>} : vector<32x32xbf16>, vector<32x8xbf16>, vector<32x8xf32> -> vector<32x8xf32>
    %278 = vector.shape_cast %271 : vector<32x8xf32> to vector<2x16x8xf32>
    %279 = arith.truncf %278 : vector<2x16x8xf32> to vector<2x16x8xbf16>
    %280 = vector.shape_cast %274 : vector<32x8xf32> to vector<2x16x8xf32>
    %281 = arith.truncf %280 : vector<2x16x8xf32> to vector<2x16x8xbf16>
    %282 = vector.shape_cast %277 : vector<32x8xf32> to vector<2x16x8xf32>
    %283 = arith.truncf %282 : vector<2x16x8xf32> to vector<2x16x8xbf16>
    "tpu.trace_start"() <{level = 10 : i32, message = "bqd,bkd->bqk"}> : () -> ()
    %cst_165 = arith.constant dense<0.000000e+00> : vector<2x16x16xf32>
    %284 = tpu.matmul %279, %281, %cst_165 {dimension_numbers = #tpu.dot_dimension_numbers<[2], [2], [1], [1], [0, 0, 0, 1, 1, 1], [0], [0]>} : vector<2x16x8xbf16>, vector<2x16x8xbf16>, vector<2x16x16xf32> -> vector<2x16x16xf32>
    "tpu.trace_stop"() : () -> ()
    %cst_166 = arith.constant 0.353553385 : f32
    %285 = vector.broadcast %cst_166 : f32 to vector<2x16x16xf32>
    %286 = arith.mulf %284, %285 : vector<2x16x16xf32>
    %287 = arith.addf %286, %15 : vector<2x16x16xf32>
    %cst_167 = arith.constant dense<0xFF800000> : vector<2x16xf32>
    %288 = vector.multi_reduction <maximumf>, %287, %cst_167 [2] : vector<2x16x16xf32> to vector<2x16xf32>
    %289 = vector.shape_cast %288 : vector<2x16xf32> to vector<2x16x1xf32>
    %290 = vector.broadcast %289 : vector<2x16x1xf32> to vector<2x16x16xf32>
    %291 = arith.subf %287, %290 : vector<2x16x16xf32>
    %292 = math.exp %291 : vector<2x16x16xf32>
    %cst_168 = arith.constant dense<0.000000e+00> : vector<2x16xf32>
    %293 = vector.multi_reduction <add>, %292, %cst_168 [2] : vector<2x16x16xf32> to vector<2x16xf32>
    %294 = vector.shape_cast %293 : vector<2x16xf32> to vector<2x16x1xf32>
    %295 = tpu.reciprocal %294 {approx = true} : vector<2x16x1xf32> -> vector<2x16x1xf32>
    %296 = vector.broadcast %295 : vector<2x16x1xf32> to vector<2x16x16xf32>
    %297 = arith.mulf %292, %296 : vector<2x16x16xf32>
    %298 = arith.truncf %297 : vector<2x16x16xf32> to vector<2x16x16xbf16>
    "tpu.trace_start"() <{level = 10 : i32, message = "bqk,bkd->bqd"}> : () -> ()
    %cst_169 = arith.constant dense<0.000000e+00> : vector<2x16x8xf32>
    %299 = tpu.matmul %298, %283, %cst_169 {dimension_numbers = #tpu.dot_dimension_numbers<[2], [1], [1], [2], [0, 0, 0, 1, 1, 2], [0], [0]>} : vector<2x16x16xbf16>, vector<2x16x8xbf16>, vector<2x16x8xf32> -> vector<2x16x8xf32>
    "tpu.trace_stop"() : () -> ()
    %300 = vector.shape_cast %299 : vector<2x16x8xf32> to vector<32x8xf32>
    %301 = arith.truncf %300 : vector<32x8xf32> to vector<32x8xbf16>
    %c1_170 = arith.constant 1 : index
    %c0_171 = arith.constant 0 : index
    %c0_172 = arith.constant 0 : index
    %c0_173 = arith.constant 0 : index
    %302 = vector.load %arg7[%c1_170, %c0_171, %c0_172, %c0_173] : memref<2x4x8x32xbf16, #tpu.memory_space<vmem>>, vector<1x1x8x32xbf16>
    %303 = vector.shape_cast %302 : vector<1x1x8x32xbf16> to vector<8x32xbf16>
    %cst_174 = arith.constant dense<0.000000e+00> : vector<32x32xf32>
    %304 = tpu.matmul %301, %303, %cst_174 {dimension_numbers = #tpu.dot_dimension_numbers<[1], [0], [0], [1], [0, 0, 1, 1], [], []>} : vector<32x8xbf16>, vector<8x32xbf16>, vector<32x32xf32> -> vector<32x32xf32>
    %305 = arith.addf %268, %304 : vector<32x32xf32>
    %c1_175 = arith.constant 1 : index
    %c1_176 = arith.constant 1 : index
    %c0_177 = arith.constant 0 : index
    %c0_178 = arith.constant 0 : index
    %306 = vector.load %arg4[%c1_175, %c1_176, %c0_177, %c0_178] : memref<2x4x32x8xbf16, #tpu.memory_space<vmem>>, vector<1x1x32x8xbf16>
    %307 = vector.shape_cast %306 : vector<1x1x32x8xbf16> to vector<32x8xbf16>
    %cst_179 = arith.constant dense<0.000000e+00> : vector<32x8xf32>
    %308 = tpu.matmul %267, %307, %cst_179 {dimension_numbers = #tpu.dot_dimension_numbers<[1], [0], [0], [1], [0, 0, 1, 1], [], []>} : vector<32x32xbf16>, vector<32x8xbf16>, vector<32x8xf32> -> vector<32x8xf32>
    %c1_180 = arith.constant 1 : index
    %c1_181 = arith.constant 1 : index
    %c0_182 = arith.constant 0 : index
    %c0_183 = arith.constant 0 : index
    %309 = vector.load %arg5[%c1_180, %c1_181, %c0_182, %c0_183] : memref<2x4x32x8xbf16, #tpu.memory_space<vmem>>, vector<1x1x32x8xbf16>
    %310 = vector.shape_cast %309 : vector<1x1x32x8xbf16> to vector<32x8xbf16>
    %cst_184 = arith.constant dense<0.000000e+00> : vector<32x8xf32>
    %311 = tpu.matmul %267, %310, %cst_184 {dimension_numbers = #tpu.dot_dimension_numbers<[1], [0], [0], [1], [0, 0, 1, 1], [], []>} : vector<32x32xbf16>, vector<32x8xbf16>, vector<32x8xf32> -> vector<32x8xf32>
    %c1_185 = arith.constant 1 : index
    %c1_186 = arith.constant 1 : index
    %c0_187 = arith.constant 0 : index
    %c0_188 = arith.constant 0 : index
    %312 = vector.load %arg6[%c1_185, %c1_186, %c0_187, %c0_188] : memref<2x4x32x8xbf16, #tpu.memory_space<vmem>>, vector<1x1x32x8xbf16>
    %313 = vector.shape_cast %312 : vector<1x1x32x8xbf16> to vector<32x8xbf16>
    %cst_189 = arith.constant dense<0.000000e+00> : vector<32x8xf32>
    %314 = tpu.matmul %267, %313, %cst_189 {dimension_numbers = #tpu.dot_dimension_numbers<[1], [0], [0], [1], [0, 0, 1, 1], [], []>} : vector<32x32xbf16>, vector<32x8xbf16>, vector<32x8xf32> -> vector<32x8xf32>
    %315 = vector.shape_cast %308 : vector<32x8xf32> to vector<2x16x8xf32>
    %316 = arith.truncf %315 : vector<2x16x8xf32> to vector<2x16x8xbf16>
    %317 = vector.shape_cast %311 : vector<32x8xf32> to vector<2x16x8xf32>
    %318 = arith.truncf %317 : vector<2x16x8xf32> to vector<2x16x8xbf16>
    %319 = vector.shape_cast %314 : vector<32x8xf32> to vector<2x16x8xf32>
    %320 = arith.truncf %319 : vector<2x16x8xf32> to vector<2x16x8xbf16>
    "tpu.trace_start"() <{level = 10 : i32, message = "bqd,bkd->bqk"}> : () -> ()
    %cst_190 = arith.constant dense<0.000000e+00> : vector<2x16x16xf32>
    %321 = tpu.matmul %316, %318, %cst_190 {dimension_numbers = #tpu.dot_dimension_numbers<[2], [2], [1], [1], [0, 0, 0, 1, 1, 1], [0], [0]>} : vector<2x16x8xbf16>, vector<2x16x8xbf16>, vector<2x16x16xf32> -> vector<2x16x16xf32>
    "tpu.trace_stop"() : () -> ()
    %cst_191 = arith.constant 0.353553385 : f32
    %322 = vector.broadcast %cst_191 : f32 to vector<2x16x16xf32>
    %323 = arith.mulf %321, %322 : vector<2x16x16xf32>
    %324 = arith.addf %323, %15 : vector<2x16x16xf32>
    %cst_192 = arith.constant dense<0xFF800000> : vector<2x16xf32>
    %325 = vector.multi_reduction <maximumf>, %324, %cst_192 [2] : vector<2x16x16xf32> to vector<2x16xf32>
    %326 = vector.shape_cast %325 : vector<2x16xf32> to vector<2x16x1xf32>
    %327 = vector.broadcast %326 : vector<2x16x1xf32> to vector<2x16x16xf32>
    %328 = arith.subf %324, %327 : vector<2x16x16xf32>
    %329 = math.exp %328 : vector<2x16x16xf32>
    %cst_193 = arith.constant dense<0.000000e+00> : vector<2x16xf32>
    %330 = vector.multi_reduction <add>, %329, %cst_193 [2] : vector<2x16x16xf32> to vector<2x16xf32>
    %331 = vector.shape_cast %330 : vector<2x16xf32> to vector<2x16x1xf32>
    %332 = tpu.reciprocal %331 {approx = true} : vector<2x16x1xf32> -> vector<2x16x1xf32>
    %333 = vector.broadcast %332 : vector<2x16x1xf32> to vector<2x16x16xf32>
    %334 = arith.mulf %329, %333 : vector<2x16x16xf32>
    %335 = arith.truncf %334 : vector<2x16x16xf32> to vector<2x16x16xbf16>
    "tpu.trace_start"() <{level = 10 : i32, message = "bqk,bkd->bqd"}> : () -> ()
    %cst_194 = arith.constant dense<0.000000e+00> : vector<2x16x8xf32>
    %336 = tpu.matmul %335, %320, %cst_194 {dimension_numbers = #tpu.dot_dimension_numbers<[2], [1], [1], [2], [0, 0, 0, 1, 1, 2], [0], [0]>} : vector<2x16x16xbf16>, vector<2x16x8xbf16>, vector<2x16x8xf32> -> vector<2x16x8xf32>
    "tpu.trace_stop"() : () -> ()
    %337 = vector.shape_cast %336 : vector<2x16x8xf32> to vector<32x8xf32>
    %338 = arith.truncf %337 : vector<32x8xf32> to vector<32x8xbf16>
    %c1_195 = arith.constant 1 : index
    %c1_196 = arith.constant 1 : index
    %c0_197 = arith.constant 0 : index
    %c0_198 = arith.constant 0 : index
    %339 = vector.load %arg7[%c1_195, %c1_196, %c0_197, %c0_198] : memref<2x4x8x32xbf16, #tpu.memory_space<vmem>>, vector<1x1x8x32xbf16>
    %340 = vector.shape_cast %339 : vector<1x1x8x32xbf16> to vector<8x32xbf16>
    %cst_199 = arith.constant dense<0.000000e+00> : vector<32x32xf32>
    %341 = tpu.matmul %338, %340, %cst_199 {dimension_numbers = #tpu.dot_dimension_numbers<[1], [0], [0], [1], [0, 0, 1, 1], [], []>} : vector<32x8xbf16>, vector<8x32xbf16>, vector<32x32xf32> -> vector<32x32xf32>
    %342 = arith.addf %305, %341 : vector<32x32xf32>
    %c1_200 = arith.constant 1 : index
    %c2_201 = arith.constant 2 : index
    %c0_202 = arith.constant 0 : index
    %c0_203 = arith.constant 0 : index
    %343 = vector.load %arg4[%c1_200, %c2_201, %c0_202, %c0_203] : memref<2x4x32x8xbf16, #tpu.memory_space<vmem>>, vector<1x1x32x8xbf16>
    %344 = vector.shape_cast %343 : vector<1x1x32x8xbf16> to vector<32x8xbf16>
    %cst_204 = arith.constant dense<0.000000e+00> : vector<32x8xf32>
    %345 = tpu.matmul %267, %344, %cst_204 {dimension_numbers = #tpu.dot_dimension_numbers<[1], [0], [0], [1], [0, 0, 1, 1], [], []>} : vector<32x32xbf16>, vector<32x8xbf16>, vector<32x8xf32> -> vector<32x8xf32>
    %c1_205 = arith.constant 1 : index
    %c2_206 = arith.constant 2 : index
    %c0_207 = arith.constant 0 : index
    %c0_208 = arith.constant 0 : index
    %346 = vector.load %arg5[%c1_205, %c2_206, %c0_207, %c0_208] : memref<2x4x32x8xbf16, #tpu.memory_space<vmem>>, vector<1x1x32x8xbf16>
    %347 = vector.shape_cast %346 : vector<1x1x32x8xbf16> to vector<32x8xbf16>
    %cst_209 = arith.constant dense<0.000000e+00> : vector<32x8xf32>
    %348 = tpu.matmul %267, %347, %cst_209 {dimension_numbers = #tpu.dot_dimension_numbers<[1], [0], [0], [1], [0, 0, 1, 1], [], []>} : vector<32x32xbf16>, vector<32x8xbf16>, vector<32x8xf32> -> vector<32x8xf32>
    %c1_210 = arith.constant 1 : index
    %c2_211 = arith.constant 2 : index
    %c0_212 = arith.constant 0 : index
    %c0_213 = arith.constant 0 : index
    %349 = vector.load %arg6[%c1_210, %c2_211, %c0_212, %c0_213] : memref<2x4x32x8xbf16, #tpu.memory_space<vmem>>, vector<1x1x32x8xbf16>
    %350 = vector.shape_cast %349 : vector<1x1x32x8xbf16> to vector<32x8xbf16>
    %cst_214 = arith.constant dense<0.000000e+00> : vector<32x8xf32>
    %351 = tpu.matmul %267, %350, %cst_214 {dimension_numbers = #tpu.dot_dimension_numbers<[1], [0], [0], [1], [0, 0, 1, 1], [], []>} : vector<32x32xbf16>, vector<32x8xbf16>, vector<32x8xf32> -> vector<32x8xf32>
    %352 = vector.shape_cast %345 : vector<32x8xf32> to vector<2x16x8xf32>
    %353 = arith.truncf %352 : vector<2x16x8xf32> to vector<2x16x8xbf16>
    %354 = vector.shape_cast %348 : vector<32x8xf32> to vector<2x16x8xf32>
    %355 = arith.truncf %354 : vector<2x16x8xf32> to vector<2x16x8xbf16>
    %356 = vector.shape_cast %351 : vector<32x8xf32> to vector<2x16x8xf32>
    %357 = arith.truncf %356 : vector<2x16x8xf32> to vector<2x16x8xbf16>
    "tpu.trace_start"() <{level = 10 : i32, message = "bqd,bkd->bqk"}> : () -> ()
    %cst_215 = arith.constant dense<0.000000e+00> : vector<2x16x16xf32>
    %358 = tpu.matmul %353, %355, %cst_215 {dimension_numbers = #tpu.dot_dimension_numbers<[2], [2], [1], [1], [0, 0, 0, 1, 1, 1], [0], [0]>} : vector<2x16x8xbf16>, vector<2x16x8xbf16>, vector<2x16x16xf32> -> vector<2x16x16xf32>
    "tpu.trace_stop"() : () -> ()
    %cst_216 = arith.constant 0.353553385 : f32
    %359 = vector.broadcast %cst_216 : f32 to vector<2x16x16xf32>
    %360 = arith.mulf %358, %359 : vector<2x16x16xf32>
    %361 = arith.addf %360, %15 : vector<2x16x16xf32>
    %cst_217 = arith.constant dense<0xFF800000> : vector<2x16xf32>
    %362 = vector.multi_reduction <maximumf>, %361, %cst_217 [2] : vector<2x16x16xf32> to vector<2x16xf32>
    %363 = vector.shape_cast %362 : vector<2x16xf32> to vector<2x16x1xf32>
    %364 = vector.broadcast %363 : vector<2x16x1xf32> to vector<2x16x16xf32>
    %365 = arith.subf %361, %364 : vector<2x16x16xf32>
    %366 = math.exp %365 : vector<2x16x16xf32>
    %cst_218 = arith.constant dense<0.000000e+00> : vector<2x16xf32>
    %367 = vector.multi_reduction <add>, %366, %cst_218 [2] : vector<2x16x16xf32> to vector<2x16xf32>
    %368 = vector.shape_cast %367 : vector<2x16xf32> to vector<2x16x1xf32>
    %369 = tpu.reciprocal %368 {approx = true} : vector<2x16x1xf32> -> vector<2x16x1xf32>
    %370 = vector.broadcast %369 : vector<2x16x1xf32> to vector<2x16x16xf32>
    %371 = arith.mulf %366, %370 : vector<2x16x16xf32>
    %372 = arith.truncf %371 : vector<2x16x16xf32> to vector<2x16x16xbf16>
    "tpu.trace_start"() <{level = 10 : i32, message = "bqk,bkd->bqd"}> : () -> ()
    %cst_219 = arith.constant dense<0.000000e+00> : vector<2x16x8xf32>
    %373 = tpu.matmul %372, %357, %cst_219 {dimension_numbers = #tpu.dot_dimension_numbers<[2], [1], [1], [2], [0, 0, 0, 1, 1, 2], [0], [0]>} : vector<2x16x16xbf16>, vector<2x16x8xbf16>, vector<2x16x8xf32> -> vector<2x16x8xf32>
    "tpu.trace_stop"() : () -> ()
    %374 = vector.shape_cast %373 : vector<2x16x8xf32> to vector<32x8xf32>
    %375 = arith.truncf %374 : vector<32x8xf32> to vector<32x8xbf16>
    %c1_220 = arith.constant 1 : index
    %c2_221 = arith.constant 2 : index
    %c0_222 = arith.constant 0 : index
    %c0_223 = arith.constant 0 : index
    %376 = vector.load %arg7[%c1_220, %c2_221, %c0_222, %c0_223] : memref<2x4x8x32xbf16, #tpu.memory_space<vmem>>, vector<1x1x8x32xbf16>
    %377 = vector.shape_cast %376 : vector<1x1x8x32xbf16> to vector<8x32xbf16>
    %cst_224 = arith.constant dense<0.000000e+00> : vector<32x32xf32>
    %378 = tpu.matmul %375, %377, %cst_224 {dimension_numbers = #tpu.dot_dimension_numbers<[1], [0], [0], [1], [0, 0, 1, 1], [], []>} : vector<32x8xbf16>, vector<8x32xbf16>, vector<32x32xf32> -> vector<32x32xf32>
    %379 = arith.addf %342, %378 : vector<32x32xf32>
    %c1_225 = arith.constant 1 : index
    %c3_226 = arith.constant 3 : index
    %c0_227 = arith.constant 0 : index
    %c0_228 = arith.constant 0 : index
    %380 = vector.load %arg4[%c1_225, %c3_226, %c0_227, %c0_228] : memref<2x4x32x8xbf16, #tpu.memory_space<vmem>>, vector<1x1x32x8xbf16>
    %381 = vector.shape_cast %380 : vector<1x1x32x8xbf16> to vector<32x8xbf16>
    %cst_229 = arith.constant dense<0.000000e+00> : vector<32x8xf32>
    %382 = tpu.matmul %267, %381, %cst_229 {dimension_numbers = #tpu.dot_dimension_numbers<[1], [0], [0], [1], [0, 0, 1, 1], [], []>} : vector<32x32xbf16>, vector<32x8xbf16>, vector<32x8xf32> -> vector<32x8xf32>
    %c1_230 = arith.constant 1 : index
    %c3_231 = arith.constant 3 : index
    %c0_232 = arith.constant 0 : index
    %c0_233 = arith.constant 0 : index
    %383 = vector.load %arg5[%c1_230, %c3_231, %c0_232, %c0_233] : memref<2x4x32x8xbf16, #tpu.memory_space<vmem>>, vector<1x1x32x8xbf16>
    %384 = vector.shape_cast %383 : vector<1x1x32x8xbf16> to vector<32x8xbf16>
    %cst_234 = arith.constant dense<0.000000e+00> : vector<32x8xf32>
    %385 = tpu.matmul %267, %384, %cst_234 {dimension_numbers = #tpu.dot_dimension_numbers<[1], [0], [0], [1], [0, 0, 1, 1], [], []>} : vector<32x32xbf16>, vector<32x8xbf16>, vector<32x8xf32> -> vector<32x8xf32>
    %c1_235 = arith.constant 1 : index
    %c3_236 = arith.constant 3 : index
    %c0_237 = arith.constant 0 : index
    %c0_238 = arith.constant 0 : index
    %386 = vector.load %arg6[%c1_235, %c3_236, %c0_237, %c0_238] : memref<2x4x32x8xbf16, #tpu.memory_space<vmem>>, vector<1x1x32x8xbf16>
    %387 = vector.shape_cast %386 : vector<1x1x32x8xbf16> to vector<32x8xbf16>
    %cst_239 = arith.constant dense<0.000000e+00> : vector<32x8xf32>
    %388 = tpu.matmul %267, %387, %cst_239 {dimension_numbers = #tpu.dot_dimension_numbers<[1], [0], [0], [1], [0, 0, 1, 1], [], []>} : vector<32x32xbf16>, vector<32x8xbf16>, vector<32x8xf32> -> vector<32x8xf32>
    %389 = vector.shape_cast %382 : vector<32x8xf32> to vector<2x16x8xf32>
    %390 = arith.truncf %389 : vector<2x16x8xf32> to vector<2x16x8xbf16>
    %391 = vector.shape_cast %385 : vector<32x8xf32> to vector<2x16x8xf32>
    %392 = arith.truncf %391 : vector<2x16x8xf32> to vector<2x16x8xbf16>
    %393 = vector.shape_cast %388 : vector<32x8xf32> to vector<2x16x8xf32>
    %394 = arith.truncf %393 : vector<2x16x8xf32> to vector<2x16x8xbf16>
    "tpu.trace_start"() <{level = 10 : i32, message = "bqd,bkd->bqk"}> : () -> ()
    %cst_240 = arith.constant dense<0.000000e+00> : vector<2x16x16xf32>
    %395 = tpu.matmul %390, %392, %cst_240 {dimension_numbers = #tpu.dot_dimension_numbers<[2], [2], [1], [1], [0, 0, 0, 1, 1, 1], [0], [0]>} : vector<2x16x8xbf16>, vector<2x16x8xbf16>, vector<2x16x16xf32> -> vector<2x16x16xf32>
    "tpu.trace_stop"() : () -> ()
    %cst_241 = arith.constant 0.353553385 : f32
    %396 = vector.broadcast %cst_241 : f32 to vector<2x16x16xf32>
    %397 = arith.mulf %395, %396 : vector<2x16x16xf32>
    %398 = arith.addf %397, %15 : vector<2x16x16xf32>
    %cst_242 = arith.constant dense<0xFF800000> : vector<2x16xf32>
    %399 = vector.multi_reduction <maximumf>, %398, %cst_242 [2] : vector<2x16x16xf32> to vector<2x16xf32>
    %400 = vector.shape_cast %399 : vector<2x16xf32> to vector<2x16x1xf32>
    %401 = vector.broadcast %400 : vector<2x16x1xf32> to vector<2x16x16xf32>
    %402 = arith.subf %398, %401 : vector<2x16x16xf32>
    %403 = math.exp %402 : vector<2x16x16xf32>
    %cst_243 = arith.constant dense<0.000000e+00> : vector<2x16xf32>
    %404 = vector.multi_reduction <add>, %403, %cst_243 [2] : vector<2x16x16xf32> to vector<2x16xf32>
    %405 = vector.shape_cast %404 : vector<2x16xf32> to vector<2x16x1xf32>
    %406 = tpu.reciprocal %405 {approx = true} : vector<2x16x1xf32> -> vector<2x16x1xf32>
    %407 = vector.broadcast %406 : vector<2x16x1xf32> to vector<2x16x16xf32>
    %408 = arith.mulf %403, %407 : vector<2x16x16xf32>
    %409 = arith.truncf %408 : vector<2x16x16xf32> to vector<2x16x16xbf16>
    "tpu.trace_start"() <{level = 10 : i32, message = "bqk,bkd->bqd"}> : () -> ()
    %cst_244 = arith.constant dense<0.000000e+00> : vector<2x16x8xf32>
    %410 = tpu.matmul %409, %394, %cst_244 {dimension_numbers = #tpu.dot_dimension_numbers<[2], [1], [1], [2], [0, 0, 0, 1, 1, 2], [0], [0]>} : vector<2x16x16xbf16>, vector<2x16x8xbf16>, vector<2x16x8xf32> -> vector<2x16x8xf32>
    "tpu.trace_stop"() : () -> ()
    %411 = vector.shape_cast %410 : vector<2x16x8xf32> to vector<32x8xf32>
    %412 = arith.truncf %411 : vector<32x8xf32> to vector<32x8xbf16>
    %c1_245 = arith.constant 1 : index
    %c3_246 = arith.constant 3 : index
    %c0_247 = arith.constant 0 : index
    %c0_248 = arith.constant 0 : index
    %413 = vector.load %arg7[%c1_245, %c3_246, %c0_247, %c0_248] : memref<2x4x8x32xbf16, #tpu.memory_space<vmem>>, vector<1x1x8x32xbf16>
    %414 = vector.shape_cast %413 : vector<1x1x8x32xbf16> to vector<8x32xbf16>
    %cst_249 = arith.constant dense<0.000000e+00> : vector<32x32xf32>
    %415 = tpu.matmul %412, %414, %cst_249 {dimension_numbers = #tpu.dot_dimension_numbers<[1], [0], [0], [1], [0, 0, 1, 1], [], []>} : vector<32x8xbf16>, vector<8x32xbf16>, vector<32x32xf32> -> vector<32x32xf32>
    %416 = arith.addf %379, %415 : vector<32x32xf32>
    %417 = arith.addf %240, %416 : vector<32x32xf32>
    %c1_250 = arith.constant 1 : index
    %c0_251 = arith.constant 0 : index
    %c0_252 = arith.constant 0 : index
    %418 = vector.load %arg8[%c1_250, %c0_251, %c0_252] : memref<2x1x32xf32, #tpu.memory_space<vmem>>, vector<1x1x32xf32>
    %419 = vector.shape_cast %418 : vector<1x1x32xf32> to vector<1x32xf32>
    %c1_253 = arith.constant 1 : index
    %c0_254 = arith.constant 0 : index
    %c0_255 = arith.constant 0 : index
    %420 = vector.load %arg9[%c1_253, %c0_254, %c0_255] : memref<2x1x32xf32, #tpu.memory_space<vmem>>, vector<1x1x32xf32>
    %421 = vector.shape_cast %420 : vector<1x1x32xf32> to vector<1x32xf32>
    %cst_256 = arith.constant dense<0.000000e+00> : vector<32xf32>
    %422 = vector.multi_reduction <add>, %417, %cst_256 [1] : vector<32x32xf32> to vector<32xf32>
    %423 = vector.shape_cast %422 : vector<32xf32> to vector<32x1xf32>
    %cst_257 = arith.constant 3.200000e+01 : f32
    %424 = vector.broadcast %cst_257 : f32 to vector<32x1xf32>
    %425 = arith.divf %423, %424 : vector<32x1xf32>
    %426 = vector.broadcast %425 : vector<32x1xf32> to vector<32x32xf32>
    %427 = arith.subf %417, %426 : vector<32x32xf32>
    %428 = arith.mulf %427, %427 : vector<32x32xf32>
    %cst_258 = arith.constant dense<0.000000e+00> : vector<32xf32>
    %429 = vector.multi_reduction <add>, %428, %cst_258 [1] : vector<32x32xf32> to vector<32xf32>
    %430 = vector.shape_cast %429 : vector<32xf32> to vector<32x1xf32>
    %cst_259 = arith.constant 3.200000e+01 : f32
    %431 = vector.broadcast %cst_259 : f32 to vector<32x1xf32>
    %432 = arith.divf %430, %431 : vector<32x1xf32>
    %433 = vector.broadcast %425 : vector<32x1xf32> to vector<32x32xf32>
    %434 = arith.subf %417, %433 : vector<32x32xf32>
    %cst_260 = arith.constant 9.99999974E-6 : f32
    %435 = vector.broadcast %cst_260 : f32 to vector<32x1xf32>
    %436 = arith.addf %432, %435 : vector<32x1xf32>
    %437 = math.rsqrt %436 : vector<32x1xf32>
    %438 = vector.broadcast %437 : vector<32x1xf32> to vector<32x32xf32>
    %439 = arith.mulf %434, %438 : vector<32x32xf32>
    %440 = vector.broadcast %419 : vector<1x32xf32> to vector<32x32xf32>
    %441 = arith.mulf %439, %440 : vector<32x32xf32>
    %442 = vector.broadcast %421 : vector<1x32xf32> to vector<32x32xf32>
    %443 = arith.addf %441, %442 : vector<32x32xf32>
    %444 = arith.truncf %443 : vector<32x32xf32> to vector<32x32xbf16>
    %c1_261 = arith.constant 1 : index
    %c0_262 = arith.constant 0 : index
    %c0_263 = arith.constant 0 : index
    %445 = vector.load %arg10[%c1_261, %c0_262, %c0_263] : memref<2x32x128xbf16, #tpu.memory_space<vmem>>, vector<1x32x128xbf16>
    %446 = vector.shape_cast %445 : vector<1x32x128xbf16> to vector<32x128xbf16>
    %cst_264 = arith.constant dense<0.000000e+00> : vector<32x128xf32>
    %447 = tpu.matmul %444, %446, %cst_264 {dimension_numbers = #tpu.dot_dimension_numbers<[1], [0], [0], [1], [0, 0, 1, 1], [], []>} : vector<32x32xbf16>, vector<32x128xbf16>, vector<32x128xf32> -> vector<32x128xf32>
    %448 = arith.mulf %447, %447 : vector<32x128xf32>
    %449 = arith.mulf %447, %448 : vector<32x128xf32>
    %cst_265 = arith.constant 4.471500e-02 : f32
    %450 = vector.broadcast %cst_265 : f32 to vector<32x128xf32>
    %451 = arith.mulf %450, %449 : vector<32x128xf32>
    %452 = arith.addf %447, %451 : vector<32x128xf32>
    %cst_266 = arith.constant 0.797884583 : f32
    %453 = vector.broadcast %cst_266 : f32 to vector<32x128xf32>
    %454 = arith.mulf %453, %452 : vector<32x128xf32>
    %455 = math.tanh %454 : vector<32x128xf32>
    %cst_267 = arith.constant 1.000000e+00 : f32
    %456 = vector.broadcast %cst_267 : f32 to vector<32x128xf32>
    %457 = arith.addf %456, %455 : vector<32x128xf32>
    %cst_268 = arith.constant 5.000000e-01 : f32
    %458 = vector.broadcast %cst_268 : f32 to vector<32x128xf32>
    %459 = arith.mulf %458, %457 : vector<32x128xf32>
    %460 = arith.mulf %447, %459 : vector<32x128xf32>
    %461 = arith.truncf %460 : vector<32x128xf32> to vector<32x128xbf16>
    %c1_269 = arith.constant 1 : index
    %c0_270 = arith.constant 0 : index
    %c0_271 = arith.constant 0 : index
    %462 = vector.load %arg11[%c1_269, %c0_270, %c0_271] : memref<2x128x32xbf16, #tpu.memory_space<vmem>>, vector<1x128x32xbf16>
    %463 = vector.shape_cast %462 : vector<1x128x32xbf16> to vector<128x32xbf16>
    %cst_272 = arith.constant dense<0.000000e+00> : vector<32x32xf32>
    %464 = tpu.matmul %461, %463, %cst_272 {dimension_numbers = #tpu.dot_dimension_numbers<[1], [0], [0], [1], [0, 0, 1, 1], [], []>} : vector<32x128xbf16>, vector<128x32xbf16>, vector<32x32xf32> -> vector<32x32xf32>
    %465 = arith.addf %417, %464 : vector<32x32xf32>
    %c0_273 = arith.constant 0 : index
    %c0_274 = arith.constant 0 : index
    %466 = vector.load %arg12[%c0_273, %c0_274] : memref<1x32xf32, #tpu.memory_space<vmem>>, vector<1x32xf32>
    %c0_275 = arith.constant 0 : index
    %c0_276 = arith.constant 0 : index
    %467 = vector.load %arg13[%c0_275, %c0_276] : memref<1x32xf32, #tpu.memory_space<vmem>>, vector<1x32xf32>
    %cst_277 = arith.constant dense<0.000000e+00> : vector<32xf32>
    %468 = vector.multi_reduction <add>, %465, %cst_277 [1] : vector<32x32xf32> to vector<32xf32>
    %469 = vector.shape_cast %468 : vector<32xf32> to vector<32x1xf32>
    %cst_278 = arith.constant 3.200000e+01 : f32
    %470 = vector.broadcast %cst_278 : f32 to vector<32x1xf32>
    %471 = arith.divf %469, %470 : vector<32x1xf32>
    %472 = vector.broadcast %471 : vector<32x1xf32> to vector<32x32xf32>
    %473 = arith.subf %465, %472 : vector<32x32xf32>
    %474 = arith.mulf %473, %473 : vector<32x32xf32>
    %cst_279 = arith.constant dense<0.000000e+00> : vector<32xf32>
    %475 = vector.multi_reduction <add>, %474, %cst_279 [1] : vector<32x32xf32> to vector<32xf32>
    %476 = vector.shape_cast %475 : vector<32xf32> to vector<32x1xf32>
    %cst_280 = arith.constant 3.200000e+01 : f32
    %477 = vector.broadcast %cst_280 : f32 to vector<32x1xf32>
    %478 = arith.divf %476, %477 : vector<32x1xf32>
    %479 = vector.broadcast %471 : vector<32x1xf32> to vector<32x32xf32>
    %480 = arith.subf %465, %479 : vector<32x32xf32>
    %cst_281 = arith.constant 9.99999974E-6 : f32
    %481 = vector.broadcast %cst_281 : f32 to vector<32x1xf32>
    %482 = arith.addf %478, %481 : vector<32x1xf32>
    %483 = math.rsqrt %482 : vector<32x1xf32>
    %484 = vector.broadcast %483 : vector<32x1xf32> to vector<32x32xf32>
    %485 = arith.mulf %480, %484 : vector<32x32xf32>
    %486 = vector.broadcast %466 : vector<1x32xf32> to vector<32x32xf32>
    %487 = arith.mulf %485, %486 : vector<32x32xf32>
    %488 = vector.broadcast %467 : vector<1x32xf32> to vector<32x32xf32>
    %489 = arith.addf %487, %488 : vector<32x32xf32>
    %490 = vector.shape_cast %489 : vector<32x32xf32> to vector<2x16x32xf32>
    %491 = vector.extract_strided_slice %490 {offsets = [0, 7, 0], sizes = [2, 8, 32], strides = [1, 1, 1]} : vector<2x16x32xf32> to vector<2x8x32xf32>
    %492 = vector.shape_cast %491 : vector<2x8x32xf32> to vector<16x32xf32>
    %493 = arith.truncf %492 : vector<16x32xf32> to vector<16x32xbf16>
    %c0_282 = arith.constant 0 : index
    %c0_283 = arith.constant 0 : index
    %494 = vector.load %arg14[%c0_282, %c0_283] : memref<32x128xbf16, #tpu.memory_space<vmem>>, vector<32x128xbf16>
    %cst_284 = arith.constant dense<0.000000e+00> : vector<16x128xf32>
    %495 = tpu.matmul %493, %494, %cst_284 {dimension_numbers = #tpu.dot_dimension_numbers<[1], [0], [0], [1], [0, 0, 1, 1], [], []>} : vector<16x32xbf16>, vector<32x128xbf16>, vector<16x128xf32> -> vector<16x128xf32>
    %496 = vector.shape_cast %495 : vector<16x128xf32> to vector<2x8x128xf32>
    %c0_285 = arith.constant 0 : index
    %c0_286 = arith.constant 0 : index
    %c0_287 = arith.constant 0 : index
    %497 = vector.load %arg17[%c0_285, %c0_286, %c0_287] : memref<2x8x128xf32, #tpu.memory_space<vmem>>, vector<2x8x128xf32>
    tpu.vector_store %arg17[%c0_285, %c0_286, %c0_287], %496 {strides = array<i32>} : memref<2x8x128xf32, #tpu.memory_space<vmem>>, vector<2x8x128xf32>,
    %cst_288 = arith.constant dense<0xFF800000> : vector<16xf32>
    %498 = vector.multi_reduction <maximumf>, %495, %cst_288 [1] : vector<16x128xf32> to vector<16xf32>
    %499 = vector.shape_cast %498 : vector<16xf32> to vector<16x1xf32>
    %500 = vector.broadcast %499 : vector<16x1xf32> to vector<16x128xf32>
    %501 = arith.subf %495, %500 : vector<16x128xf32>
    %502 = math.exp %501 : vector<16x128xf32>
    %cst_289 = arith.constant dense<0.000000e+00> : vector<16xf32>
    %503 = vector.multi_reduction <add>, %502, %cst_289 [1] : vector<16x128xf32> to vector<16xf32>
    %504 = vector.shape_cast %503 : vector<16xf32> to vector<16x1xf32>
    %505 = math.log %504 : vector<16x1xf32>
    %506 = arith.addf %505, %499 : vector<16x1xf32>
    %c0_290 = arith.constant 0 : index
    %c0_291 = arith.constant 0 : index
    %507 = vector.load %arg15[%c0_290, %c0_291] : memref<16x128xf32, #tpu.memory_space<vmem>>, vector<16x128xf32>
    %508 = arith.mulf %495, %507 : vector<16x128xf32>
    %cst_292 = arith.constant dense<0.000000e+00> : vector<16xf32>
    %509 = vector.multi_reduction <add>, %508, %cst_292 [1] : vector<16x128xf32> to vector<16xf32>
    %510 = vector.shape_cast %509 : vector<16xf32> to vector<16x1xf32>
    %511 = arith.subf %506, %510 : vector<16x1xf32>
    %c0_293 = arith.constant 0 : index
    %c0_294 = arith.constant 0 : index
    %512 = vector.load %arg16[%c0_293, %c0_294] : memref<16x1xf32, #tpu.memory_space<vmem>>, vector<16x1xf32>
    %513 = arith.mulf %511, %512 : vector<16x1xf32>
    %514 = vector.shape_cast %513 : vector<16x1xf32> to vector<1x16x1xf32>
    %cst_295 = arith.constant dense<0.000000e+00> : vector<1xf32>
    %515 = vector.multi_reduction <add>, %514, %cst_295 [1, 2] : vector<1x16x1xf32> to vector<1xf32>
    %516 = vector.shape_cast %515 : vector<1xf32> to vector<1x1x1xf32>
    %517 = vector.extract %516[0, 0, 0] : f32 from vector<1x1x1xf32>
    %518 = vector.broadcast %517 : f32 to vector<1x1xf32>
    %c0_296 = arith.constant 0 : index
    %c0_297 = arith.constant 0 : index
    %519 = vector.load %arg18[%c0_296, %c0_297] : memref<1x1xf32, #tpu.memory_space<vmem>>, vector<1x1xf32>
    tpu.vector_store %arg18[%c0_296, %c0_297], %518 {strides = array<i32>} : memref<1x1xf32, #tpu.memory_space<vmem>>, vector<1x1xf32>,
    return
  }
}

</mosaic_0001>

<bundles_post_ra>
// kernel: img_caption_forward.1
= control target key start
LH: loop header
LB: loop body
LE: loop exit
PB: predicated region body
PF: predicated region fallthrough
CT: control target
= control target key end

     0   :  { %s7556_s0 = inlined_call_operand.hbm [shape: f32[2,8,32], index: 0, kind: input, shape index: {}]   ;;  %s7557_s1 = inlined_call_operand.hbm [shape: f32[2,8,32], index: 1, kind: input, shape index: {}]   ;;  %s7558_s2 = inlined_call_operand.vmem [shape: f32[2,1,32], index: 2, kind: input, shape index: {}, may-alias: {2,8}]   ;;  %s7559_s3 = inlined_call_operand.vmem [shape: f32[2,1,32], index: 3, kind: input, shape index: {}, may-alias: {3,9}]   ;;  %s7560_s4 = inlined_call_operand.hbm [shape: bf16[2,4,32,8], index: 4, kind: input, shape index: {}]   ;;  %s7561_s5 = inlined_call_operand.hbm [shape: bf16[2,4,32,8], index: 5, kind: input, shape index: {}]   ;;  %s7562_s6 = inlined_call_operand.hbm [shape: bf16[2,4,32,8], index: 6, kind: input, shape index: {}]   ;;  %s7563_s7 = inlined_call_operand.hbm [shape: bf16[2,4,8,32], index: 7, kind: input, shape index: {}]   ;;  %s7564_s8 = inlined_call_operand.vmem [shape: f32[2,1,32], index: 8, kind: input, shape index: {}, may-alias: {2,8}]   ;;  %s7565_s9 = inlined_call_operand.vmem [shape: f32[2,1,32], index: 9, kind: input, shape index: {}, may-alias: {3,9}]   ;;  %s7566_s10 = inlined_call_operand.hbm [shape: bf16[2,32,128], index: 10, kind: input, shape index: {}]   ;;  %s7567_s11 = inlined_call_operand.vmem [shape: bf16[2,128,32], index: 11, kind: input, shape index: {}]   ;;  %s7568_s12 = inlined_call_operand.vmem [shape: f32[1,32], index: 12, kind: input, shape index: {}]   ;;  %s7569_s13 = inlined_call_operand.vmem [shape: f32[1,32], index: 13, kind: input, shape index: {}]   ;;  %s7570_s14 = inlined_call_operand.hbm [shape: bf16[32,128], index: 14, kind: input, shape index: {}]   ;;  %s7571_s15 = inlined_call_operand.vmem [shape: f32[16,128], index: 15, kind: input, shape index: {}]   ;;  %s7572_s16 = inlined_call_operand.vmem [shape: f32[16,1], index: 16, kind: input, shape index: {}]   ;;  %s7573_s17 = inlined_call_operand.hbm [shape: f32[2,8,128], index: 17, kind: output, shape index: {0}]   ;;  %s7574_s18 = inlined_call_operand.hbm [shape: f32[1,1], index: 18, kind: output, shape index: {1}]  }
   0x1   :  { %7582 = sst [smem:[#allocation26_spill]] %s7556_s0 }
   0x2   :  { %7583 = sst [smem:[#allocation27_spill]] %s7557_s1 }
   0x3   :  { %7584 = sst [smem:[#allocation28_spill]] %s7558_s2 }
   0x4   :  { %7585 = sst [smem:[#allocation29_spill]] %s7573_s17 }
   0x5   :  { %7586 = sst [smem:[#allocation30_spill]] %s7574_s18 }
   0x6   :  { %24 = vsyncpa [#allocation3], 0 }
   0x7   :  { %25 = vsyncpa [#allocation6], 0 }
   0x8   :  { %26 = vsyncpa [#allocation9], 0 }
   0x9   :  { %27 = vsyncpa [#allocation12], 0 }
   0xa   :  { %28 = vsyncpa [#allocation15], 0 }
   0xb   :  { %29 = vsyncpa [#allocation4], 0 }
   0xc   :  { %30 = vsyncpa [#allocation18], 0  ;;  %s6700_s27 = smov [#allocation5]   ;;  %s7587_s0 = sld [smem:[#allocation27_spill]] }
   0xd   :  { %s48_s28 = sshll.u32 %s6700_s27, 4  ;;  %s49_s28 = int_to_ptr.vmem [resolvable:$true] %s48_s28 }
  0x12   :  { %s6466_s19 = scalar_lea.hbm %s7587_s0, 256 }
  0x13   :  { %p6467_p0 = scmp.ne.s32.totalorder %s7587_s0, %s6466_s19  ;;  %p6470_p1 = scmp.lt.u32.totalorder %s6466_s19, %s7587_s0 }
  0x15   :  { %p6472_p2 = pnand %p6470_p1, %p6467_p0 }
  0x17   :  { %6475 = shalt.err (!%p6472_p2)
}
  0x18   :  { %s6476_s2 = scalar_lea.vmem %s49_s28, 256  ;;  %p6481_p4 = scmp.lt.s32.totalorder %s49_s28, %s49_s28 }
  0x19   :  { %p6477_p3 = scmp.ne.s32.totalorder %s49_s28, %s6476_s2  ;;  %p6482_p5 = scmp.lt.s32.totalorder %s6476_s2, %s6476_s2 }
  0x1b   :  { %p6483_p6 = por %p6482_p5, %p6481_p4 }
  0x1d   :  { %p6484_p7 = pnand %p6483_p6, %p6477_p3 }
  0x1f   :  { %6487 = shalt.err (!%p6484_p7)
}
  0x20   :  { %s7580_s23 = smov 128   ;;  %s6702_s24 = smov 8  }
  0x21   :  { %54 = dma.hbm_to_vmem [thread:$0]  %s7587_s0, 256, %s49_s28, [#allocation6], %s7580_s23, %s7580_s23, %s6702_s24  }
  0x22   :  { %s6703_s27 = smov [#allocation8]   ;;  %s6704_s30 = smov [#allocation11]  }
  0x23   :  { %s76_s29 = sshll.u32 %s6703_s27, 4  ;;  %s100_s19 = sshll.u32 %s6704_s30, 4  ;;  %s77_s29 = int_to_ptr.vmem [resolvable:$true] %s76_s29  ;;  %s101_s19 = int_to_ptr.vmem [resolvable:$true] %s100_s19 }
  0x24   :  { %s6488_s21 = scalar_lea.hbm %s7561_s5, 2048 }
  0x25   :  { %p6489_p8 = scmp.ne.s32.totalorder %s7561_s5, %s6488_s21  ;;  %p6492_p9 = scmp.lt.u32.totalorder %s6488_s21, %s7561_s5 }
  0x27   :  { %p6494_p10 = pnand %p6492_p9, %p6489_p8 }
  0x29   :  { %6497 = shalt.err (!%p6494_p10)
}
  0x2a   :  { %s6498_s28 = scalar_lea.vmem %s77_s29, 2048  ;;  %p6503_p12 = scmp.lt.s32.totalorder %s77_s29, %s77_s29 }
  0x2b   :  { %p6499_p11 = scmp.ne.s32.totalorder %s77_s29, %s6498_s28  ;;  %p6504_p13 = scmp.lt.s32.totalorder %s6498_s28, %s6498_s28 }
  0x2d   :  { %p6505_p0 = por %p6504_p13, %p6503_p12 }
  0x2f   :  { %p6506_p1 = pnand %p6505_p0, %p6499_p11 }
  0x31   :  { %6509 = shalt.err (!%p6506_p1)
}
  0x32   :  { %s6705_s0 = smov 64   ;;  %s6706_s25 = smov 4  }
  0x33   :  { %82 = dma.hbm_to_vmem [thread:$0]  %s7561_s5, 2048, %s77_s29, [#allocation9], %s6705_s0, %s6705_s0, %s6706_s25  }
  0x34   :  { %s6510_s30 = scalar_lea.hbm %s7563_s7, 512 }
  0x35   :  { %p6511_p2 = scmp.ne.s32.totalorder %s7563_s7, %s6510_s30  ;;  %p6514_p3 = scmp.lt.u32.totalorder %s6510_s30, %s7563_s7 }
  0x37   :  { %p6516_p4 = pnand %p6514_p3, %p6511_p2 }
  0x39   :  { %6519 = shalt.err (!%p6516_p4)
}
  0x3a   :  { %s6520_s2 = scalar_lea.vmem %s101_s19, 512  ;;  %p6525_p6 = scmp.lt.s32.totalorder %s101_s19, %s101_s19 }
  0x3b   :  { %p6521_p5 = scmp.ne.s32.totalorder %s101_s19, %s6520_s2  ;;  %p6526_p7 = scmp.lt.s32.totalorder %s6520_s2, %s6520_s2 }
  0x3d   :  { %p6527_p8 = por %p6526_p7, %p6525_p6 }
  0x3f   :  { %p6528_p9 = pnand %p6527_p8, %p6521_p5 }
  0x41   :  { %6531 = shalt.err (!%p6528_p9)
}
  0x42   :  { %106 = dma.hbm_to_vmem [thread:$0]  %s7563_s7, 512, %s101_s19, [#allocation12], %s6705_s0, %s6705_s0, %s6706_s25  }
  0x43   :  { %s6707_s28 = smov [#allocation2]   ;;  %s6708_s27 = smov [#allocation7]  }
  0x44   :  { %s36_s26 = sshll.u32 %s6707_s28, 4  ;;  %s64_s17 = sshll.u32 %s6708_s27, 4  ;;  %s37_s26 = int_to_ptr.vmem [resolvable:$true] %s36_s26  ;;  %s65_s17 = int_to_ptr.vmem [resolvable:$true] %s64_s17 }
  0x45   :  { %s7588_s1 = sld [smem:[#allocation26_spill]] }
  0x4b   :  { %s6532_s20 = scalar_lea.hbm %s7588_s1, 256 }
  0x4c   :  { %p6533_p10 = scmp.ne.s32.totalorder %s7588_s1, %s6532_s20  ;;  %p6536_p11 = scmp.lt.u32.totalorder %s6532_s20, %s7588_s1 }
  0x4e   :  { %p6538_p12 = pnand %p6536_p11, %p6533_p10 }
  0x50   :  { %6541 = shalt.err (!%p6538_p12)
}
  0x51   :  { %s6542_s7 = scalar_lea.vmem %s37_s26, 256  ;;  %p6547_p0 = scmp.lt.s32.totalorder %s37_s26, %s37_s26 }
  0x52   :  { %p6543_p13 = scmp.ne.s32.totalorder %s37_s26, %s6542_s7  ;;  %p6548_p1 = scmp.lt.s32.totalorder %s6542_s7, %s6542_s7 }
  0x54   :  { %p6549_p2 = por %p6548_p1, %p6547_p0 }
  0x56   :  { %p6550_p3 = pnand %p6549_p2, %p6543_p13 }
  0x58   :  { %6553 = shalt.err (!%p6550_p3)
}
  0x59   :  { %s7589_s19 = smov 128   ;;  %s6554_s27 = scalar_lea.hbm %s7560_s4, 2048 }
  0x5a   :  { %42 = dma.hbm_to_vmem [thread:$0]  %s7588_s1, 256, %s37_s26, [#allocation3], %s7589_s19, %s7589_s19, %s6702_s24  }
  0x5b   :  { %p6555_p4 = scmp.ne.s32.totalorder %s7560_s4, %s6554_s27  ;;  %p6558_p5 = scmp.lt.u32.totalorder %s6554_s27, %s7560_s4 }
  0x5d   :  { %p6560_p6 = pnand %p6558_p5, %p6555_p4 }
  0x5f   :  { %6563 = shalt.err (!%p6560_p6)
}
  0x60   :  { %s6564_s22 = scalar_lea.vmem %s65_s17, 2048  ;;  %p6569_p8 = scmp.lt.s32.totalorder %s65_s17, %s65_s17 }
  0x61   :  { %p6565_p7 = scmp.ne.s32.totalorder %s65_s17, %s6564_s22  ;;  %p6570_p9 = scmp.lt.s32.totalorder %s6564_s22, %s6564_s22 }
  0x63   :  { %p6571_p10 = por %p6570_p9, %p6569_p8 }
  0x65   :  { %p6572_p11 = pnand %p6571_p10, %p6565_p7 }
  0x67   :  { %6575 = shalt.err (!%p6572_p11)
}
  0x68   :  { %70 = dma.hbm_to_vmem [thread:$0]  %s7560_s4, 2048, %s65_s17, [#allocation6], %s6705_s0, %s6705_s0, %s6706_s25  }
  0x69   :  { %s6709_s2 = smov [#allocation10]   ;;  %s6710_s5 = smov [#allocation13]  }
  0x6a   :  { %s88_s7 = sshll.u32 %s6709_s2, 4  ;;  %s116_s29 = sshll.u32 %s6710_s5, 4  ;;  %s89_s7 = int_to_ptr.vmem [resolvable:$true] %s88_s7  ;;  %s117_s29 = int_to_ptr.vmem [resolvable:$true] %s116_s29 }
  0x6b   :  { %s6576_s27 = scalar_lea.hbm %s7562_s6, 2048 }
  0x6c   :  { %p6577_p12 = scmp.ne.s32.totalorder %s7562_s6, %s6576_s27  ;;  %p6580_p13 = scmp.lt.u32.totalorder %s6576_s27, %s7562_s6 }
  0x6e   :  { %p6582_p0 = pnand %p6580_p13, %p6577_p12 }
  0x70   :  { %6585 = shalt.err (!%p6582_p0)
}
  0x71   :  { %s6586_s4 = scalar_lea.vmem %s89_s7, 2048  ;;  %p6591_p2 = scmp.lt.s32.totalorder %s89_s7, %s89_s7 }
  0x72   :  { %p6587_p1 = scmp.ne.s32.totalorder %s89_s7, %s6586_s4  ;;  %p6592_p3 = scmp.lt.s32.totalorder %s6586_s4, %s6586_s4 }
  0x74   :  { %p6593_p4 = por %p6592_p3, %p6591_p2 }
  0x76   :  { %p6594_p5 = pnand %p6593_p4, %p6587_p1 }
  0x78   :  { %6597 = shalt.err (!%p6594_p5)
}
  0x79   :  { %94 = dma.hbm_to_vmem [thread:$0]  %s7562_s6, 2048, %s89_s7, [#allocation9], %s6705_s0, %s6705_s0, %s6706_s25  }
  0x7a   :  { %s6598_s2 = scalar_lea.hbm %s7566_s10, 512 }
  0x7b   :  { %p6599_p6 = scmp.ne.s32.totalorder %s7566_s10, %s6598_s2  ;;  %p6602_p7 = scmp.lt.u32.totalorder %s6598_s2, %s7566_s10 }
  0x7d   :  { %p6604_p8 = pnand %p6602_p7, %p6599_p6 }
  0x7f   :  { %6607 = shalt.err (!%p6604_p8)
}
  0x80   :  { %s6608_s18 = scalar_lea.vmem %s117_s29, 512  ;;  %p6613_p10 = scmp.lt.s32.totalorder %s117_s29, %s117_s29 }
  0x81   :  { %p6609_p9 = scmp.ne.s32.totalorder %s117_s29, %s6608_s18  ;;  %p6614_p11 = scmp.lt.s32.totalorder %s6608_s18, %s6608_s18 }
  0x83   :  { %p6615_p12 = por %p6614_p11, %p6613_p10 }
  0x85   :  { %p6616_p13 = pnand %p6615_p12, %p6609_p9 }
  0x87   :  { %6619 = shalt.err (!%p6616_p13)
}
  0x88   :  { %122 = dma.hbm_to_vmem [thread:$0]  %s7566_s10, 512, %s117_s29, [#allocation12], %s6705_s0, %s6705_s0, %s6706_s25  }
  0x89   :  { %s6711_s30 = smov [#allocation14]   ;;  %s6620_s17 = scalar_lea.hbm %s7570_s14, 256 }
  0x8a   :  { %s134_s20 = sshll.u32 %s6711_s30, 4  ;;  %p6621_p0 = scmp.ne.s32.totalorder %s7570_s14, %s6620_s17  ;;  %s135_s20 = int_to_ptr.vmem [resolvable:$true] %s134_s20 }
  0x8b   :  { %p6624_p1 = scmp.lt.u32.totalorder %s6620_s17, %s7570_s14 }
  0x8d   :  { %p6626_p2 = pnand %p6624_p1, %p6621_p0 }
  0x8f   :  { %6629 = shalt.err (!%p6626_p2)
}
  0x90   :  { %s6630_s5 = scalar_lea.vmem %s135_s20, 256  ;;  %p6635_p4 = scmp.lt.s32.totalorder %s135_s20, %s135_s20 }
  0x91   :  { %p6631_p3 = scmp.ne.s32.totalorder %s135_s20, %s6630_s5  ;;  %p6636_p5 = scmp.lt.s32.totalorder %s6630_s5, %s6630_s5 }
  0x93   :  { %p6637_p6 = por %p6636_p5, %p6635_p4 }
  0x95   :  { %p6638_p7 = pnand %p6637_p6, %p6631_p3 }
  0x97   :  { %6641 = shalt.err (!%p6638_p7)
}
  0x98   :  { %140 = dma.hbm_to_vmem [thread:$0]  %s7570_s14, 256, %s135_s20, [#allocation15], %s6705_s0, %s6705_s0, %s6706_s25  }
  0x99   :  { %6686 = dma.done.wait [#allocation3], 256  }
  0x9a   :  { %6687 = vsyncadd [#allocation3], 4294967040 }
  0x9b   :  { %6688 = dma.done.wait [#allocation6], 2304  }
  0x9c   :  { %6689 = vsyncadd [#allocation6], 4294964992 }
  0x9d   :  { %6690 = dma.done.wait [#allocation9], 4096  }
  0x9e   :  { %6691 = vsyncadd [#allocation9], 4294963200 }
  0x9f   :  { %6692 = dma.done.wait [#allocation12], 1024  }
  0xa0   :  { %6693 = vsyncadd [#allocation12], 4294966272 }
  0xa1   :  { %6694 = dma.done.wait [#allocation15], 256  }
  0xa2   :  { %6695 = vsyncadd [#allocation15], 4294967040  ;;  %vm189_vm0 = vcmask 261120   ;;  %v170_v0 = vld [vmem:[#allocation2] sm:$0xff]  ;;  %v171_v1 = vld [vmem:[#allocation2 + $0x8] sm:$0xff]  ;;  %s7590_s25 = sld [smem:[#allocation28_spill]] }
  0xa3   :  { %v172_v2 = vld [vmem:[#allocation5] sm:$0xff]  ;;  %v190_v3 = vsel %vm189_vm0, %v170_v0, 0.0  ;;  %v196_v4 = vsel %vm189_vm0, %v171_v1, 0.0  ;;  %v173_v5 = vld [vmem:[#allocation5 + $0x8] sm:$0xff]  ;;  %v6200_v28 = vld [vmem:[#allocation7] sm:$0xff]   ;;  %vm6713_vm1 = vmmov 0  }
  0xa4   :  { %191 = vadd.xlane.f32.xlu0 %v190_v3  ;;  %197 = vadd.xlane.f32.xlu1 %v196_v4  ;;  %v193_v6 = vsel %vm189_vm0, %v172_v2, 0.0  ;;  %v199_v7 = vsel %vm189_vm0, %v173_v5, 0.0  ;;  %v6201_v29 = vld [vmem:[#allocation10] sm:$0xff]   ;;  %v6202_v30 = vld [vmem:[#allocation7 + $0x8] sm:$0xff]   ;;  %vm472_vm2 = vcmask 64512   ;;  %vm575_vm4 = vcmask 130048  }
  0xa5   :  { %5653 = vmatprep.subr.bf16.mxu1 %v6200_v28  ;;  %5669 = vmatprep.subr.bf16.mxu0 %v6201_v29  ;;  %v6203_v31 = vld [vmem:[#allocation10 + $0x8] sm:$0xff]   ;;  %v6204_v32 = vld [vmem:[#allocation8] sm:$0xff]   ;;  %vm1163_vm5 = vcmask 1043456   ;;  %vm5080_vm6 = vcmask 1040384   ;;  %vm5186_vm7 = vcmask 7168  }
  0xa6   :  { %5654 = vmatpush3.bf16.msra.mxu1 %v6200_v28  ;;  %5670 = vmatpush3.bf16.msra.mxu0 %v6201_v29  ;;  %v5238_v52 = vld [vmem:[%s7559_s3] ss:$0 sm:$0xff] }
  0xa7   :  { %5655 = vmatprep.subr.bf16.mxu1 %v6202_v30  ;;  %5671 = vmatprep.subr.bf16.mxu0 %v6203_v31 }
  0xa8   :  { %194 = vadd.xlane.f32.xlu0 %v193_v6  ;;  %200 = vadd.xlane.f32.xlu1 %v199_v7  ;;  %v5237_v47 = vld [vmem:[%s7590_s25] ss:$0 sm:$0xff] }
  0xaa   :  { %5656 = vmatpush3.bf16.msra.mxu1 %v6202_v30  ;;  %5672 = vmatpush3.bf16.msra.mxu0 %v6203_v31 }
  0xab   :  { %5661 = vmatprep.subr.bf16.mxu1 %v6204_v32 }
 0x131   :  { %v192_v8 = vpop.xlane.xlu0 %191  ;;  %v198_v9 = vpop.xlane.xlu1 %197 }
 0x132   :  { %v203_v10 = vmul.f32 0.03125, %v192_v8  ;;  %v205_v11 = vmul.f32 0.03125, %v198_v9 }
 0x134   :  { %v207_v12 = vsub.f32 %v170_v0, %v203_v10  ;;  %v209_v13 = vsub.f32 %v171_v1, %v205_v11  ;;  %v6205_v1 = vld [vmem:[#allocation8 + $0x8] sm:$0xff]  }
 0x135   :  { %v195_v14 = vpop.xlane.xlu0 %194  ;;  %v201_v15 = vpop.xlane.xlu1 %200 }
 0x136   :  { %v204_v16 = vmul.f32 0.03125, %v195_v14  ;;  %v206_v17 = vmul.f32 0.03125, %v201_v15  ;;  %v211_v18 = vmul.f32 %v207_v12, %v207_v12  ;;  %v213_v19 = vmul.f32 %v209_v13, %v209_v13 }
 0x138   :  { %v208_v20 = vsub.f32 %v172_v2, %v204_v16  ;;  %v210_v21 = vsub.f32 %v173_v5, %v206_v17  ;;  %v215_v22 = vsel %vm189_vm0, %v211_v18, 0.0  ;;  %v221_v23 = vsel %vm189_vm0, %v213_v19, 0.0 }
 0x139   :  { %216 = vadd.xlane.f32.xlu0 %v215_v22  ;;  %v6712_v2 = vmov 0.0  }
 0x13a   :  { %v212_v24 = vmul.f32 %v208_v20, %v208_v20  ;;  %v214_v25 = vmul.f32 %v210_v21, %v210_v21  ;;  %5683 = vmatprep.subr.bf16.mxu0 %v6712_v2 }
 0x13c   :  { %v218_v26 = vsel %vm189_vm0, %v212_v24, 0.0  ;;  %v224_v27 = vsel %vm189_vm0, %v214_v25, 0.0 }
 0x13d   :  { %222 = vadd.xlane.f32.xlu0 %v221_v23  ;;  %219 = vadd.xlane.f32.xlu1 %v218_v26  ;;  %v174_v23 = vlaneseq }
 0x13f   :  { %v175_v24 = vshrl.u32 %v174_v23, 7  ;;  %v178_v26 = vand.u32 127, %v174_v23  ;;  %v6209_v23 = vld [vmem:[#allocation7 + $0x18] sm:$0xff]  }
 0x141   :  { %225 = vadd.xlane.f32.xlu1 %v224_v27  ;;  %v176_v25 = vadd.s32 8, %v175_v24  ;;  %v6210_v24 = vld [vmem:[#allocation10 + $0x10] sm:$0xff]  }
 0x143   :  { %vm182_vm3 = vcmp.le.s32.totalorder %v178_v26, %v176_v25  ;;  %v6211_v25 = vld [vmem:[#allocation10 + $0x18] sm:$0xff]  }
 0x1c6   :  { %v217_v33 = vpop.xlane.xlu0 %216 }
 0x1c7   :  { %v227_v34 = vmul.f32 0.03125, %v217_v33 }
 0x1c9   :  { %v231_v35 = vadd.f32 1e-05, %v227_v34  ;;  %v6714_v34 = vmov -1e+30  }
 0x1ca   :  { %v220_v36 = vpop.xlane.xlu1 %219  ;;  %v223_v37 = vpop.xlane.xlu0 %222 }
 0x1cb   :  { %6270 = vrsqrt.f32 %v231_v35  ;;  %v228_v38 = vmul.f32 0.03125, %v220_v36  ;;  %v229_v39 = vmul.f32 0.03125, %v223_v37  ;;  %v6978_v35 = vsel %vm182_vm3, 0.0, %v6714_v34 }
 0x1cd   :  { %v232_v40 = vadd.f32 1e-05, %v228_v38  ;;  %v233_v41 = vadd.f32 1e-05, %v229_v39 }
 0x1ce   :  { %v226_v42 = vpop.xlane.xlu1 %225 }
 0x1cf   :  { %6272 = vrsqrt.f32 %v232_v40  ;;  %v230_v43 = vmul.f32 0.03125, %v226_v42 }
 0x1d0   :  { %6274 = vrsqrt.f32 %v233_v41 }
 0x1d1   :  { %v234_v44 = vadd.f32 1e-05, %v230_v43 }
 0x1d3   :  { %6276 = vrsqrt.f32 %v234_v44 }
 0x1d5   :  { %v6271_v45 = vpop.eup %6270 }
 0x1d6   :  { %v239_v46 = vmul.f32 %v6271_v45, %v207_v12 }
 0x1d8   :  { %v249_v50 = vmul.f32 %v5237_v47, %v239_v46 }
 0x1d9   :  { %v6273_v48 = vpop.eup %6272 }
 0x1da   :  { %v6275_v49 = vpop.eup %6274  ;;  %v240_v51 = vmul.f32 %v6273_v48, %v208_v20  ;;  %v259_v56 = vadd.f32 %v5238_v52, %v249_v50 }
 0x1db   :  { %v241_v53 = vmul.f32 %v6275_v49, %v209_v13 }
 0x1dc   :  { %v250_v54 = vmul.f32 %v5237_v47, %v240_v51 }
 0x1dd   :  { %v6277_v55 = vpop.eup %6276  ;;  %v251_v58 = vmul.f32 %v5237_v47, %v241_v53 }
 0x1de   :  { %v260_v57 = vadd.f32 %v5238_v52, %v250_v54  ;;  %v242_v59 = vmul.f32 %v6277_v55, %v210_v21 }
 0x1df   :  { %v261_v62 = vadd.f32 %v5238_v52, %v251_v58 }
 0x1e0   :  { %v6946_v60 = vpack.c.bf16 %v260_v57, %v259_v56  ;;  %v252_v61 = vmul.f32 %v5237_v47, %v242_v59 }
 0x1e2   :  { %v262_v63 = vadd.f32 %v5238_v52, %v252_v61  ;;  %5657 = vmatprep.mubr.msk.bf16.mxu1 %vm189_vm0, %v6946_v60  ;;  %5673 = vmatprep.mubr.msk.bf16.mxu0 %vm189_vm0, %v6946_v60 }
 0x1e4   :  { %v6952_v0 = vpack.c.bf16 %v262_v63, %v261_v62 }
 0x1e6   :  { %5658 = vmatmul.mubr.msk.bf16.vlgmr.msra.gmra.mrb[0].mxu1 %vm189_vm0, %v6952_v0  ;;  %5674 = vmatmul.mubr.msk.bf16.vlgmr.msra.gmra.mrb[0].mxu0 %vm189_vm0, %v6952_v0 }
 0x1e7   :  { %5662 = vmatpush3.bf16.msra.mxu1 %v6204_v32  ;;  %5665 = vmatprep.mubr.msk.bf16.mxu1 %vm189_vm0, %v6946_v60 }
 0x1e8   :  { %5663 = vmatprep.subr.bf16.mxu1 %v6205_v1  ;;  %5685 = vmatprep.mubr.msk.bf16.mxu0 %vm6713_vm1, %v6712_v2 }
 0x1eb   :  { %5664 = vmatpush3.bf16.msra.mxu1 %v6205_v1 }
 0x1ec   :  { %5677 = vmatprep.subr.bf16.mxu1 %v6712_v2 }
 0x1ee   :  { %5666 = vmatmul.mubr.msk.bf16.vlgmr.msra.gmra.mrb[4].mxu1 %vm189_vm0, %v6952_v0 }
 0x1ef   :  { %5679 = vmatprep.mubr.msk.bf16.mxu1 %vm6713_vm1, %v6712_v2 }
 0x2b9   :  { %v5659_v3 = vpop.f32.mrb[0].mxu1  ;;  %v5675_v4 = vpop.f32.mrb[0].mxu0 }
 0x2ba   :  { %v321_v5 = vpop.f32.mrb[1].mxu1  ;;  %v451_v6 = vpop.f32.mrb[1].mxu0 }
 0x2bb   :  { %v5660_v7 = vpop.f32.mrb[2].mxu1  ;;  %v5676_v8 = vpop.f32.mrb[2].mxu0 }
 0x2bc   :  { %v467_v9 = vpack.c.bf16 %v5660_v7, %v5659_v3  ;;  %v471_v10 = vpack.c.bf16 %v5676_v8, %v5675_v4  ;;  %v324_v11 = vpop.f32.mrb[3].mxu1  ;;  %v454_v12 = vpop.f32.mrb[3].mxu0  ;;  %v6207_v7 = vld [vmem:[#allocation7 + $0x10] sm:$0xff]  }
 0x2bd   :  { %v466_v13 = vpack.c.bf16 %v324_v11, %v321_v5  ;;  %v470_v14 = vpack.c.bf16 %v454_v12, %v451_v6  ;;  %v6206_v6 = vld [vmem:[#allocation8 + $0x10] sm:$0xff]  }
 0x2c1   :  { %v5667_v15 = vpop.f32.mrb[4].mxu1 }
 0x2c2   :  { %v386_v16 = vpop.f32.mrb[5].mxu1 }
 0x2c3   :  { %v5668_v17 = vpop.f32.mrb[6].mxu1 }
 0x2c4   :  { %v469_v18 = vpack.c.bf16 %v5668_v17, %v5667_v15  ;;  %v389_v19 = vpop.f32.mrb[7].mxu1 }
 0x2c5   :  { %v468_v20 = vpack.c.bf16 %v389_v19, %v386_v16 }
 0x2c6   :  { %v524_v21 = vsel %vm472_vm2, %v469_v18, 0  ;;  %v6208_v18 = vld [vmem:[#allocation8 + $0x18] sm:$0xff]  }
 0x2c7   :  { %v477_v22 = vsel %vm472_vm2, %v468_v20, 0  ;;  %5684 = vmatpush3.bf16.xpose.msra.mxu0 %v524_v21 }
 0x2c8   :  { %5678 = vmatpush3.bf16.xpose.msra.mxu1 %v477_v22  ;;  %5695 = vmatprep.subr.bf16.mxu0 %v6712_v2 }
 0x2c9   :  { %5689 = vmatprep.subr.bf16.mxu1 %v6712_v2 }
 0x2ce   :  { %5686 = vmatmul.mubr.msk.bf16.vlgmr.msra.gmra.mrb[4].mxu0 %vm472_vm2, %v467_v9 }
 0x2cf   :  { %5680 = vmatmul.mubr.msk.bf16.vlgmr.msra.gmra.mrb[8].mxu1 %vm472_vm2, %v466_v13  ;;  %5696 = vmatpush3.bf16.msra.mxu0 %v471_v10 }
 0x2d0   :  { %5690 = vmatpush3.bf16.msra.mxu1 %v470_v14  ;;  %5697 = vmatprep.mubr.msk.bf16.mxu0 %vm6713_vm1, %v6712_v2 }
 0x2d1   :  { %5691 = vmatprep.mubr.msk.bf16.mxu1 %vm6713_vm1, %v6712_v2  ;;  %5709 = vmatprep.subr.bf16.mxu0 %v6206_v6 }
 0x2d2   :  { %5701 = vmatprep.subr.bf16.mxu1 %v6207_v7 }
 0x3a1   :  { %v560_v27 = vpop.f32.mrb[4].mxu0 }
 0x3a2   :  { %v569_v28 = vmul.f32 0.35355338, %v560_v27  ;;  %v513_v29 = vpop.f32.mrb[8].mxu1  ;;  %v5687_v30 = vpop.f32.mrb[5].mxu0 }
 0x3a3   :  { %v567_v31 = vmul.f32 0.35355338, %v513_v29  ;;  %v5681_v32 = vpop.f32.mrb[9].mxu1  ;;  %v563_v33 = vpop.f32.mrb[6].mxu0 }
 0x3a4   :  { %v570_v36 = vmul.f32 0.35355338, %v563_v33  ;;  %v516_v37 = vpop.f32.mrb[10].mxu1  ;;  %v5688_v38 = vpop.f32.mrb[7].mxu0  ;;  %v582_v39 = vsel %vm575_vm4, %v569_v28, -inf }
 0x3a5   :  { %v568_v40 = vmul.f32 0.35355338, %v516_v37  ;;  %583 = vmax.xlane.f32.xlu0 %v582_v39  ;;  %v5682_v41 = vpop.f32.mrb[11].mxu1  ;;  %v576_v44 = vsel %vm575_vm4, %v567_v31, -inf }
 0x3a6   :  { %v574_v42 = vadd.f32 %v570_v36, %v6978_v35 }
 0x3a7   :  { %v572_v45 = vadd.f32 %v568_v40, %v6978_v35 }
 0x3a8   :  { %v585_v43 = vsel %vm575_vm4, %v574_v42, -inf }
 0x3a9   :  { %586 = vmax.xlane.f32.xlu1 %v585_v43  ;;  %577 = vmax.xlane.f32.xlu0 %v576_v44  ;;  %v579_v46 = vsel %vm575_vm4, %v572_v45, -inf }
 0x3ad   :  { %580 = vmax.xlane.f32.xlu1 %v579_v46 }
 0x432   :  { %v584_v47 = vpop.xlane.xlu0 %583 }
 0x433   :  { %v590_v48 = vsub.f32 %v569_v28, %v584_v47 }
 0x435   :  { %v596_v49 = vmul.f32 1.442695, %v590_v48 }
 0x436   :  { %v587_v50 = vpop.xlane.xlu1 %586  ;;  %v578_v51 = vpop.xlane.xlu0 %577 }
 0x437   :  { %6278 = vpow2.f32 %v596_v49  ;;  %v591_v52 = vsub.f32 %v574_v42, %v587_v50  ;;  %v588_v53 = vsub.f32 %v567_v31, %v578_v51 }
 0x439   :  { %v598_v54 = vmul.f32 1.442695, %v591_v52  ;;  %v592_v55 = vmul.f32 1.442695, %v588_v53 }
 0x43a   :  { %v581_v56 = vpop.xlane.xlu1 %580 }
 0x43b   :  { %6280 = vpow2.f32 %v598_v54  ;;  %v589_v57 = vsub.f32 %v572_v45, %v581_v56 }
 0x43c   :  { %6282 = vpow2.f32 %v592_v55 }
 0x43d   :  { %v594_v58 = vmul.f32 1.442695, %v589_v57 }
 0x43f   :  { %6284 = vpow2.f32 %v594_v58 }
 0x441   :  { %v6279_v59 = vpop.eup %6278 }
 0x442   :  { %v606_v61 = vsel %vm575_vm4, %v6279_v59, 0.0 }
 0x443   :  { %607 = vadd.xlane.f32.xlu0 %v606_v61 }
 0x445   :  { %v6281_v62 = vpop.eup %6280 }
 0x446   :  { %v6283_v63 = vpop.eup %6282  ;;  %v609_v1 = vsel %vm575_vm4, %v6281_v62, 0.0 }
 0x447   :  { %v600_v3 = vsel %vm575_vm4, %v6283_v63, 0.0  ;;  %610 = vadd.xlane.f32.xlu1 %v609_v1 }
 0x448   :  { %601 = vadd.xlane.f32.xlu0 %v600_v3 }
 0x449   :  { %v6285_v4 = vpop.eup %6284 }
 0x44a   :  { %v603_v5 = vsel %vm575_vm4, %v6285_v4, 0.0 }
 0x44b   :  { %604 = vadd.xlane.f32.xlu1 %v603_v5 }
 0x4d0   :  { %v608_v8 = vpop.xlane.xlu0 %607 }
 0x4d1   :  { %6286 = vrcp.f32 %v608_v8 }
 0x4d4   :  { %v611_v9 = vpop.xlane.xlu1 %610 }
 0x4d5   :  { %v602_v10 = vpop.xlane.xlu0 %601  ;;  %6288 = vrcp.f32 %v611_v9 }
 0x4d6   :  { %6290 = vrcp.f32 %v602_v10 }
 0x4d8   :  { %v605_v11 = vpop.xlane.xlu1 %604 }
 0x4d9   :  { %6292 = vrcp.f32 %v605_v11 }
 0x4db   :  { %v6287_v12 = vpop.eup %6286 }
 0x4dc   :  { %v618_v14 = vmul.f32 %v6287_v12, %v6279_v59 }
 0x4df   :  { %v6289_v13 = vpop.eup %6288 }
 0x4e0   :  { %v619_v15 = vmul.f32 %v6289_v13, %v6281_v62  ;;  %v6291_v16 = vpop.eup %6290 }
 0x4e1   :  { %v616_v20 = vmul.f32 %v6291_v16, %v6283_v63 }
 0x4e2   :  { %v621_v17 = vpack.c.bf16 %v619_v15, %v618_v14 }
 0x4e3   :  { %v6293_v19 = vpop.eup %6292 }
 0x4e4   :  { %v617_v21 = vmul.f32 %v6293_v19, %v6285_v4  ;;  %5698 = vmatmul.mubr.msk.bf16.vlgmr.msra.gmra.mrb[8].mxu0 %vm575_vm4, %v621_v17 }
 0x4e5   :  { %5710 = vmatpush3.bf16.msra.mxu0 %v6206_v6  ;;  %5713 = vmatprep.mubr.msk.bf16.mxu0 %vm189_vm0, %v6946_v60 }
 0x4e6   :  { %v620_v22 = vpack.c.bf16 %v617_v21, %v616_v20  ;;  %5711 = vmatprep.subr.bf16.mxu0 %v6208_v18 }
 0x4e8   :  { %5692 = vmatmul.mubr.msk.bf16.vlgmr.msra.gmra.mrb[12].mxu1 %vm575_vm4, %v620_v22 }
 0x4e9   :  { %5702 = vmatpush3.bf16.msra.mxu1 %v6207_v7  ;;  %5705 = vmatprep.mubr.msk.bf16.mxu1 %vm189_vm0, %v6946_v60 }
 0x4ea   :  { %5712 = vmatpush3.bf16.msra.mxu0 %v6208_v18  ;;  %5703 = vmatprep.subr.bf16.mxu1 %v6209_v23 }
 0x4eb   :  { %5725 = vmatprep.subr.bf16.mxu0 %v6712_v2 }
 0x4ed   :  { %5714 = vmatmul.mubr.msk.bf16.vlgmr.msra.gmra.mrb[12].mxu0 %vm189_vm0, %v6952_v0  ;;  %5704 = vmatpush3.bf16.msra.mxu1 %v6209_v23 }
 0x4ee   :  { %5717 = vmatprep.subr.bf16.mxu1 %v6210_v24  ;;  %5727 = vmatprep.mubr.msk.bf16.mxu0 %vm6713_vm1, %v6712_v2 }
 0x4f0   :  { %5706 = vmatmul.mubr.msk.bf16.vlgmr.msra.gmra.mrb[16].mxu1 %vm189_vm0, %v6952_v0 }
 0x4f1   :  { %5718 = vmatpush3.bf16.msra.mxu1 %v6210_v24  ;;  %5721 = vmatprep.mubr.msk.bf16.mxu1 %vm189_vm0, %v6946_v60 }
 0x4f2   :  { %5719 = vmatprep.subr.bf16.mxu1 %v6211_v25 }
 0x4f5   :  { %5720 = vmatpush3.bf16.msra.mxu1 %v6211_v25 }
 0x4f6   :  { %5731 = vmatprep.subr.bf16.mxu1 %v6712_v2 }
 0x4f8   :  { %5722 = vmatmul.mubr.msk.bf16.vlgmr.msra.gmra.mrb[20].mxu1 %vm189_vm0, %v6952_v0 }
 0x4f9   :  { %5733 = vmatprep.mubr.msk.bf16.mxu1 %vm6713_vm1, %v6712_v2 }
 0x5b7   :  { %v7010_v26 = vpop.f32.mrb[8].mxu0 }
 0x5b8   :  { %v5699_v27 = vpop.f32.mrb[9].mxu0 }
 0x5b9   :  { %v7012_v28 = vpop.f32.mrb[10].mxu0 }
 0x5ba   :  { %v711_v29 = vpack.c.bf16 %v7012_v28, %v7010_v26  ;;  %v5700_v30 = vpop.f32.mrb[11].mxu0 }
 0x5bb   :  { %v7016_v31 = vpop.f32.mrb[12].mxu1 }
 0x5bc   :  { %v5693_v32 = vpop.f32.mrb[13].mxu1 }
 0x5bd   :  { %v7018_v33 = vpop.f32.mrb[14].mxu1 }
 0x5be   :  { %v710_v34 = vpack.c.bf16 %v7018_v33, %v7016_v31  ;;  %v5694_v36 = vpop.f32.mrb[15].mxu1 }
 0x5c0   :  { %v5715_v37 = vpop.f32.mrb[12].mxu0 }
 0x5c1   :  { %v830_v38 = vpop.f32.mrb[13].mxu0 }
 0x5c2   :  { %v5716_v39 = vpop.f32.mrb[14].mxu0 }
 0x5c3   :  { %v914_v40 = vpack.c.bf16 %v5716_v39, %v5715_v37  ;;  %v833_v41 = vpop.f32.mrb[15].mxu0  ;;  %v5707_v42 = vpop.f32.mrb[16].mxu1 }
 0x5c4   :  { %v913_v43 = vpack.c.bf16 %v833_v41, %v830_v38  ;;  %v764_v44 = vpop.f32.mrb[17].mxu1  ;;  %v6212_v41 = vld [vmem:[#allocation7 + $0x20] sm:$0xff]  }
 0x5c5   :  { %v968_v45 = vsel %vm472_vm2, %v914_v40, 0  ;;  %v5708_v46 = vpop.f32.mrb[18].mxu1 }
 0x5c6   :  { %v921_v47 = vsel %vm472_vm2, %v913_v43, 0  ;;  %v912_v48 = vpack.c.bf16 %v5708_v46, %v5707_v42  ;;  %5732 = vmatpush3.bf16.xpose.msra.mxu1 %v968_v45  ;;  %v767_v49 = vpop.f32.mrb[19].mxu1 }
 0x5c7   :  { %v911_v50 = vpack.c.bf16 %v767_v49, %v764_v44  ;;  %5726 = vmatpush3.bf16.xpose.msra.mxu0 %v921_v47  ;;  %5743 = vmatprep.subr.bf16.mxu1 %v6712_v2 }
 0x5c8   :  { %5737 = vmatprep.subr.bf16.mxu0 %v6712_v2 }
 0x5cb   :  { %v5723_v51 = vpop.f32.mrb[20].mxu1 }
 0x5cc   :  { %v896_v52 = vpop.f32.mrb[21].mxu1 }
 0x5cd   :  { %5734 = vmatmul.mubr.msk.bf16.vlgmr.msra.gmra.mrb[24].mxu1 %vm472_vm2, %v912_v48  ;;  %v5724_v53 = vpop.f32.mrb[22].mxu1 }
 0x5ce   :  { %v916_v54 = vpack.c.bf16 %v5724_v53, %v5723_v51  ;;  %5728 = vmatmul.mubr.msk.bf16.vlgmr.msra.gmra.mrb[16].mxu0 %vm472_vm2, %v911_v50  ;;  %v899_v55 = vpop.f32.mrb[23].mxu1  ;;  %5745 = vmatprep.mubr.msk.bf16.mxu1 %vm6713_vm1, %v6712_v2 }
 0x5cf   :  { %v915_v56 = vpack.c.bf16 %v899_v55, %v896_v52  ;;  %5739 = vmatprep.mubr.msk.bf16.mxu0 %vm6713_vm1, %v6712_v2 }
 0x5d0   :  { %5744 = vmatpush3.bf16.msra.mxu1 %v916_v54 }
 0x5d1   :  { %5738 = vmatpush3.bf16.msra.mxu0 %v915_v56  ;;  %5761 = vmatprep.subr.bf16.mxu1 %v6212_v41  ;;  %v6213_v56 = vld [vmem:[#allocation7 + $0x28] sm:$0xff]  }
 0x6a0   :  { %v1004_v57 = vpop.f32.mrb[24].mxu1 }
 0x6a1   :  { %v957_v58 = vpop.f32.mrb[16].mxu0  ;;  %v5735_v59 = vpop.f32.mrb[25].mxu1  ;;  %v1013_v1 = vmul.f32 0.35355338, %v1004_v57  ;;  %v6214_v57 = vld [vmem:[#allocation8 + $0x20] sm:$0xff]  }
 0x6a2   :  { %v1011_v61 = vmul.f32 0.35355338, %v957_v58  ;;  %v5729_v62 = vpop.f32.mrb[17].mxu0  ;;  %v1007_v63 = vpop.f32.mrb[26].mxu1  ;;  %v6215_v58 = vld [vmem:[#allocation8 + $0x28] sm:$0xff]  }
 0x6a3   :  { %v960_v3 = vpop.f32.mrb[18].mxu0  ;;  %v5736_v4 = vpop.f32.mrb[27].mxu1  ;;  %v1014_v5 = vmul.f32 0.35355338, %v1007_v63  ;;  %v1025_v11 = vsel %vm575_vm4, %v1013_v1, -inf }
 0x6a4   :  { %v1012_v6 = vmul.f32 0.35355338, %v960_v3  ;;  %v5730_v7 = vpop.f32.mrb[19].mxu0  ;;  %v1019_v8 = vsel %vm575_vm4, %v1011_v61, -inf  ;;  %v1156_v59 = vld [vmem:[#allocation11 + $0x4] sm:$0xf] }
 0x6a5   :  { %1020 = vmax.xlane.f32.xlu0 %v1019_v8  ;;  %v1018_v12 = vadd.f32 %v1014_v5, %v6978_v35  ;;  %6173 = vmatprep.subr.msk.bf16.mxu0 %vm1163_vm5, %v1156_v59  ;;  %v712_v62 = vld [vmem:[#allocation11] sm:$0xf] }
 0x6a6   :  { %v1016_v9 = vadd.f32 %v1012_v6, %v6978_v35 }
 0x6a7   :  { %v1028_v13 = vsel %vm575_vm4, %v1018_v12, -inf }
 0x6a8   :  { %v1022_v10 = vsel %vm575_vm4, %v1016_v9, -inf }
 0x6a9   :  { %1023 = vmax.xlane.f32.xlu1 %v1022_v10  ;;  %1026 = vmax.xlane.f32.xlu0 %v1025_v11  ;;  %v1223_v11 = vsel %vm1163_vm5, %v712_v62, 0 }
 0x6ad   :  { %1029 = vmax.xlane.f32.xlu1 %v1028_v13 }
 0x732   :  { %v1021_v14 = vpop.xlane.xlu0 %1020 }
 0x733   :  { %v1031_v15 = vsub.f32 %v1011_v61, %v1021_v14  ;;  %v1165_v61 = vsel %vm1163_vm5, %v1156_v59, 0 }
 0x735   :  { %v1035_v16 = vmul.f32 1.442695, %v1031_v15 }
 0x736   :  { %v1024_v17 = vpop.xlane.xlu1 %1023  ;;  %v1027_v18 = vpop.xlane.xlu0 %1026 }
 0x737   :  { %6294 = vpow2.f32 %v1035_v16  ;;  %v1032_v19 = vsub.f32 %v1016_v9, %v1024_v17  ;;  %v1033_v20 = vsub.f32 %v1013_v1, %v1027_v18 }
 0x739   :  { %v1037_v21 = vmul.f32 1.442695, %v1032_v19  ;;  %v1039_v22 = vmul.f32 1.442695, %v1033_v20  ;;  %v6217_v19 = vld [vmem:[#allocation10 + $0x28] sm:$0xff]  }
 0x73a   :  { %v1030_v23 = vpop.xlane.xlu1 %1029 }
 0x73b   :  { %6296 = vpow2.f32 %v1037_v21  ;;  %v1034_v24 = vsub.f32 %v1018_v12, %v1030_v23  ;;  %v6216_v12 = vld [vmem:[#allocation10 + $0x20] sm:$0xff]  }
 0x73c   :  { %6298 = vpow2.f32 %v1039_v22 }
 0x73d   :  { %v1041_v25 = vmul.f32 1.442695, %v1034_v24 }
 0x73f   :  { %6300 = vpow2.f32 %v1041_v25 }
 0x741   :  { %v6295_v27 = vpop.eup %6294 }
 0x742   :  { %v1043_v30 = vsel %vm575_vm4, %v6295_v27, 0.0 }
 0x743   :  { %1044 = vadd.xlane.f32.xlu0 %v1043_v30 }
 0x745   :  { %v6297_v32 = vpop.eup %6296 }
 0x746   :  { %v6299_v36 = vpop.eup %6298  ;;  %v1046_v37 = vsel %vm575_vm4, %v6297_v32, 0.0 }
 0x747   :  { %v1049_v38 = vsel %vm575_vm4, %v6299_v36, 0.0  ;;  %1047 = vadd.xlane.f32.xlu1 %v1046_v37 }
 0x748   :  { %1050 = vadd.xlane.f32.xlu0 %v1049_v38 }
 0x749   :  { %v6301_v39 = vpop.eup %6300 }
 0x74a   :  { %v1052_v40 = vsel %vm575_vm4, %v6301_v39, 0.0 }
 0x74b   :  { %1053 = vadd.xlane.f32.xlu1 %v1052_v40 }
 0x7d0   :  { %v1045_v42 = vpop.xlane.xlu0 %1044 }
 0x7d1   :  { %6302 = vrcp.f32 %v1045_v42 }
 0x7d4   :  { %v1048_v43 = vpop.xlane.xlu1 %1047 }
 0x7d5   :  { %v1051_v44 = vpop.xlane.xlu0 %1050  ;;  %6304 = vrcp.f32 %v1048_v43 }
 0x7d6   :  { %6306 = vrcp.f32 %v1051_v44 }
 0x7d8   :  { %v1054_v45 = vpop.xlane.xlu1 %1053 }
 0x7d9   :  { %6308 = vrcp.f32 %v1054_v45 }
 0x7db   :  { %v6303_v46 = vpop.eup %6302 }
 0x7dc   :  { %v1059_v48 = vmul.f32 %v6303_v46, %v6295_v27 }
 0x7df   :  { %v6305_v47 = vpop.eup %6304 }
 0x7e0   :  { %v1060_v49 = vmul.f32 %v6305_v47, %v6297_v32  ;;  %v6307_v50 = vpop.eup %6306 }
 0x7e1   :  { %v1061_v53 = vmul.f32 %v6307_v50, %v6299_v36 }
 0x7e2   :  { %v1063_v51 = vpack.c.bf16 %v1060_v49, %v1059_v48 }
 0x7e3   :  { %v6309_v52 = vpop.eup %6308 }
 0x7e4   :  { %v1062_v54 = vmul.f32 %v6309_v52, %v6301_v39  ;;  %5740 = vmatmul.mubr.msk.bf16.vlgmr.msra.gmra.mrb[20].mxu0 %vm575_vm4, %v1063_v51 }
 0x7e5   :  { %5750 = vmatpush3.bf16.msra.mxu0 %v1165_v61 }
 0x7e6   :  { %v1064_v55 = vpack.c.bf16 %v1062_v54, %v1061_v53  ;;  %6174 = vmatprep.subr.msk.bf16.mxu0 %vm1163_vm5, %v712_v62 }
 0x7e8   :  { %5746 = vmatmul.mubr.msk.bf16.vlgmr.msra.gmra.mrb[28].mxu1 %vm575_vm4, %v1064_v55 }
 0x7e9   :  { %5762 = vmatpush3.bf16.msra.mxu1 %v6212_v41  ;;  %5765 = vmatprep.mubr.msk.bf16.mxu1 %vm189_vm0, %v6946_v60 }
 0x7ea   :  { %5763 = vmatprep.subr.bf16.mxu1 %v6213_v56 }
 0x7ed   :  { %5764 = vmatpush3.bf16.msra.mxu1 %v6213_v56 }
 0x7ee   :  { %5769 = vmatprep.subr.bf16.mxu1 %v6214_v57 }
 0x7f0   :  { %5766 = vmatmul.mubr.msk.bf16.vlgmr.msra.gmra.mrb[32].mxu1 %vm189_vm0, %v6952_v0 }
 0x7f1   :  { %5770 = vmatpush3.bf16.msra.mxu1 %v6214_v57  ;;  %5773 = vmatprep.mubr.msk.bf16.mxu1 %vm189_vm0, %v6946_v60 }
 0x7f2   :  { %5771 = vmatprep.subr.bf16.mxu1 %v6215_v58 }
 0x7f5   :  { %5772 = vmatpush3.bf16.msra.mxu1 %v6215_v58 }
 0x7f6   :  { %5785 = vmatprep.subr.bf16.mxu1 %v6712_v2 }
 0x7f8   :  { %5774 = vmatmul.mubr.msk.bf16.vlgmr.msra.gmra.mrb[36].mxu1 %vm189_vm0, %v6952_v0 }
 0x7f9   :  { %5787 = vmatprep.mubr.msk.bf16.mxu1 %vm6713_vm1, %v6712_v2 }
 0x8b7   :  { %v1102_v63 = vpop.f32.mrb[20].mxu0 }
 0x8b8   :  { %v5741_v1 = vpop.f32.mrb[21].mxu0 }
 0x8b9   :  { %v1105_v3 = vpop.f32.mrb[22].mxu0 }
 0x8ba   :  { %v1153_v4 = vpack.c.bf16 %v1105_v3, %v1102_v63  ;;  %v5742_v5 = vpop.f32.mrb[23].mxu0 }
 0x8bb   :  { %v1146_v6 = vpop.f32.mrb[28].mxu1 }
 0x8bc   :  { %v5747_v7 = vpop.f32.mrb[29].mxu1  ;;  %5751 = vmatprep.mubr.msk.bf16.mxu0 %vm472_vm2, %v1153_v4 }
 0x8bd   :  { %v1149_v8 = vpop.f32.mrb[30].mxu1 }
 0x8be   :  { %v1154_v9 = vpack.c.bf16 %v1149_v8, %v1146_v6  ;;  %v5748_v10 = vpop.f32.mrb[31].mxu1 }
 0x8c0   :  { %5752 = vmatmul.mubr.msk.bf16.vlgmr.msra.gmra.mrb[24].mxu0 %vm472_vm2, %v1154_v9 }
 0x8c1   :  { %5757 = vmatprep.mubr.msk.bf16.mxu0 %vm472_vm2, %v710_v34  ;;  %5756 = vmatpush3.bf16.msra.mxu0 %v1223_v11 }
 0x8c2   :  { %5777 = vmatprep.subr.bf16.mxu0 %v6216_v12 }
 0x8c3   :  { %v5767_v13 = vpop.f32.mrb[32].mxu1 }
 0x8c4   :  { %v1325_v14 = vpop.f32.mrb[33].mxu1 }
 0x8c5   :  { %v5768_v15 = vpop.f32.mrb[34].mxu1 }
 0x8c6   :  { %v1473_v16 = vpack.c.bf16 %v5768_v15, %v5767_v13  ;;  %v1328_v17 = vpop.f32.mrb[35].mxu1 }
 0x8c7   :  { %v1472_v18 = vpack.c.bf16 %v1328_v17, %v1325_v14 }
 0x8cb   :  { %v5775_v20 = vpop.f32.mrb[36].mxu1 }
 0x8cc   :  { %5758 = vmatmul.mubr.msk.bf16.vlgmr.msra.gmra.mrb[24].mxu0 %vm472_vm2, %v711_v29  ;;  %v1391_v21 = vpop.f32.mrb[37].mxu1 }
 0x8cd   :  { %5778 = vmatpush3.bf16.msra.mxu0 %v6216_v12  ;;  %v5776_v31 = vpop.f32.mrb[38].mxu1  ;;  %5781 = vmatprep.mubr.msk.bf16.mxu0 %vm189_vm0, %v6946_v60  ;;  %v6218_v12 = vld [vmem:[#allocation7 + $0x30] sm:$0xff]  }
 0x8ce   :  { %v1475_v33 = vpack.c.bf16 %v5776_v31, %v5775_v20  ;;  %v1394_v34 = vpop.f32.mrb[39].mxu1  ;;  %5779 = vmatprep.subr.bf16.mxu0 %v6217_v19  ;;  %v6219_v31 = vld [vmem:[#allocation7 + $0x38] sm:$0xff]  }
 0x8cf   :  { %v1474_v22 = vpack.c.bf16 %v1394_v34, %v1391_v21  ;;  %v6220_v34 = vld [vmem:[#allocation8 + $0x30] sm:$0xff]  }
 0x8d0   :  { %v1529_v26 = vsel %vm472_vm2, %v1475_v33, 0 }
 0x8d1   :  { %v1482_v23 = vsel %vm472_vm2, %v1474_v22, 0  ;;  %5780 = vmatpush3.bf16.msra.mxu0 %v6217_v19 }
 0x8d2   :  { %5786 = vmatpush3.bf16.xpose.msra.mxu1 %v1482_v23  ;;  %5791 = vmatprep.subr.bf16.mxu0 %v6712_v2 }
 0x8d3   :  { %5797 = vmatprep.subr.bf16.mxu1 %v6712_v2 }
 0x8d4   :  { %5782 = vmatmul.mubr.msk.bf16.vlgmr.msra.gmra.mrb[28].mxu0 %vm189_vm0, %v6952_v0 }
 0x8d5   :  { %5793 = vmatprep.mubr.msk.bf16.mxu0 %vm6713_vm1, %v6712_v2 }
 0x8d9   :  { %5788 = vmatmul.mubr.msk.bf16.vlgmr.msra.gmra.mrb[40].mxu1 %vm472_vm2, %v1472_v18 }
 0x8da   :  { %5792 = vmatpush3.bf16.xpose.msra.mxu0 %v1529_v26  ;;  %5799 = vmatprep.mubr.msk.bf16.mxu1 %vm6713_vm1, %v6712_v2 }
 0x8db   :  { %5803 = vmatprep.subr.bf16.mxu0 %v6712_v2 }
 0x8e1   :  { %5794 = vmatmul.mubr.msk.bf16.vlgmr.msra.gmra.mrb[32].mxu0 %vm472_vm2, %v1473_v16 }
 0x8e2   :  { %5805 = vmatprep.mubr.msk.bf16.mxu0 %vm6713_vm1, %v6712_v2 }
 0x9a7   :  { %v5783_v28 = vpop.f32.mrb[28].mxu0 }
 0x9a8   :  { %v1457_v29 = vpop.f32.mrb[29].mxu0 }
 0x9a9   :  { %v5784_v24 = vpop.f32.mrb[30].mxu0 }
 0x9aa   :  { %v1477_v25 = vpack.c.bf16 %v5784_v24, %v5783_v28  ;;  %v1460_v27 = vpop.f32.mrb[31].mxu0  ;;  %v1717_v24 = vld [vmem:[#allocation11 + $0x8] sm:$0xf] }
 0x9ab   :  { %v1476_v30 = vpack.c.bf16 %v1460_v27, %v1457_v29  ;;  %v6221_v29 = vld [vmem:[#allocation8 + $0x38] sm:$0xff]   ;;  %v6222_v27 = vld [vmem:[#allocation10 + $0x30] sm:$0xff]  }
 0x9ac   :  { %v1518_v32 = vpop.f32.mrb[40].mxu1  ;;  %5804 = vmatpush3.bf16.msra.mxu0 %v1477_v25  ;;  %v1725_v25 = vsel %vm1163_vm5, %v1717_v24, 0 }
 0x9ad   :  { %v1572_v36 = vmul.f32 0.35355338, %v1518_v32  ;;  %v5789_v37 = vpop.f32.mrb[41].mxu1  ;;  %5798 = vmatpush3.bf16.msra.mxu1 %v1476_v30  ;;  %6175 = vmatprep.subr.msk.bf16.mxu0 %vm1163_vm5, %v1717_v24 }
 0x9ae   :  { %v1521_v38 = vpop.f32.mrb[42].mxu1  ;;  %5815 = vmatprep.subr.bf16.mxu1 %v6218_v12 }
 0x9af   :  { %v1573_v39 = vmul.f32 0.35355338, %v1521_v38  ;;  %v5790_v40 = vpop.f32.mrb[43].mxu1  ;;  %v1580_v41 = vsel %vm575_vm4, %v1572_v36, -inf }
 0x9b0   :  { %1581 = vmax.xlane.f32.xlu0 %v1580_v41 }
 0x9b1   :  { %v1577_v42 = vadd.f32 %v1573_v39, %v6978_v35 }
 0x9b3   :  { %v1583_v43 = vsel %vm575_vm4, %v1577_v42, -inf }
 0x9b4   :  { %v1565_v44 = vpop.f32.mrb[32].mxu0  ;;  %1584 = vmax.xlane.f32.xlu1 %v1583_v43 }
 0x9b5   :  { %v1574_v45 = vmul.f32 0.35355338, %v1565_v44  ;;  %v5795_v46 = vpop.f32.mrb[33].mxu0 }
 0x9b6   :  { %v1568_v47 = vpop.f32.mrb[34].mxu0 }
 0x9b7   :  { %v1575_v48 = vmul.f32 0.35355338, %v1568_v47  ;;  %v5796_v49 = vpop.f32.mrb[35].mxu0  ;;  %v1586_v50 = vsel %vm575_vm4, %v1574_v45, -inf }
 0x9b8   :  { %1587 = vmax.xlane.f32.xlu0 %v1586_v50  ;;  %v6223_v49 = vld [vmem:[#allocation10 + $0x38] sm:$0xff]  }
 0x9b9   :  { %v1579_v51 = vadd.f32 %v1575_v48, %v6978_v35 }
 0x9bb   :  { %v1589_v52 = vsel %vm575_vm4, %v1579_v51, -inf }
 0x9bc   :  { %1590 = vmax.xlane.f32.xlu1 %v1589_v52 }
 0xa3d   :  { %v1582_v53 = vpop.xlane.xlu0 %1581 }
 0xa3e   :  { %v1592_v54 = vsub.f32 %v1572_v36, %v1582_v53 }
 0xa40   :  { %v1596_v55 = vmul.f32 1.442695, %v1592_v54 }
 0xa41   :  { %v1585_v56 = vpop.xlane.xlu1 %1584 }
 0xa42   :  { %6310 = vpow2.f32 %v1596_v55  ;;  %v1593_v57 = vsub.f32 %v1577_v42, %v1585_v56 }
 0xa44   :  { %v1598_v58 = vmul.f32 1.442695, %v1593_v57 }
 0xa45   :  { %v1588_v59 = vpop.xlane.xlu0 %1587 }
 0xa46   :  { %6312 = vpow2.f32 %v1598_v58  ;;  %v1594_v61 = vsub.f32 %v1574_v45, %v1588_v59 }
 0xa48   :  { %v1600_v62 = vmul.f32 1.442695, %v1594_v61 }
 0xa49   :  { %v1591_v63 = vpop.xlane.xlu1 %1590 }
 0xa4a   :  { %6314 = vpow2.f32 %v1600_v62  ;;  %v1595_v1 = vsub.f32 %v1579_v51, %v1591_v63 }
 0xa4c   :  { %v6311_v3 = vpop.eup %6310  ;;  %v1602_v4 = vmul.f32 1.442695, %v1595_v1 }
 0xa4d   :  { %v1604_v5 = vsel %vm575_vm4, %v6311_v3, 0.0 }
 0xa4e   :  { %6316 = vpow2.f32 %v1602_v4  ;;  %1605 = vadd.xlane.f32.xlu0 %v1604_v5 }
 0xa50   :  { %v6313_v6 = vpop.eup %6312 }
 0xa51   :  { %v1607_v7 = vsel %vm575_vm4, %v6313_v6, 0.0 }
 0xa52   :  { %1608 = vadd.xlane.f32.xlu1 %v1607_v7 }
 0xa54   :  { %v6315_v8 = vpop.eup %6314 }
 0xa55   :  { %v1610_v9 = vsel %vm575_vm4, %v6315_v8, 0.0 }
 0xa56   :  { %1611 = vadd.xlane.f32.xlu0 %v1610_v9 }
 0xa58   :  { %v6317_v10 = vpop.eup %6316 }
 0xa59   :  { %v1613_v11 = vsel %vm575_vm4, %v6317_v10, 0.0 }
 0xa5a   :  { %1614 = vadd.xlane.f32.xlu1 %v1613_v11 }
 0xadb   :  { %v1606_v13 = vpop.xlane.xlu0 %1605 }
 0xadc   :  { %6318 = vrcp.f32 %v1606_v13 }
 0xadf   :  { %v1609_v14 = vpop.xlane.xlu1 %1608 }
 0xae0   :  { %6320 = vrcp.f32 %v1609_v14 }
 0xae3   :  { %v1612_v15 = vpop.xlane.xlu0 %1611 }
 0xae4   :  { %6322 = vrcp.f32 %v1612_v15 }
 0xae6   :  { %v6319_v17 = vpop.eup %6318 }
 0xae7   :  { %v1615_v16 = vpop.xlane.xlu1 %1614  ;;  %v1620_v19 = vmul.f32 %v6319_v17, %v6311_v3 }
 0xae8   :  { %6324 = vrcp.f32 %v1615_v16 }
 0xaea   :  { %v6321_v18 = vpop.eup %6320 }
 0xaeb   :  { %v1621_v20 = vmul.f32 %v6321_v18, %v6313_v6 }
 0xaed   :  { %v1624_v21 = vpack.c.bf16 %v1621_v20, %v1620_v19 }
 0xaee   :  { %v6323_v33 = vpop.eup %6322 }
 0xaef   :  { %5800 = vmatmul.mubr.msk.bf16.vlgmr.msra.gmra.mrb[44].mxu1 %vm575_vm4, %v1624_v21  ;;  %v1622_v23 = vmul.f32 %v6323_v33, %v6315_v8 }
 0xaf0   :  { %5816 = vmatpush3.bf16.msra.mxu1 %v6218_v12  ;;  %5819 = vmatprep.mubr.msk.bf16.mxu1 %vm189_vm0, %v6946_v60 }
 0xaf1   :  { %5817 = vmatprep.subr.bf16.mxu1 %v6219_v31 }
 0xaf2   :  { %v6325_v22 = vpop.eup %6324 }
 0xaf3   :  { %v1623_v26 = vmul.f32 %v6325_v22, %v6317_v10 }
 0xaf4   :  { %5818 = vmatpush3.bf16.msra.mxu1 %v6219_v31 }
 0xaf5   :  { %v1625_v28 = vpack.c.bf16 %v1623_v26, %v1622_v23  ;;  %5823 = vmatprep.subr.bf16.mxu1 %v6220_v34 }
 0xaf7   :  { %5806 = vmatmul.mubr.msk.bf16.vlgmr.msra.gmra.mrb[36].mxu0 %vm575_vm4, %v1625_v28  ;;  %5820 = vmatmul.mubr.msk.bf16.vlgmr.msra.gmra.mrb[48].mxu1 %vm189_vm0, %v6952_v0 }
 0xaf8   :  { %5824 = vmatpush3.bf16.msra.mxu1 %v6220_v34  ;;  %5827 = vmatprep.mubr.msk.bf16.mxu1 %vm189_vm0, %v6946_v60 }
 0xaf9   :  { %5825 = vmatprep.subr.bf16.mxu1 %v6221_v29  ;;  %5810 = vmatpush3.bf16.msra.mxu0 %v1725_v25 }
 0xafa   :  { %5831 = vmatprep.subr.bf16.mxu0 %v6222_v27 }
 0xafc   :  { %5826 = vmatpush3.bf16.msra.mxu1 %v6221_v29 }
 0xafd   :  { %5839 = vmatprep.subr.bf16.mxu1 %v6712_v2 }
 0xaff   :  { %5828 = vmatmul.mubr.msk.bf16.vlgmr.msra.gmra.mrb[52].mxu1 %vm189_vm0, %v6952_v0 }
 0xb00   :  { %5841 = vmatprep.mubr.msk.bf16.mxu1 %vm6713_vm1, %v6712_v2 }
 0xbc2   :  { %v1663_v30 = vpop.f32.mrb[44].mxu1 }
 0xbc3   :  { %v5801_v32 = vpop.f32.mrb[45].mxu1 }
 0xbc4   :  { %v1666_v36 = vpop.f32.mrb[46].mxu1 }
 0xbc5   :  { %v1714_v37 = vpack.c.bf16 %v1666_v36, %v1663_v30  ;;  %v5802_v38 = vpop.f32.mrb[47].mxu1 }
 0xbc7   :  { %5811 = vmatprep.mubr.msk.bf16.mxu0 %vm472_vm2, %v1714_v37 }
 0xbca   :  { %v1707_v39 = vpop.f32.mrb[36].mxu0  ;;  %v5821_v40 = vpop.f32.mrb[48].mxu1 }
 0xbcb   :  { %v5807_v41 = vpop.f32.mrb[37].mxu0  ;;  %v1831_v42 = vpop.f32.mrb[49].mxu1 }
 0xbcc   :  { %v1710_v43 = vpop.f32.mrb[38].mxu0  ;;  %v5822_v44 = vpop.f32.mrb[50].mxu1 }
 0xbcd   :  { %v1715_v45 = vpack.c.bf16 %v1710_v43, %v1707_v39  ;;  %v5808_v46 = vpop.f32.mrb[39].mxu0  ;;  %v1979_v47 = vpack.c.bf16 %v5822_v44, %v5821_v40  ;;  %v1834_v48 = vpop.f32.mrb[51].mxu1 }
 0xbce   :  { %v1978_v50 = vpack.c.bf16 %v1834_v48, %v1831_v42 }
 0xbcf   :  { %5812 = vmatmul.mubr.msk.bf16.vlgmr.msra.gmra.mrb[24].mxu0 %vm472_vm2, %v1715_v45 }
 0xbd0   :  { %5832 = vmatpush3.bf16.msra.mxu0 %v6222_v27  ;;  %5835 = vmatprep.mubr.msk.bf16.mxu0 %vm189_vm0, %v6946_v60 }
 0xbd1   :  { %5833 = vmatprep.subr.bf16.mxu0 %v6223_v49 }
 0xbd2   :  { %v5829_v51 = vpop.f32.mrb[52].mxu1 }
 0xbd3   :  { %v1897_v52 = vpop.f32.mrb[53].mxu1 }
 0xbd4   :  { %5834 = vmatpush3.bf16.msra.mxu0 %v6223_v49  ;;  %v5830_v53 = vpop.f32.mrb[54].mxu1 }
 0xbd5   :  { %v1981_v54 = vpack.c.bf16 %v5830_v53, %v5829_v51  ;;  %v1900_v55 = vpop.f32.mrb[55].mxu1  ;;  %5845 = vmatprep.subr.bf16.mxu0 %v6712_v2 }
 0xbd6   :  { %v1980_v56 = vpack.c.bf16 %v1900_v55, %v1897_v52  ;;  %v2223_v55 = vld [vmem:[#allocation11 + $0xc] sm:$0xf] }
 0xbd7   :  { %5836 = vmatmul.mubr.msk.bf16.vlgmr.msra.gmra.mrb[40].mxu0 %vm189_vm0, %v6952_v0  ;;  %v2035_v60 = vsel %vm472_vm2, %v1981_v54, 0 }
 0xbd8   :  { %v1988_v57 = vsel %vm472_vm2, %v1980_v56, 0  ;;  %5847 = vmatprep.mubr.msk.bf16.mxu0 %vm6713_vm1, %v6712_v2  ;;  %v2231_v56 = vsel %vm1163_vm5, %v2223_v55, 0 }
 0xbd9   :  { %5840 = vmatpush3.bf16.xpose.msra.mxu1 %v1988_v57 }
 0xbda   :  { %5851 = vmatprep.subr.bf16.mxu1 %v6712_v2 }
 0xbdd   :  { %5846 = vmatpush3.bf16.xpose.msra.mxu0 %v2035_v60 }
 0xbde   :  { %5857 = vmatprep.subr.bf16.mxu0 %v6712_v2 }
 0xbe0   :  { %5842 = vmatmul.mubr.msk.bf16.vlgmr.msra.gmra.mrb[56].mxu1 %vm472_vm2, %v1978_v50 }
 0xbe1   :  { %5853 = vmatprep.mubr.msk.bf16.mxu1 %vm6713_vm1, %v6712_v2 }
 0xbe4   :  { %5848 = vmatmul.mubr.msk.bf16.vlgmr.msra.gmra.mrb[44].mxu0 %vm472_vm2, %v1979_v47 }
 0xbe5   :  { %5859 = vmatprep.mubr.msk.bf16.mxu0 %vm6713_vm1, %v6712_v2 }
 0xcaa   :  { %v5837_v0 = vpop.f32.mrb[40].mxu0 }
 0xcab   :  { %v1963_v58 = vpop.f32.mrb[41].mxu0 }
 0xcac   :  { %v5838_v59 = vpop.f32.mrb[42].mxu0 }
 0xcad   :  { %v1983_v61 = vpack.c.bf16 %v5838_v59, %v5837_v0  ;;  %v1966_v62 = vpop.f32.mrb[43].mxu0 }
 0xcae   :  { %v1982_v63 = vpack.c.bf16 %v1966_v62, %v1963_v58 }
 0xcaf   :  { %5858 = vmatpush3.bf16.msra.mxu0 %v1983_v61 }
 0xcb0   :  { %5852 = vmatpush3.bf16.msra.mxu1 %v1982_v63  ;;  %6176 = vmatprep.subr.msk.bf16.mxu0 %vm1163_vm5, %v2223_v55 }
 0xcb3   :  { %v2024_v1 = vpop.f32.mrb[56].mxu1 }
 0xcb4   :  { %v2078_v3 = vmul.f32 0.35355338, %v2024_v1  ;;  %v5843_v4 = vpop.f32.mrb[57].mxu1 }
 0xcb5   :  { %v2027_v5 = vpop.f32.mrb[58].mxu1 }
 0xcb6   :  { %v2079_v6 = vmul.f32 0.35355338, %v2027_v5  ;;  %v5844_v7 = vpop.f32.mrb[59].mxu1  ;;  %v2086_v8 = vsel %vm575_vm4, %v2078_v3, -inf }
 0xcb7   :  { %v2071_v9 = vpop.f32.mrb[44].mxu0  ;;  %2087 = vmax.xlane.f32.xlu0 %v2086_v8 }
 0xcb8   :  { %v2080_v10 = vmul.f32 0.35355338, %v2071_v9  ;;  %v5849_v11 = vpop.f32.mrb[45].mxu0  ;;  %v2083_v12 = vadd.f32 %v2079_v6, %v6978_v35  ;;  %v6462_v6 = vld [vmem:[#allocation2] sm:$0xff] }
 0xcb9   :  { %v2074_v13 = vpop.f32.mrb[46].mxu0 }
 0xcba   :  { %v2081_v14 = vmul.f32 0.35355338, %v2074_v13  ;;  %v5850_v15 = vpop.f32.mrb[47].mxu0  ;;  %v2092_v16 = vsel %vm575_vm4, %v2080_v10, -inf  ;;  %v2089_v17 = vsel %vm575_vm4, %v2083_v12, -inf }
 0xcbb   :  { %2093 = vmax.xlane.f32.xlu0 %v2092_v16  ;;  %2090 = vmax.xlane.f32.xlu1 %v2089_v17  ;;  %v6465_v15 = vld [vmem:[#allocation5 + $0x8] sm:$0xff] }
 0xcbc   :  { %v2085_v18 = vadd.f32 %v2081_v14, %v6978_v35 }
 0xcbe   :  { %v2095_v19 = vsel %vm575_vm4, %v2085_v18, -inf }
 0xcbf   :  { %2096 = vmax.xlane.f32.xlu1 %v2095_v19 }
 0xd44   :  { %v2088_v20 = vpop.xlane.xlu0 %2087 }
 0xd45   :  { %v2098_v21 = vsub.f32 %v2078_v3, %v2088_v20 }
 0xd47   :  { %v2102_v31 = vmul.f32 1.442695, %v2098_v21 }
 0xd48   :  { %v2094_v33 = vpop.xlane.xlu0 %2093  ;;  %v2091_v34 = vpop.xlane.xlu1 %2090 }
 0xd49   :  { %6326 = vpow2.f32 %v2102_v31  ;;  %v2100_v22 = vsub.f32 %v2080_v10, %v2094_v33  ;;  %v2099_v23 = vsub.f32 %v2083_v12, %v2091_v34  ;;  %v6463_v10 = vld [vmem:[#allocation2 + $0x8] sm:$0xff]  ;;  %v6464_v12 = vld [vmem:[#allocation5] sm:$0xff] }
 0xd4b   :  { %v2106_v26 = vmul.f32 1.442695, %v2100_v22  ;;  %v2104_v28 = vmul.f32 1.442695, %v2099_v23 }
 0xd4c   :  { %v2097_v29 = vpop.xlane.xlu1 %2096 }
 0xd4d   :  { %6328 = vpow2.f32 %v2106_v26  ;;  %v2101_v24 = vsub.f32 %v2085_v18, %v2097_v29 }
 0xd4e   :  { %6330 = vpow2.f32 %v2104_v28 }
 0xd4f   :  { %v2108_v25 = vmul.f32 1.442695, %v2101_v24 }
 0xd51   :  { %6332 = vpow2.f32 %v2108_v25 }
 0xd53   :  { %v6327_v27 = vpop.eup %6326 }
 0xd54   :  { %v2110_v30 = vsel %vm575_vm4, %v6327_v27, 0.0 }
 0xd55   :  { %2111 = vadd.xlane.f32.xlu0 %v2110_v30 }
 0xd57   :  { %v6329_v32 = vpop.eup %6328 }
 0xd58   :  { %v6331_v36 = vpop.eup %6330  ;;  %v2116_v37 = vsel %vm575_vm4, %v6329_v32, 0.0 }
 0xd59   :  { %2117 = vadd.xlane.f32.xlu0 %v2116_v37  ;;  %v2113_v38 = vsel %vm575_vm4, %v6331_v36, 0.0 }
 0xd5a   :  { %2114 = vadd.xlane.f32.xlu1 %v2113_v38 }
 0xd5b   :  { %v6333_v39 = vpop.eup %6332 }
 0xd5c   :  { %v2119_v40 = vsel %vm575_vm4, %v6333_v39, 0.0 }
 0xd5e   :  { %2120 = vadd.xlane.f32.xlu1 %v2119_v40 }
 0xde2   :  { %v2112_v41 = vpop.xlane.xlu0 %2111 }
 0xde3   :  { %6334 = vrcp.f32 %v2112_v41  ;;  %v6224_v41 = vld [vmem:[#allocation13] sm:$0xff]  }
 0xde4   :  { %5869 = vmatprep.subr.bf16.mxu1 %v6224_v41 }
 0xde6   :  { %v2118_v42 = vpop.xlane.xlu0 %2117 }
 0xde7   :  { %v2115_v43 = vpop.xlane.xlu1 %2114 }
 0xde8   :  { %6336 = vrcp.f32 %v2115_v43 }
 0xde9   :  { %6338 = vrcp.f32 %v2118_v42  ;;  %v6225_v42 = vld [vmem:[#allocation13 + $0x8] sm:$0xff]  }
 0xdeb   :  { %v2121_v44 = vpop.xlane.xlu1 %2120 }
 0xdec   :  { %6340 = vrcp.f32 %v2121_v44 }
 0xded   :  { %v6335_v45 = vpop.eup %6334 }
 0xdee   :  { %v2126_v47 = vmul.f32 %v6335_v45, %v6327_v27 }
 0xdf2   :  { %v6337_v46 = vpop.eup %6336 }
 0xdf3   :  { %v2127_v48 = vmul.f32 %v6337_v46, %v6331_v36  ;;  %v6339_v49 = vpop.eup %6338 }
 0xdf4   :  { %v2128_v52 = vmul.f32 %v6339_v49, %v6329_v32 }
 0xdf5   :  { %v2130_v50 = vpack.c.bf16 %v2127_v48, %v2126_v47 }
 0xdf6   :  { %v6341_v51 = vpop.eup %6340 }
 0xdf7   :  { %v2129_v53 = vmul.f32 %v6341_v51, %v6333_v39  ;;  %5854 = vmatmul.mubr.msk.bf16.vlgmr.msra.gmra.mrb[60].mxu1 %vm575_vm4, %v2130_v50 }
 0xdf8   :  { %5870 = vmatpush3.bf16.msra.mxu1 %v6224_v41 }
 0xdf9   :  { %v2131_v54 = vpack.c.bf16 %v2129_v53, %v2128_v52  ;;  %5871 = vmatprep.subr.bf16.mxu1 %v6225_v42 }
 0xdfb   :  { %5860 = vmatmul.mubr.msk.bf16.vlgmr.msra.gmra.mrb[48].mxu0 %vm575_vm4, %v2131_v54 }
 0xdfc   :  { %5864 = vmatpush3.bf16.msra.mxu0 %v2231_v56  ;;  %5872 = vmatpush3.bf16.msra.mxu1 %v6225_v42  ;;  %v5311_v56 = vld [vmem:[%s7564_s8] ss:$0 sm:$0xff] }
 0xeca   :  { %v2169_v57 = vpop.f32.mrb[60].mxu1 }
 0xecb   :  { %v5855_v60 = vpop.f32.mrb[61].mxu1 }
 0xecc   :  { %v2172_v0 = vpop.f32.mrb[62].mxu1 }
 0xecd   :  { %v2220_v58 = vpack.c.bf16 %v2172_v0, %v2169_v57  ;;  %v5856_v59 = vpop.f32.mrb[63].mxu1 }
 0xece   :  { %v2213_v61 = vpop.f32.mrb[48].mxu0 }
 0xecf   :  { %v5861_v62 = vpop.f32.mrb[49].mxu0  ;;  %5865 = vmatprep.mubr.msk.bf16.mxu0 %vm472_vm2, %v2220_v58 }
 0xed0   :  { %v2216_v63 = vpop.f32.mrb[50].mxu0 }
 0xed1   :  { %v2221_v1 = vpack.c.bf16 %v2216_v63, %v2213_v61  ;;  %v5862_v3 = vpop.f32.mrb[51].mxu0  ;;  %v5312_v61 = vld [vmem:[%s7565_s9] ss:$0 sm:$0xff] }
 0xed3   :  { %5866 = vmatmul.mubr.msk.bf16.vlgmr.msra.gmra.mrb[24].mxu0 %vm472_vm2, %v2221_v1 }
 0xfa6   :  { %v5867_v4 = vpop.f32.mrb[24].mxu0 }
 0xfa7   :  { %v2267_v5 = vpop.f32.mrb[25].mxu0  ;;  %v7148_v11 = vadd.f32 %v6463_v10, %v5867_v4 }
 0xfa8   :  { %v7146_v7 = vadd.f32 %v6462_v6, %v2267_v5  ;;  %v5868_v8 = vpop.f32.mrb[26].mxu0 }
 0xfa9   :  { %v2270_v9 = vpop.f32.mrb[27].mxu0  ;;  %v7154_v16 = vadd.f32 %v6465_v15, %v5868_v8  ;;  %v2298_v18 = vsel %vm189_vm0, %v7148_v11, 0.0  ;;  %v6226_v15 = vld [vmem:[%s7567_s11] sm:$0xff]  }
 0xfaa   :  { %v7150_v13 = vadd.f32 %v6464_v12, %v2270_v9  ;;  %v2292_v14 = vsel %vm189_vm0, %v7146_v7, 0.0  ;;  %5877 = vmatprep.subr.bf16.mxu1 %v6226_v15 }
 0xfab   :  { %2293 = vadd.xlane.f32.xlu0 %v2292_v14  ;;  %v2301_v19 = vsel %vm189_vm0, %v7154_v16, 0.0 }
 0xfac   :  { %v2295_v17 = vsel %vm189_vm0, %v7150_v13, 0.0 }
 0xfad   :  { %2296 = vadd.xlane.f32.xlu1 %v2295_v17  ;;  %v6227_v17 = vld [vmem:[%s7567_s11 + $0x8] sm:$0xff]  }
 0xfaf   :  { %2299 = vadd.xlane.f32.xlu0 %v2298_v18  ;;  %v6228_v18 = vld [vmem:[%s7567_s11 + $0x10] sm:$0xff]  }
 0xfb1   :  { %2302 = vadd.xlane.f32.xlu1 %v2301_v19  ;;  %v6229_v19 = vld [vmem:[%s7567_s11 + $0x18] sm:$0xff]  }
0x1038   :  { %v2294_v20 = vpop.xlane.xlu0 %2293 }
0x1039   :  { %v2304_v21 = vmul.f32 0.03125, %v2294_v20  ;;  %v6230_v20 = vld [vmem:[%s7567_s11 + $0x20] sm:$0xff]  }
0x103a   :  { %v2297_v31 = vpop.xlane.xlu1 %2296 }
0x103b   :  { %v2308_v33 = vsub.f32 %v7146_v7, %v2304_v21  ;;  %v2305_v34 = vmul.f32 0.03125, %v2297_v31  ;;  %v6231_v21 = vld [vmem:[%s7567_s11 + $0x28] sm:$0xff]   ;;  %v6232_v31 = vld [vmem:[%s7567_s11 + $0x30] sm:$0xff]  }
0x103c   :  { %v2300_v22 = vpop.xlane.xlu0 %2299 }
0x103d   :  { %v2309_v23 = vsub.f32 %v7150_v13, %v2305_v34  ;;  %v2306_v26 = vmul.f32 0.03125, %v2300_v22  ;;  %v2312_v28 = vmul.f32 %v2308_v33, %v2308_v33 }
0x103e   :  { %v2303_v29 = vpop.xlane.xlu1 %2302 }
0x103f   :  { %v2310_v24 = vsub.f32 %v7148_v11, %v2306_v26  ;;  %v2307_v25 = vmul.f32 0.03125, %v2303_v29  ;;  %v2316_v27 = vsel %vm189_vm0, %v2312_v28, 0.0  ;;  %v2313_v30 = vmul.f32 %v2309_v23, %v2309_v23 }
0x1040   :  { %2317 = vadd.xlane.f32.xlu0 %v2316_v27 }
0x1041   :  { %v2311_v32 = vsub.f32 %v7154_v16, %v2307_v25  ;;  %v2319_v36 = vsel %vm189_vm0, %v2313_v30, 0.0  ;;  %v2314_v37 = vmul.f32 %v2310_v24, %v2310_v24 }
0x1042   :  { %2320 = vadd.xlane.f32.xlu1 %v2319_v36 }
0x1043   :  { %v2322_v38 = vsel %vm189_vm0, %v2314_v37, 0.0  ;;  %v2315_v39 = vmul.f32 %v2311_v32, %v2311_v32 }
0x1044   :  { %2323 = vadd.xlane.f32.xlu0 %v2322_v38 }
0x1045   :  { %v2325_v40 = vsel %vm189_vm0, %v2315_v39, 0.0 }
0x1046   :  { %2326 = vadd.xlane.f32.xlu1 %v2325_v40 }
0x10cd   :  { %v2318_v43 = vpop.xlane.xlu0 %2317 }
0x10ce   :  { %v2328_v44 = vmul.f32 0.03125, %v2318_v43 }
0x10cf   :  { %v2321_v45 = vpop.xlane.xlu1 %2320 }
0x10d0   :  { %v2332_v46 = vadd.f32 1e-05, %v2328_v44  ;;  %v2329_v47 = vmul.f32 0.03125, %v2321_v45 }
0x10d1   :  { %v2324_v48 = vpop.xlane.xlu0 %2323 }
0x10d2   :  { %6342 = vrsqrt.f32 %v2332_v46  ;;  %v2333_v49 = vadd.f32 1e-05, %v2329_v47  ;;  %v2330_v50 = vmul.f32 0.03125, %v2324_v48 }
0x10d3   :  { %v2327_v51 = vpop.xlane.xlu1 %2326 }
0x10d4   :  { %6344 = vrsqrt.f32 %v2333_v49  ;;  %v2334_v52 = vadd.f32 1e-05, %v2330_v50  ;;  %v2331_v53 = vmul.f32 0.03125, %v2327_v51 }
0x10d6   :  { %6346 = vrsqrt.f32 %v2334_v52  ;;  %v2335_v54 = vadd.f32 1e-05, %v2331_v53 }
0x10d8   :  { %6348 = vrsqrt.f32 %v2335_v54 }
0x10dc   :  { %v6343_v55 = vpop.eup %6342 }
0x10dd   :  { %v2340_v57 = vmul.f32 %v6343_v55, %v2308_v33  ;;  %v6233_v33 = vld [vmem:[%s7567_s11 + $0x38] sm:$0xff]  }
0x10de   :  { %v6345_v60 = vpop.eup %6344 }
0x10df   :  { %v2341_v0 = vmul.f32 %v6345_v60, %v2309_v23  ;;  %v2350_v58 = vmul.f32 %v5311_v56, %v2340_v57 }
0x10e0   :  { %v6347_v59 = vpop.eup %6346 }
0x10e1   :  { %v2342_v62 = vmul.f32 %v6347_v59, %v2310_v24  ;;  %v2351_v63 = vmul.f32 %v5311_v56, %v2341_v0  ;;  %v2360_v5 = vadd.f32 %v5312_v61, %v2350_v58 }
0x10e2   :  { %v6349_v1 = vpop.eup %6348 }
0x10e3   :  { %v2352_v3 = vmul.f32 %v5311_v56, %v2342_v62  ;;  %v2343_v4 = vmul.f32 %v6349_v1, %v2311_v32  ;;  %v2361_v6 = vadd.f32 %v5312_v61, %v2351_v63 }
0x10e5   :  { %v2353_v8 = vmul.f32 %v5311_v56, %v2343_v4  ;;  %v2364_v9 = vpack.c.bf16 %v2361_v6, %v2360_v5  ;;  %v2362_v10 = vadd.f32 %v5312_v61, %v2352_v3 }
0x10e7   :  { %5873 = vmatprep.mubr.msk.bf16.mxu1 %vm189_vm0, %v2364_v9  ;;  %v2363_v12 = vadd.f32 %v5312_v61, %v2353_v8 }
0x10e9   :  { %v2365_v14 = vpack.c.bf16 %v2363_v12, %v2362_v10 }
0x10eb   :  { %5874 = vmatmul.mubr.msk.bf16.vlgmr.msra.gmra.mrb[64].mxu1 %vm189_vm0, %v2365_v14 }
0x10ec   :  { %5878 = vmatpush3.bf16.msra.mxu1 %v6226_v15 }
0x10ed   :  { %5879 = vmatprep.subr.bf16.mxu1 %v6227_v17 }
0x10f0   :  { %5880 = vmatpush3.bf16.msra.mxu1 %v6227_v17 }
0x10f1   :  { %5881 = vmatprep.subr.bf16.mxu1 %v6228_v18 }
0x10f4   :  { %5882 = vmatpush3.bf16.msra.mxu1 %v6228_v18 }
0x10f5   :  { %5883 = vmatprep.subr.bf16.mxu1 %v6229_v19 }
0x10f8   :  { %5884 = vmatpush3.bf16.msra.mxu1 %v6229_v19 }
0x10f9   :  { %5885 = vmatprep.subr.bf16.mxu1 %v6230_v20 }
0x10fc   :  { %5886 = vmatpush3.bf16.msra.mxu1 %v6230_v20 }
0x10fd   :  { %5887 = vmatprep.subr.bf16.mxu1 %v6231_v21 }
0x1100   :  { %5888 = vmatpush3.bf16.msra.mxu1 %v6231_v21 }
0x1101   :  { %5889 = vmatprep.subr.bf16.mxu1 %v6232_v31 }
0x1104   :  { %5890 = vmatpush3.bf16.msra.mxu1 %v6232_v31 }
0x1105   :  { %5891 = vmatprep.subr.bf16.mxu1 %v6233_v33 }
0x1108   :  { %5892 = vmatpush3.bf16.msra.mxu1 %v6233_v33 }
0x1109   :  { %5927 = vmatprep.subr.bf16.mxu1 %v6712_v2 }
0x11be   :  { %v5875_v34 = vpop.f32.mrb[64].mxu1 }
0x11bf   :  { %v2439_v22 = vmul.f32 %v5875_v34, %v5875_v34  ;;  %v2422_v23 = vpop.f32.mrb[65].mxu1 }
0x11c0   :  { %v2437_v26 = vmul.f32 %v2422_v23, %v2422_v23  ;;  %v5876_v28 = vpop.f32.mrb[66].mxu1 }
0x11c1   :  { %v2443_v29 = vmul.f32 %v5875_v34, %v2439_v22  ;;  %v2440_v24 = vmul.f32 %v5876_v28, %v5876_v28  ;;  %v2425_v25 = vpop.f32.mrb[67].mxu1 }
0x11c2   :  { %v2441_v27 = vmul.f32 %v2437_v26, %v2422_v23  ;;  %v2438_v30 = vmul.f32 %v2425_v25, %v2425_v25 }
0x11c3   :  { %v2447_v32 = vmul.f32 0.044715, %v2443_v29  ;;  %v2444_v36 = vmul.f32 %v5876_v28, %v2440_v24 }
0x11c4   :  { %v2445_v37 = vmul.f32 0.044715, %v2441_v27  ;;  %v2442_v38 = vmul.f32 %v2438_v30, %v2425_v25 }
0x11c5   :  { %v2451_v39 = vadd.f32 %v5875_v34, %v2447_v32  ;;  %v2448_v40 = vmul.f32 0.044715, %v2444_v36 }
0x11c6   :  { %v2449_v41 = vadd.f32 %v2445_v37, %v2422_v23  ;;  %v2446_v42 = vmul.f32 0.044715, %v2442_v38  ;;  %v6234_v37 = vld [vmem:[#allocation7 + $0x40] sm:$0xff]   ;;  %v6235_v38 = vld [vmem:[#allocation7 + $0x48] sm:$0xff]  }
0x11c7   :  { %v2455_v43 = vmul.f32 0.7978846, %v2451_v39  ;;  %v2452_v44 = vadd.f32 %v5876_v28, %v2448_v40  ;;  %5897 = vmatprep.subr.bf16.mxu0 %v6234_v37  ;;  %v6236_v39 = vld [vmem:[#allocation8 + $0x40] sm:$0xff]  }
0x11c8   :  { %v2453_v45 = vmul.f32 0.7978846, %v2449_v41  ;;  %v2450_v46 = vadd.f32 %v2446_v42, %v2425_v25  ;;  %5898 = vmatpush3.bf16.msra.mxu0 %v6234_v37 }
0x11c9   :  { %6350 = vtanh.f32 %v2455_v43  ;;  %v2456_v47 = vmul.f32 0.7978846, %v2452_v44  ;;  %5899 = vmatprep.subr.bf16.mxu0 %v6235_v38 }
0x11ca   :  { %6352 = vtanh.f32 %v2453_v45  ;;  %v2454_v48 = vmul.f32 0.7978846, %v2450_v46 }
0x11cb   :  { %6354 = vtanh.f32 %v2456_v47 }
0x11cc   :  { %6356 = vtanh.f32 %v2454_v48  ;;  %5900 = vmatpush3.bf16.msra.mxu0 %v6235_v38 }
0x11cd   :  { %5905 = vmatprep.subr.bf16.mxu0 %v6236_v39 }
0x11d3   :  { %v6351_v49 = vpop.eup %6350 }
0x11d4   :  { %v6353_v50 = vpop.eup %6352  ;;  %v2463_v51 = vadd.f32 1.0, %v6351_v49 }
0x11d5   :  { %v6355_v52 = vpop.eup %6354  ;;  %v2461_v53 = vadd.f32 1.0, %v6353_v50 }
0x11d6   :  { %v6357_v54 = vpop.eup %6356  ;;  %v2467_v55 = vmul.f32 0.5, %v2463_v51  ;;  %v2464_v56 = vadd.f32 1.0, %v6355_v52 }
0x11d7   :  { %v2465_v57 = vmul.f32 0.5, %v2461_v53  ;;  %v2462_v60 = vadd.f32 1.0, %v6357_v54  ;;  %v5327_v53 = vld [vmem:[%s7590_s25 + $0x1] ss:$0 sm:$0xff] }
0x11d8   :  { %v2468_v0 = vmul.f32 0.5, %v2464_v56  ;;  %v2471_v59 = vmul.f32 %v5875_v34, %v2467_v55 }
0x11d9   :  { %v2466_v58 = vmul.f32 0.5, %v2462_v60  ;;  %v2469_v62 = vmul.f32 %v2465_v57, %v2422_v23 }
0x11da   :  { %v2472_v61 = vmul.f32 %v5876_v28, %v2468_v0  ;;  %v5328_v0 = vld [vmem:[%s7559_s3 + $0x1] ss:$0 sm:$0xff] }
0x11db   :  { %v2470_v63 = vmul.f32 %v2466_v58, %v2425_v25 }
0x11dc   :  { %v2474_v1 = vpack.c.bf16 %v2472_v61, %v2471_v59 }
0x11dd   :  { %v2473_v3 = vpack.c.bf16 %v2470_v63, %v2469_v62 }
0x11df   :  { %5893 = vmatprep.mubr.bf16.mxu1 %v2473_v3 }
0x11e0   :  { %5894 = vmatmul.mubr.bf16.vlgmr.msra.gmra.mrb[68].mxu1 %v2474_v1 }
0x11e1   :  { %5929 = vmatprep.mubr.msk.bf16.mxu1 %vm6713_vm1, %v6712_v2 }
0x12b3   :  { %v5895_v4 = vpop.f32.mrb[68].mxu1 }
0x12b4   :  { %v2573_v5 = vpop.f32.mrb[69].mxu1  ;;  %v7209_v10 = vadd.f32 %v5895_v4, %v7148_v11 }
0x12b5   :  { %v7206_v6 = vadd.f32 %v2573_v5, %v7146_v7  ;;  %v5896_v8 = vpop.f32.mrb[70].mxu1 }
0x12b6   :  { %v2576_v9 = vpop.f32.mrb[71].mxu1  ;;  %v7217_v15 = vadd.f32 %v5896_v8, %v7154_v16  ;;  %v2602_v7 = vsel %vm189_vm0, %v7209_v10, 0.0 }
0x12b7   :  { %v7212_v12 = vadd.f32 %v2576_v9, %v7150_v13  ;;  %v2596_v14 = vsel %vm189_vm0, %v7206_v6, 0.0 }
0x12b8   :  { %2597 = vadd.xlane.f32.xlu0 %v2596_v14  ;;  %v2605_v11 = vsel %vm189_vm0, %v7217_v15, 0.0 }
0x12b9   :  { %v2599_v17 = vsel %vm189_vm0, %v7212_v12, 0.0 }
0x12ba   :  { %2600 = vadd.xlane.f32.xlu1 %v2599_v17  ;;  %v6237_v17 = vld [vmem:[#allocation8 + $0x48] sm:$0xff]  }
0x12bc   :  { %2603 = vadd.xlane.f32.xlu0 %v2602_v7  ;;  %v6238_v7 = vld [vmem:[#allocation10 + $0x40] sm:$0xff]  }
0x12be   :  { %2606 = vadd.xlane.f32.xlu1 %v2605_v11  ;;  %v6239_v11 = vld [vmem:[#allocation10 + $0x48] sm:$0xff]  }
0x1345   :  { %v2598_v13 = vpop.xlane.xlu0 %2597 }
0x1346   :  { %v2608_v18 = vmul.f32 0.03125, %v2598_v13 }
0x1347   :  { %v2601_v19 = vpop.xlane.xlu1 %2600 }
0x1348   :  { %v2612_v20 = vsub.f32 %v7206_v6, %v2608_v18  ;;  %v2609_v21 = vmul.f32 0.03125, %v2601_v19 }
0x1349   :  { %v2604_v16 = vpop.xlane.xlu0 %2603 }
0x134a   :  { %v2613_v31 = vsub.f32 %v7212_v12, %v2609_v21  ;;  %v2610_v33 = vmul.f32 0.03125, %v2604_v16  ;;  %v2616_v34 = vmul.f32 %v2612_v20, %v2612_v20 }
0x134b   :  { %v2607_v22 = vpop.xlane.xlu1 %2606 }
0x134c   :  { %v2614_v23 = vsub.f32 %v7209_v10, %v2610_v33  ;;  %v2611_v26 = vmul.f32 0.03125, %v2607_v22  ;;  %v2620_v28 = vsel %vm189_vm0, %v2616_v34, 0.0  ;;  %v2617_v29 = vmul.f32 %v2613_v31, %v2613_v31 }
0x134d   :  { %2621 = vadd.xlane.f32.xlu0 %v2620_v28 }
0x134e   :  { %v2615_v24 = vsub.f32 %v7217_v15, %v2611_v26  ;;  %v2623_v25 = vsel %vm189_vm0, %v2617_v29, 0.0  ;;  %v2618_v27 = vmul.f32 %v2614_v23, %v2614_v23 }
0x134f   :  { %2624 = vadd.xlane.f32.xlu1 %v2623_v25 }
0x1350   :  { %v2626_v30 = vsel %vm189_vm0, %v2618_v27, 0.0  ;;  %v2619_v32 = vmul.f32 %v2615_v24, %v2615_v24 }
0x1351   :  { %2627 = vadd.xlane.f32.xlu0 %v2626_v30 }
0x1352   :  { %v2629_v36 = vsel %vm189_vm0, %v2619_v32, 0.0 }
0x1353   :  { %2630 = vadd.xlane.f32.xlu1 %v2629_v36 }
0x13da   :  { %v2622_v40 = vpop.xlane.xlu0 %2621 }
0x13db   :  { %v2632_v41 = vmul.f32 0.03125, %v2622_v40 }
0x13dc   :  { %v2625_v42 = vpop.xlane.xlu1 %2624 }
0x13dd   :  { %v2636_v43 = vadd.f32 1e-05, %v2632_v41  ;;  %v2633_v44 = vmul.f32 0.03125, %v2625_v42 }
0x13de   :  { %v2628_v45 = vpop.xlane.xlu0 %2627 }
0x13df   :  { %6358 = vrsqrt.f32 %v2636_v43  ;;  %v2637_v46 = vadd.f32 1e-05, %v2633_v44  ;;  %v2634_v47 = vmul.f32 0.03125, %v2628_v45 }
0x13e0   :  { %v2631_v48 = vpop.xlane.xlu1 %2630 }
0x13e1   :  { %6360 = vrsqrt.f32 %v2637_v46  ;;  %v2638_v49 = vadd.f32 1e-05, %v2634_v47  ;;  %v2635_v50 = vmul.f32 0.03125, %v2631_v48 }
0x13e3   :  { %6362 = vrsqrt.f32 %v2638_v49  ;;  %v2639_v51 = vadd.f32 1e-05, %v2635_v50 }
0x13e5   :  { %6364 = vrsqrt.f32 %v2639_v51 }
0x13e9   :  { %v6359_v52 = vpop.eup %6358 }
0x13ea   :  { %v2644_v54 = vmul.f32 %v6359_v52, %v2612_v20 }
0x13eb   :  { %v6361_v55 = vpop.eup %6360 }
0x13ec   :  { %v2654_v56 = vmul.f32 %v5327_v53, %v2644_v54  ;;  %v2645_v57 = vmul.f32 %v6361_v55, %v2613_v31 }
0x13ed   :  { %v6363_v60 = vpop.eup %6362 }
0x13ee   :  { %v2655_v58 = vmul.f32 %v5327_v53, %v2645_v57  ;;  %v2646_v59 = vmul.f32 %v6363_v60, %v2614_v23  ;;  %v2664_v62 = vadd.f32 %v5328_v0, %v2654_v56 }
0x13ef   :  { %v6365_v61 = vpop.eup %6364 }
0x13f0   :  { %v2665_v63 = vadd.f32 %v5328_v0, %v2655_v58  ;;  %v2656_v1 = vmul.f32 %v5327_v53, %v2646_v59  ;;  %v2647_v3 = vmul.f32 %v6365_v61, %v2615_v24 }
0x13f2   :  { %v7239_v4 = vpack.c.bf16 %v2665_v63, %v2664_v62  ;;  %v2657_v5 = vmul.f32 %v5327_v53, %v2647_v3  ;;  %v2666_v8 = vadd.f32 %v5328_v0, %v2656_v1 }
0x13f4   :  { %v2667_v9 = vadd.f32 %v5328_v0, %v2657_v5  ;;  %5901 = vmatprep.mubr.msk.bf16.mxu0 %vm189_vm0, %v7239_v4 }
0x13f6   :  { %v7243_v14 = vpack.c.bf16 %v2667_v9, %v2666_v8 }
0x13f8   :  { %5902 = vmatmul.mubr.msk.bf16.vlgmr.msra.gmra.mrb[52].mxu0 %vm189_vm0, %v7243_v14 }
0x13f9   :  { %5906 = vmatpush3.bf16.msra.mxu0 %v6236_v39  ;;  %5909 = vmatprep.mubr.msk.bf16.mxu0 %vm189_vm0, %v7239_v4 }
0x13fa   :  { %5907 = vmatprep.subr.bf16.mxu0 %v6237_v17 }
0x13fd   :  { %5908 = vmatpush3.bf16.msra.mxu0 %v6237_v17 }
0x13fe   :  { %5913 = vmatprep.subr.bf16.mxu0 %v6238_v7 }
0x1400   :  { %5910 = vmatmul.mubr.msk.bf16.vlgmr.msra.gmra.mrb[56].mxu0 %vm189_vm0, %v7243_v14 }
0x1401   :  { %5914 = vmatpush3.bf16.msra.mxu0 %v6238_v7  ;;  %5917 = vmatprep.mubr.msk.bf16.mxu0 %vm189_vm0, %v7239_v4 }
0x1402   :  { %5915 = vmatprep.subr.bf16.mxu0 %v6239_v11 }
0x1405   :  { %5916 = vmatpush3.bf16.msra.mxu0 %v6239_v11 }
0x1406   :  { %5921 = vmatprep.subr.bf16.mxu0 %v6712_v2 }
0x1408   :  { %5918 = vmatmul.mubr.msk.bf16.vlgmr.msra.gmra.mrb[60].mxu0 %vm189_vm0, %v7243_v14 }
0x1409   :  { %5923 = vmatprep.mubr.msk.bf16.mxu0 %vm6713_vm1, %v6712_v2 }
0x14cb   :  { %v5903_v13 = vpop.f32.mrb[52].mxu0 }
0x14cc   :  { %v2727_v18 = vpop.f32.mrb[53].mxu0 }
0x14cd   :  { %v5904_v19 = vpop.f32.mrb[54].mxu0 }
0x14ce   :  { %v2875_v20 = vpack.c.bf16 %v5904_v19, %v5903_v13  ;;  %v2730_v21 = vpop.f32.mrb[55].mxu0  ;;  %v6240_v19 = vld [vmem:[#allocation8 + $0x50] sm:$0xff]  }
0x14cf   :  { %v2874_v16 = vpack.c.bf16 %v2730_v21, %v2727_v18 }
0x14d3   :  { %v5911_v31 = vpop.f32.mrb[56].mxu0 }
0x14d4   :  { %v2793_v33 = vpop.f32.mrb[57].mxu0 }
0x14d5   :  { %v5912_v34 = vpop.f32.mrb[58].mxu0 }
0x14d6   :  { %v2877_v22 = vpack.c.bf16 %v5912_v34, %v5911_v31  ;;  %v2796_v23 = vpop.f32.mrb[59].mxu0 }
0x14d7   :  { %v2876_v26 = vpack.c.bf16 %v2796_v23, %v2793_v33 }
0x14d8   :  { %v2931_v28 = vsel %vm472_vm2, %v2877_v22, 0 }
0x14d9   :  { %v2884_v29 = vsel %vm472_vm2, %v2876_v26, 0  ;;  %5928 = vmatpush3.bf16.xpose.msra.mxu1 %v2931_v28 }
0x14da   :  { %5922 = vmatpush3.bf16.xpose.msra.mxu0 %v2884_v29  ;;  %5939 = vmatprep.subr.bf16.mxu1 %v6712_v2 }
0x14db   :  { %v5919_v24 = vpop.f32.mrb[60].mxu0  ;;  %5933 = vmatprep.subr.bf16.mxu0 %v6712_v2 }
0x14dc   :  { %v2859_v25 = vpop.f32.mrb[61].mxu0 }
0x14dd   :  { %v5920_v27 = vpop.f32.mrb[62].mxu0 }
0x14de   :  { %v2879_v30 = vpack.c.bf16 %v5920_v27, %v5919_v24  ;;  %v2862_v32 = vpop.f32.mrb[63].mxu0  ;;  %v6242_v24 = vld [vmem:[#allocation8 + $0x58] sm:$0xff]  }
0x14df   :  { %v2878_v36 = vpack.c.bf16 %v2862_v32, %v2859_v25 }
0x14e0   :  { %5930 = vmatmul.mubr.msk.bf16.vlgmr.msra.gmra.mrb[72].mxu1 %vm472_vm2, %v2875_v20  ;;  %v6241_v20 = vld [vmem:[#allocation7 + $0x50] sm:$0xff]  }
0x14e1   :  { %5924 = vmatmul.mubr.msk.bf16.vlgmr.msra.gmra.mrb[64].mxu0 %vm472_vm2, %v2874_v16  ;;  %5940 = vmatpush3.bf16.msra.mxu1 %v2879_v30 }
0x14e2   :  { %5934 = vmatpush3.bf16.msra.mxu0 %v2878_v36  ;;  %5941 = vmatprep.mubr.msk.bf16.mxu1 %vm6713_vm1, %v6712_v2  ;;  %v6243_v36 = vld [vmem:[#allocation7 + $0x58] sm:$0xff]  }
0x14e3   :  { %5935 = vmatprep.mubr.msk.bf16.mxu0 %vm6713_vm1, %v6712_v2  ;;  %5953 = vmatprep.subr.bf16.mxu1 %v6240_v19 }
0x14e4   :  { %5945 = vmatprep.subr.bf16.mxu0 %v6241_v20 }
0x15b3   :  { %v2967_v37 = vpop.f32.mrb[72].mxu1 }
0x15b4   :  { %v2976_v38 = vmul.f32 0.35355338, %v2967_v37  ;;  %v2920_v39 = vpop.f32.mrb[64].mxu0  ;;  %v5931_v40 = vpop.f32.mrb[73].mxu1  ;;  %v6244_v37 = vld [vmem:[#allocation10 + $0x50] sm:$0xff]  }
0x15b5   :  { %v2974_v41 = vmul.f32 0.35355338, %v2920_v39  ;;  %v5925_v42 = vpop.f32.mrb[65].mxu0  ;;  %v2970_v43 = vpop.f32.mrb[74].mxu1 }
0x15b6   :  { %v2977_v44 = vmul.f32 0.35355338, %v2970_v43  ;;  %v2923_v45 = vpop.f32.mrb[66].mxu0  ;;  %v5932_v46 = vpop.f32.mrb[75].mxu1  ;;  %v2988_v47 = vsel %vm575_vm4, %v2976_v38, -inf }
0x15b7   :  { %v2975_v48 = vmul.f32 0.35355338, %v2923_v45  ;;  %2989 = vmax.xlane.f32.xlu0 %v2988_v47  ;;  %v5926_v49 = vpop.f32.mrb[67].mxu0  ;;  %v2982_v52 = vsel %vm575_vm4, %v2974_v41, -inf }
0x15b8   :  { %v2981_v50 = vadd.f32 %v2977_v44, %v6978_v35 }
0x15b9   :  { %v2979_v53 = vadd.f32 %v2975_v48, %v6978_v35 }
0x15ba   :  { %v2991_v51 = vsel %vm575_vm4, %v2981_v50, -inf }
0x15bb   :  { %2992 = vmax.xlane.f32.xlu1 %v2991_v51  ;;  %2983 = vmax.xlane.f32.xlu0 %v2982_v52  ;;  %v2985_v54 = vsel %vm575_vm4, %v2979_v53, -inf }
0x15bf   :  { %2986 = vmax.xlane.f32.xlu1 %v2985_v54 }
0x1644   :  { %v2990_v55 = vpop.xlane.xlu0 %2989 }
0x1645   :  { %v2996_v56 = vsub.f32 %v2976_v38, %v2990_v55  ;;  %v6245_v38 = vld [vmem:[#allocation10 + $0x58] sm:$0xff]  }
0x1647   :  { %v3002_v57 = vmul.f32 1.442695, %v2996_v56 }
0x1648   :  { %v2993_v60 = vpop.xlane.xlu1 %2992  ;;  %v2984_v0 = vpop.xlane.xlu0 %2983 }
0x1649   :  { %6366 = vpow2.f32 %v3002_v57  ;;  %v2997_v58 = vsub.f32 %v2981_v50, %v2993_v60  ;;  %v2994_v59 = vsub.f32 %v2974_v41, %v2984_v0 }
0x164b   :  { %v3004_v61 = vmul.f32 1.442695, %v2997_v58  ;;  %v2998_v62 = vmul.f32 1.442695, %v2994_v59 }
0x164c   :  { %v2987_v63 = vpop.xlane.xlu1 %2986 }
0x164d   :  { %6368 = vpow2.f32 %v3004_v61  ;;  %v2995_v1 = vsub.f32 %v2979_v53, %v2987_v63 }
0x164e   :  { %6370 = vpow2.f32 %v2998_v62 }
0x164f   :  { %v3000_v3 = vmul.f32 1.442695, %v2995_v1 }
0x1651   :  { %6372 = vpow2.f32 %v3000_v3 }
0x1653   :  { %v6367_v5 = vpop.eup %6366 }
0x1654   :  { %v3012_v8 = vsel %vm575_vm4, %v6367_v5, 0.0 }
0x1655   :  { %3013 = vadd.xlane.f32.xlu0 %v3012_v8 }
0x1657   :  { %v6369_v9 = vpop.eup %6368 }
0x1658   :  { %v6371_v17 = vpop.eup %6370  ;;  %v3015_v7 = vsel %vm575_vm4, %v6369_v9, 0.0 }
0x1659   :  { %v3006_v11 = vsel %vm575_vm4, %v6371_v17, 0.0  ;;  %3016 = vadd.xlane.f32.xlu1 %v3015_v7 }
0x165a   :  { %3007 = vadd.xlane.f32.xlu0 %v3006_v11 }
0x165b   :  { %v6373_v13 = vpop.eup %6372 }
0x165c   :  { %v3009_v18 = vsel %vm575_vm4, %v6373_v13, 0.0 }
0x165d   :  { %3010 = vadd.xlane.f32.xlu1 %v3009_v18 }
0x16e2   :  { %v3014_v21 = vpop.xlane.xlu0 %3013 }
0x16e3   :  { %6374 = vrcp.f32 %v3014_v21 }
0x16e6   :  { %v3017_v16 = vpop.xlane.xlu1 %3016 }
0x16e7   :  { %v3008_v31 = vpop.xlane.xlu0 %3007  ;;  %6376 = vrcp.f32 %v3017_v16 }
0x16e8   :  { %6378 = vrcp.f32 %v3008_v31 }
0x16ea   :  { %v3011_v33 = vpop.xlane.xlu1 %3010 }
0x16eb   :  { %6380 = vrcp.f32 %v3011_v33 }
0x16ed   :  { %v6375_v34 = vpop.eup %6374 }
0x16ee   :  { %v3024_v23 = vmul.f32 %v6375_v34, %v6367_v5 }
0x16f1   :  { %v6377_v22 = vpop.eup %6376 }
0x16f2   :  { %v3025_v26 = vmul.f32 %v6377_v22, %v6369_v9  ;;  %v6379_v28 = vpop.eup %6378 }
0x16f3   :  { %v3022_v27 = vmul.f32 %v6379_v28, %v6371_v17 }
0x16f4   :  { %v3027_v29 = vpack.c.bf16 %v3025_v26, %v3024_v23 }
0x16f5   :  { %v6381_v25 = vpop.eup %6380 }
0x16f6   :  { %v3023_v30 = vmul.f32 %v6381_v25, %v6373_v13  ;;  %5942 = vmatmul.mubr.msk.bf16.vlgmr.msra.gmra.mrb[76].mxu1 %vm575_vm4, %v3027_v29 }
0x16f7   :  { %5954 = vmatpush3.bf16.msra.mxu1 %v6240_v19  ;;  %5957 = vmatprep.mubr.msk.bf16.mxu1 %vm189_vm0, %v7239_v4 }
0x16f8   :  { %v3026_v32 = vpack.c.bf16 %v3023_v30, %v3022_v27  ;;  %5955 = vmatprep.subr.bf16.mxu1 %v6242_v24 }
0x16fa   :  { %5936 = vmatmul.mubr.msk.bf16.vlgmr.msra.gmra.mrb[68].mxu0 %vm575_vm4, %v3026_v32 }
0x16fb   :  { %5946 = vmatpush3.bf16.msra.mxu0 %v6241_v20  ;;  %5949 = vmatprep.mubr.msk.bf16.mxu0 %vm189_vm0, %v7239_v4 }
0x16fc   :  { %5956 = vmatpush3.bf16.msra.mxu1 %v6242_v24  ;;  %5947 = vmatprep.subr.bf16.mxu0 %v6243_v36 }
0x16fd   :  { %5969 = vmatprep.subr.bf16.mxu1 %v6712_v2 }
0x16ff   :  { %5958 = vmatmul.mubr.msk.bf16.vlgmr.msra.gmra.mrb[80].mxu1 %vm189_vm0, %v7243_v14  ;;  %5948 = vmatpush3.bf16.msra.mxu0 %v6243_v36 }
0x1700   :  { %5961 = vmatprep.subr.bf16.mxu0 %v6244_v37  ;;  %5971 = vmatprep.mubr.msk.bf16.mxu1 %vm6713_vm1, %v6712_v2 }
0x1702   :  { %5950 = vmatmul.mubr.msk.bf16.vlgmr.msra.gmra.mrb[72].mxu0 %vm189_vm0, %v7243_v14 }
0x1703   :  { %5962 = vmatpush3.bf16.msra.mxu0 %v6244_v37  ;;  %5965 = vmatprep.mubr.msk.bf16.mxu0 %vm189_vm0, %v7239_v4 }
0x1704   :  { %5963 = vmatprep.subr.bf16.mxu0 %v6245_v38 }
0x1707   :  { %5964 = vmatpush3.bf16.msra.mxu0 %v6245_v38 }
0x1708   :  { %5975 = vmatprep.subr.bf16.mxu0 %v6712_v2 }
0x170a   :  { %5966 = vmatmul.mubr.msk.bf16.vlgmr.msra.gmra.mrb[76].mxu0 %vm189_vm0, %v7243_v14 }
0x170b   :  { %5977 = vmatprep.mubr.msk.bf16.mxu0 %vm6713_vm1, %v6712_v2 }
0x17c9   :  { %v7298_v39 = vpop.f32.mrb[76].mxu1 }
0x17ca   :  { %v5943_v40 = vpop.f32.mrb[77].mxu1 }
0x17cb   :  { %v7300_v41 = vpop.f32.mrb[78].mxu1 }
0x17cc   :  { %v3117_v42 = vpack.c.bf16 %v7300_v41, %v7298_v39  ;;  %v5944_v43 = vpop.f32.mrb[79].mxu1 }
0x17cd   :  { %v7304_v44 = vpop.f32.mrb[68].mxu0 }
0x17ce   :  { %v5937_v45 = vpop.f32.mrb[69].mxu0 }
0x17cf   :  { %v7306_v46 = vpop.f32.mrb[70].mxu0 }
0x17d0   :  { %v3116_v47 = vpack.c.bf16 %v7306_v46, %v7304_v44  ;;  %v5938_v48 = vpop.f32.mrb[71].mxu0 }
0x17d2   :  { %v5959_v49 = vpop.f32.mrb[80].mxu1 }
0x17d3   :  { %v3237_v50 = vpop.f32.mrb[81].mxu1 }
0x17d4   :  { %v5960_v51 = vpop.f32.mrb[82].mxu1 }
0x17d5   :  { %v3321_v52 = vpack.c.bf16 %v5960_v51, %v5959_v49  ;;  %v3240_v53 = vpop.f32.mrb[83].mxu1  ;;  %v5951_v54 = vpop.f32.mrb[72].mxu0 }
0x17d6   :  { %v3320_v55 = vpack.c.bf16 %v3240_v53, %v3237_v50  ;;  %v3171_v56 = vpop.f32.mrb[73].mxu0 }
0x17d7   :  { %v3375_v57 = vsel %vm472_vm2, %v3321_v52, 0  ;;  %v5952_v60 = vpop.f32.mrb[74].mxu0 }
0x17d8   :  { %v3328_v0 = vsel %vm472_vm2, %v3320_v55, 0  ;;  %v3319_v58 = vpack.c.bf16 %v5952_v60, %v5951_v54  ;;  %5976 = vmatpush3.bf16.xpose.msra.mxu0 %v3375_v57  ;;  %v3174_v59 = vpop.f32.mrb[75].mxu0  ;;  %v6246_v57 = vld [vmem:[#allocation7 + $0x60] sm:$0xff]  }
0x17d9   :  { %v3318_v61 = vpack.c.bf16 %v3174_v59, %v3171_v56  ;;  %5970 = vmatpush3.bf16.xpose.msra.mxu1 %v3328_v0  ;;  %5987 = vmatprep.subr.bf16.mxu0 %v6712_v2 }
0x17da   :  { %5981 = vmatprep.subr.bf16.mxu1 %v6712_v2 }
0x17dd   :  { %v5967_v62 = vpop.f32.mrb[76].mxu0 }
0x17de   :  { %v3303_v63 = vpop.f32.mrb[77].mxu0 }
0x17df   :  { %5978 = vmatmul.mubr.msk.bf16.vlgmr.msra.gmra.mrb[80].mxu0 %vm472_vm2, %v3319_v58  ;;  %v5968_v1 = vpop.f32.mrb[78].mxu0 }
0x17e0   :  { %v3323_v3 = vpack.c.bf16 %v5968_v1, %v5967_v62  ;;  %5972 = vmatmul.mubr.msk.bf16.vlgmr.msra.gmra.mrb[84].mxu1 %vm472_vm2, %v3318_v61  ;;  %v3306_v5 = vpop.f32.mrb[79].mxu0  ;;  %5989 = vmatprep.mubr.msk.bf16.mxu0 %vm6713_vm1, %v6712_v2 }
0x17e1   :  { %v3322_v8 = vpack.c.bf16 %v3306_v5, %v3303_v63  ;;  %5983 = vmatprep.mubr.msk.bf16.mxu1 %vm6713_vm1, %v6712_v2 }
0x17e2   :  { %5988 = vmatpush3.bf16.msra.mxu0 %v3323_v3 }
0x17e3   :  { %5982 = vmatpush3.bf16.msra.mxu1 %v3322_v8  ;;  %6005 = vmatprep.subr.bf16.mxu0 %v6246_v57 }
0x18b2   :  { %v3411_v9 = vpop.f32.mrb[80].mxu0 }
0x18b3   :  { %v3364_v17 = vpop.f32.mrb[84].mxu1  ;;  %v5979_v7 = vpop.f32.mrb[81].mxu0  ;;  %v3420_v19 = vmul.f32 0.35355338, %v3411_v9 }
0x18b4   :  { %v3418_v11 = vmul.f32 0.35355338, %v3364_v17  ;;  %v5973_v13 = vpop.f32.mrb[85].mxu1  ;;  %v3414_v18 = vpop.f32.mrb[82].mxu0 }
0x18b5   :  { %v3367_v20 = vpop.f32.mrb[86].mxu1  ;;  %v5980_v21 = vpop.f32.mrb[83].mxu0  ;;  %v3421_v16 = vmul.f32 0.35355338, %v3414_v18  ;;  %v3432_v26 = vsel %vm575_vm4, %v3420_v19, -inf  ;;  %v6248_v13 = vld [vmem:[#allocation8 + $0x60] sm:$0xff]  }
0x18b6   :  { %v3419_v31 = vmul.f32 0.35355338, %v3367_v20  ;;  %v5974_v33 = vpop.f32.mrb[87].mxu1  ;;  %v3426_v34 = vsel %vm575_vm4, %v3418_v11, -inf  ;;  %v6249_v18 = vld [vmem:[#allocation8 + $0x68] sm:$0xff]  }
0x18b7   :  { %3427 = vmax.xlane.f32.xlu0 %v3426_v34  ;;  %v3425_v28 = vadd.f32 %v3421_v16, %v6978_v35  ;;  %v3119_v21 = vld [vmem:[#allocation11 + $0x10] sm:$0xf] }
0x18b8   :  { %v3423_v22 = vadd.f32 %v3419_v31, %v6978_v35 }
0x18b9   :  { %v3435_v29 = vsel %vm575_vm4, %v3425_v28, -inf }
0x18ba   :  { %v3429_v23 = vsel %vm575_vm4, %v3423_v22, -inf }
0x18bb   :  { %3430 = vmax.xlane.f32.xlu1 %v3429_v23  ;;  %3433 = vmax.xlane.f32.xlu0 %v3432_v26 }
0x18bf   :  { %3436 = vmax.xlane.f32.xlu1 %v3435_v29 }
0x1944   :  { %v3428_v24 = vpop.xlane.xlu0 %3427 }
0x1945   :  { %v3438_v25 = vsub.f32 %v3418_v11, %v3428_v24  ;;  %v6247_v11 = vld [vmem:[#allocation7 + $0x68] sm:$0xff]  }
0x1947   :  { %v3442_v27 = vmul.f32 1.442695, %v3438_v25  ;;  %v3629_v25 = vsel %vm1163_vm5, %v3119_v21, 0 }
0x1948   :  { %v3431_v30 = vpop.xlane.xlu1 %3430  ;;  %v3434_v32 = vpop.xlane.xlu0 %3433 }
0x1949   :  { %6382 = vpow2.f32 %v3442_v27  ;;  %v3439_v36 = vsub.f32 %v3423_v22, %v3431_v30  ;;  %v3440_v37 = vsub.f32 %v3420_v19, %v3434_v32  ;;  %v3563_v19 = vld [vmem:[#allocation11 + $0x14] sm:$0xf]  ;;  %v6250_v27 = vld [vmem:[#allocation10 + $0x60] sm:$0xff]  }
0x194a   :  { %6177 = vmatprep.subr.msk.bf16.mxu1 %vm1163_vm5, %v3563_v19  ;;  %v3571_v20 = vsel %vm1163_vm5, %v3563_v19, 0 }
0x194b   :  { %v3444_v38 = vmul.f32 1.442695, %v3439_v36  ;;  %v3446_v40 = vmul.f32 1.442695, %v3440_v37 }
0x194c   :  { %v3437_v43 = vpop.xlane.xlu1 %3436 }
0x194d   :  { %6384 = vpow2.f32 %v3444_v38  ;;  %v3441_v45 = vsub.f32 %v3425_v28, %v3437_v43  ;;  %v6251_v43 = vld [vmem:[#allocation10 + $0x68] sm:$0xff]  }
0x194e   :  { %6386 = vpow2.f32 %v3446_v40 }
0x194f   :  { %v3448_v48 = vmul.f32 1.442695, %v3441_v45 }
0x1951   :  { %6388 = vpow2.f32 %v3448_v48 }
0x1953   :  { %v6383_v49 = vpop.eup %6382 }
0x1954   :  { %v3450_v50 = vsel %vm575_vm4, %v6383_v49, 0.0 }
0x1955   :  { %3451 = vadd.xlane.f32.xlu0 %v3450_v50 }
0x1957   :  { %v6385_v51 = vpop.eup %6384 }
0x1958   :  { %v6387_v52 = vpop.eup %6386  ;;  %v3453_v53 = vsel %vm575_vm4, %v6385_v51, 0.0 }
0x1959   :  { %v3456_v54 = vsel %vm575_vm4, %v6387_v52, 0.0  ;;  %3454 = vadd.xlane.f32.xlu1 %v3453_v53 }
0x195a   :  { %3457 = vadd.xlane.f32.xlu0 %v3456_v54 }
0x195b   :  { %v6389_v55 = vpop.eup %6388 }
0x195c   :  { %v3459_v56 = vsel %vm575_vm4, %v6389_v55, 0.0 }
0x195d   :  { %3460 = vadd.xlane.f32.xlu1 %v3459_v56 }
0x19e2   :  { %v3452_v60 = vpop.xlane.xlu0 %3451 }
0x19e3   :  { %6390 = vrcp.f32 %v3452_v60 }
0x19e6   :  { %v3455_v0 = vpop.xlane.xlu1 %3454 }
0x19e7   :  { %v3458_v58 = vpop.xlane.xlu0 %3457  ;;  %6392 = vrcp.f32 %v3455_v0 }
0x19e8   :  { %6394 = vrcp.f32 %v3458_v58 }
0x19ea   :  { %v3461_v59 = vpop.xlane.xlu1 %3460 }
0x19eb   :  { %6396 = vrcp.f32 %v3461_v59 }
0x19ed   :  { %v6391_v61 = vpop.eup %6390 }
0x19ee   :  { %v3466_v63 = vmul.f32 %v6391_v61, %v6383_v49 }
0x19f1   :  { %v6393_v62 = vpop.eup %6392 }
0x19f2   :  { %v3467_v1 = vmul.f32 %v6393_v62, %v6385_v51  ;;  %v6395_v3 = vpop.eup %6394 }
0x19f3   :  { %v3468_v9 = vmul.f32 %v6395_v3, %v6387_v52 }
0x19f4   :  { %v3470_v5 = vpack.c.bf16 %v3467_v1, %v3466_v63 }
0x19f5   :  { %v6397_v8 = vpop.eup %6396 }
0x19f6   :  { %v3469_v17 = vmul.f32 %v6397_v8, %v6389_v55  ;;  %5984 = vmatmul.mubr.msk.bf16.vlgmr.msra.gmra.mrb[88].mxu1 %vm575_vm4, %v3470_v5 }
0x19f7   :  { %5994 = vmatpush3.bf16.msra.mxu1 %v3571_v20 }
0x19f8   :  { %v3471_v7 = vpack.c.bf16 %v3469_v17, %v3468_v9  ;;  %6178 = vmatprep.subr.msk.bf16.mxu1 %vm1163_vm5, %v3119_v21 }
0x19fa   :  { %5990 = vmatmul.mubr.msk.bf16.vlgmr.msra.gmra.mrb[84].mxu0 %vm575_vm4, %v3471_v7 }
0x19fb   :  { %6006 = vmatpush3.bf16.msra.mxu0 %v6246_v57  ;;  %6009 = vmatprep.mubr.msk.bf16.mxu0 %vm189_vm0, %v7239_v4 }
0x19fc   :  { %6007 = vmatprep.subr.bf16.mxu0 %v6247_v11 }
0x19ff   :  { %6008 = vmatpush3.bf16.msra.mxu0 %v6247_v11 }
0x1a00   :  { %6013 = vmatprep.subr.bf16.mxu0 %v6248_v13 }
0x1a02   :  { %6010 = vmatmul.mubr.msk.bf16.vlgmr.msra.gmra.mrb[88].mxu0 %vm189_vm0, %v7243_v14 }
0x1a03   :  { %6014 = vmatpush3.bf16.msra.mxu0 %v6248_v13  ;;  %6017 = vmatprep.mubr.msk.bf16.mxu0 %vm189_vm0, %v7239_v4 }
0x1a04   :  { %6015 = vmatprep.subr.bf16.mxu0 %v6249_v18 }
0x1a07   :  { %6016 = vmatpush3.bf16.msra.mxu0 %v6249_v18 }
0x1a08   :  { %6029 = vmatprep.subr.bf16.mxu0 %v6712_v2 }
0x1a0a   :  { %6018 = vmatmul.mubr.msk.bf16.vlgmr.msra.gmra.mrb[92].mxu0 %vm189_vm0, %v7243_v14 }
0x1a0b   :  { %6031 = vmatprep.mubr.msk.bf16.mxu0 %vm6713_vm1, %v6712_v2 }
0x1ac9   :  { %v3509_v16 = vpop.f32.mrb[88].mxu1 }
0x1aca   :  { %v5985_v31 = vpop.f32.mrb[89].mxu1 }
0x1acb   :  { %v3512_v33 = vpop.f32.mrb[90].mxu1 }
0x1acc   :  { %v3560_v34 = vpack.c.bf16 %v3512_v33, %v3509_v16  ;;  %v5986_v22 = vpop.f32.mrb[91].mxu1 }
0x1acd   :  { %v3553_v23 = vpop.f32.mrb[84].mxu0 }
0x1ace   :  { %v5991_v26 = vpop.f32.mrb[85].mxu0  ;;  %5995 = vmatprep.mubr.msk.bf16.mxu1 %vm472_vm2, %v3560_v34 }
0x1acf   :  { %v3556_v28 = vpop.f32.mrb[86].mxu0 }
0x1ad0   :  { %v3561_v29 = vpack.c.bf16 %v3556_v28, %v3553_v23  ;;  %v5992_v24 = vpop.f32.mrb[87].mxu0 }
0x1ad2   :  { %5996 = vmatmul.mubr.msk.bf16.vlgmr.msra.gmra.mrb[92].mxu1 %vm472_vm2, %v3561_v29 }
0x1ad3   :  { %6001 = vmatprep.mubr.msk.bf16.mxu1 %vm472_vm2, %v3116_v47  ;;  %6000 = vmatpush3.bf16.msra.mxu1 %v3629_v25 }
0x1ad4   :  { %6021 = vmatprep.subr.bf16.mxu1 %v6250_v27 }
0x1ad5   :  { %v6011_v30 = vpop.f32.mrb[88].mxu0 }
0x1ad6   :  { %v3731_v32 = vpop.f32.mrb[89].mxu0 }
0x1ad7   :  { %v6012_v36 = vpop.f32.mrb[90].mxu0 }
0x1ad8   :  { %v3879_v37 = vpack.c.bf16 %v6012_v36, %v6011_v30  ;;  %v3734_v38 = vpop.f32.mrb[91].mxu0 }
0x1ad9   :  { %v3878_v40 = vpack.c.bf16 %v3734_v38, %v3731_v32 }
0x1add   :  { %v6019_v45 = vpop.f32.mrb[92].mxu0 }
0x1ade   :  { %6002 = vmatmul.mubr.msk.bf16.vlgmr.msra.gmra.mrb[92].mxu1 %vm472_vm2, %v3117_v42  ;;  %v3797_v48 = vpop.f32.mrb[93].mxu0 }
0x1adf   :  { %6022 = vmatpush3.bf16.msra.mxu1 %v6250_v27  ;;  %v6020_v44 = vpop.f32.mrb[94].mxu0  ;;  %6025 = vmatprep.mubr.msk.bf16.mxu1 %vm189_vm0, %v7239_v4 }
0x1ae0   :  { %v3881_v46 = vpack.c.bf16 %v6020_v44, %v6019_v45  ;;  %v3800_v47 = vpop.f32.mrb[95].mxu0  ;;  %6023 = vmatprep.subr.bf16.mxu1 %v6251_v43 }
0x1ae1   :  { %v3880_v49 = vpack.c.bf16 %v3800_v47, %v3797_v48 }
0x1ae2   :  { %v3935_v39 = vsel %vm472_vm2, %v3881_v46, 0 }
0x1ae3   :  { %v3888_v50 = vsel %vm472_vm2, %v3880_v49, 0  ;;  %6024 = vmatpush3.bf16.msra.mxu1 %v6251_v43 }
0x1ae4   :  { %6030 = vmatpush3.bf16.xpose.msra.mxu0 %v3888_v50  ;;  %6035 = vmatprep.subr.bf16.mxu1 %v6712_v2  ;;  %v6253_v50 = vld [vmem:[#allocation7 + $0x78] sm:$0xff]  }
0x1ae5   :  { %6041 = vmatprep.subr.bf16.mxu0 %v6712_v2 }
0x1ae6   :  { %6026 = vmatmul.mubr.msk.bf16.vlgmr.msra.gmra.mrb[96].mxu1 %vm189_vm0, %v7243_v14 }
0x1ae7   :  { %6037 = vmatprep.mubr.msk.bf16.mxu1 %vm6713_vm1, %v6712_v2 }
0x1aeb   :  { %6032 = vmatmul.mubr.msk.bf16.vlgmr.msra.gmra.mrb[96].mxu0 %vm472_vm2, %v3878_v40 }
0x1aec   :  { %6036 = vmatpush3.bf16.xpose.msra.mxu1 %v3935_v39  ;;  %6043 = vmatprep.mubr.msk.bf16.mxu0 %vm6713_vm1, %v6712_v2 }
0x1aed   :  { %6047 = vmatprep.subr.bf16.mxu1 %v6712_v2 }
0x1af3   :  { %6038 = vmatmul.mubr.msk.bf16.vlgmr.msra.gmra.mrb[100].mxu1 %vm472_vm2, %v3879_v37  ;;  %v6252_v37 = vld [vmem:[#allocation7 + $0x70] sm:$0xff]  }
0x1af4   :  { %6049 = vmatprep.mubr.msk.bf16.mxu1 %vm6713_vm1, %v6712_v2 }
0x1bb9   :  { %v6027_v41 = vpop.f32.mrb[96].mxu1 }
0x1bba   :  { %v3863_v42 = vpop.f32.mrb[97].mxu1 }
0x1bbb   :  { %v6028_v51 = vpop.f32.mrb[98].mxu1 }
0x1bbc   :  { %v3883_v52 = vpack.c.bf16 %v6028_v51, %v6027_v41  ;;  %v3866_v53 = vpop.f32.mrb[99].mxu1  ;;  %v6254_v41 = vld [vmem:[#allocation8 + $0x70] sm:$0xff]  }
0x1bbd   :  { %v3882_v54 = vpack.c.bf16 %v3866_v53, %v3863_v42 }
0x1bbe   :  { %v3924_v55 = vpop.f32.mrb[96].mxu0  ;;  %6048 = vmatpush3.bf16.msra.mxu1 %v3883_v52 }
0x1bbf   :  { %v3978_v56 = vmul.f32 0.35355338, %v3924_v55  ;;  %v6033_v57 = vpop.f32.mrb[97].mxu0  ;;  %6042 = vmatpush3.bf16.msra.mxu0 %v3882_v54  ;;  %v6255_v54 = vld [vmem:[#allocation8 + $0x78] sm:$0xff]  }
0x1bc0   :  { %v3927_v60 = vpop.f32.mrb[98].mxu0  ;;  %6059 = vmatprep.subr.bf16.mxu0 %v6252_v37  ;;  %v4123_v55 = vld [vmem:[#allocation11 + $0x18] sm:$0xf]  ;;  %v6256_v57 = vld [vmem:[#allocation10 + $0x70] sm:$0xff]  }
0x1bc1   :  { %v3979_v0 = vmul.f32 0.35355338, %v3927_v60  ;;  %v6034_v58 = vpop.f32.mrb[99].mxu0  ;;  %v3986_v59 = vsel %vm575_vm4, %v3978_v56, -inf  ;;  %6179 = vmatprep.subr.msk.bf16.mxu1 %vm1163_vm5, %v4123_v55 }
0x1bc2   :  { %3987 = vmax.xlane.f32.xlu0 %v3986_v59 }
0x1bc3   :  { %v3983_v61 = vadd.f32 %v3979_v0, %v6978_v35 }
0x1bc5   :  { %v3989_v62 = vsel %vm575_vm4, %v3983_v61, -inf }
0x1bc6   :  { %v3971_v63 = vpop.f32.mrb[100].mxu1  ;;  %3990 = vmax.xlane.f32.xlu1 %v3989_v62 }
0x1bc7   :  { %v3980_v1 = vmul.f32 0.35355338, %v3971_v63  ;;  %v6039_v3 = vpop.f32.mrb[101].mxu1 }
0x1bc8   :  { %v3974_v5 = vpop.f32.mrb[102].mxu1 }
0x1bc9   :  { %v3981_v8 = vmul.f32 0.35355338, %v3974_v5  ;;  %v6040_v9 = vpop.f32.mrb[103].mxu1  ;;  %v3992_v17 = vsel %vm575_vm4, %v3980_v1, -inf }
0x1bca   :  { %3993 = vmax.xlane.f32.xlu0 %v3992_v17 }
0x1bcb   :  { %v3985_v7 = vadd.f32 %v3981_v8, %v6978_v35 }
0x1bcd   :  { %v3995_v11 = vsel %vm575_vm4, %v3985_v7, -inf }
0x1bce   :  { %3996 = vmax.xlane.f32.xlu1 %v3995_v11 }
0x1c4f   :  { %v3988_v13 = vpop.xlane.xlu0 %3987 }
0x1c50   :  { %v3998_v18 = vsub.f32 %v3978_v56, %v3988_v13  ;;  %v4131_v56 = vsel %vm1163_vm5, %v4123_v55, 0  ;;  %v6257_v13 = vld [vmem:[#allocation10 + $0x78] sm:$0xff]  }
0x1c52   :  { %v4002_v19 = vmul.f32 1.442695, %v3998_v18 }
0x1c53   :  { %v3991_v20 = vpop.xlane.xlu1 %3990 }
0x1c54   :  { %6398 = vpow2.f32 %v4002_v19  ;;  %v3999_v21 = vsub.f32 %v3983_v61, %v3991_v20 }
0x1c56   :  { %v4004_v16 = vmul.f32 1.442695, %v3999_v21 }
0x1c57   :  { %v3994_v31 = vpop.xlane.xlu0 %3993 }
0x1c58   :  { %6400 = vpow2.f32 %v4004_v16  ;;  %v4000_v33 = vsub.f32 %v3980_v1, %v3994_v31 }
0x1c5a   :  { %v4006_v34 = vmul.f32 1.442695, %v4000_v33 }
0x1c5b   :  { %v3997_v22 = vpop.xlane.xlu1 %3996 }
0x1c5c   :  { %6402 = vpow2.f32 %v4006_v34  ;;  %v4001_v23 = vsub.f32 %v3985_v7, %v3997_v22 }
0x1c5e   :  { %v6399_v26 = vpop.eup %6398  ;;  %v4008_v28 = vmul.f32 1.442695, %v4001_v23 }
0x1c5f   :  { %v4010_v29 = vsel %vm575_vm4, %v6399_v26, 0.0 }
0x1c60   :  { %6404 = vpow2.f32 %v4008_v28  ;;  %4011 = vadd.xlane.f32.xlu0 %v4010_v29 }
0x1c62   :  { %v6401_v24 = vpop.eup %6400 }
0x1c63   :  { %v4013_v25 = vsel %vm575_vm4, %v6401_v24, 0.0 }
0x1c64   :  { %4014 = vadd.xlane.f32.xlu1 %v4013_v25 }
0x1c66   :  { %v6403_v27 = vpop.eup %6402 }
0x1c67   :  { %v4016_v30 = vsel %vm575_vm4, %v6403_v27, 0.0 }
0x1c68   :  { %4017 = vadd.xlane.f32.xlu0 %v4016_v30 }
0x1c6a   :  { %v6405_v32 = vpop.eup %6404 }
0x1c6b   :  { %v4019_v36 = vsel %vm575_vm4, %v6405_v32, 0.0 }
0x1c6c   :  { %4020 = vadd.xlane.f32.xlu1 %v4019_v36 }
0x1ced   :  { %v4012_v38 = vpop.xlane.xlu0 %4011 }
0x1cee   :  { %6406 = vrcp.f32 %v4012_v38 }
0x1cf1   :  { %v4015_v40 = vpop.xlane.xlu1 %4014 }
0x1cf2   :  { %6408 = vrcp.f32 %v4015_v40 }
0x1cf5   :  { %v4018_v43 = vpop.xlane.xlu0 %4017 }
0x1cf6   :  { %6410 = vrcp.f32 %v4018_v43 }
0x1cf8   :  { %v6407_v48 = vpop.eup %6406 }
0x1cf9   :  { %v4021_v45 = vpop.xlane.xlu1 %4020  ;;  %v4026_v46 = vmul.f32 %v6407_v48, %v6399_v26 }
0x1cfa   :  { %6412 = vrcp.f32 %v4021_v45 }
0x1cfc   :  { %v6409_v44 = vpop.eup %6408 }
0x1cfd   :  { %v4027_v47 = vmul.f32 %v6409_v44, %v6401_v24 }
0x1cff   :  { %v4030_v49 = vpack.c.bf16 %v4027_v47, %v4026_v46 }
0x1d00   :  { %v6411_v39 = vpop.eup %6410 }
0x1d01   :  { %6044 = vmatmul.mubr.msk.bf16.vlgmr.msra.gmra.mrb[100].mxu0 %vm575_vm4, %v4030_v49  ;;  %v4028_v51 = vmul.f32 %v6411_v39, %v6403_v27 }
0x1d02   :  { %6060 = vmatpush3.bf16.msra.mxu0 %v6252_v37  ;;  %6063 = vmatprep.mubr.msk.bf16.mxu0 %vm189_vm0, %v7239_v4 }
0x1d03   :  { %6061 = vmatprep.subr.bf16.mxu0 %v6253_v50 }
0x1d04   :  { %v6413_v42 = vpop.eup %6412 }
0x1d05   :  { %v4029_v52 = vmul.f32 %v6413_v42, %v6405_v32 }
0x1d06   :  { %6062 = vmatpush3.bf16.msra.mxu0 %v6253_v50 }
0x1d07   :  { %v4031_v53 = vpack.c.bf16 %v4029_v52, %v4028_v51  ;;  %6067 = vmatprep.subr.bf16.mxu0 %v6254_v41 }
0x1d09   :  { %6050 = vmatmul.mubr.msk.bf16.vlgmr.msra.gmra.mrb[104].mxu1 %vm575_vm4, %v4031_v53  ;;  %6064 = vmatmul.mubr.msk.bf16.vlgmr.msra.gmra.mrb[104].mxu0 %vm189_vm0, %v7243_v14 }
0x1d0a   :  { %6068 = vmatpush3.bf16.msra.mxu0 %v6254_v41  ;;  %6071 = vmatprep.mubr.msk.bf16.mxu0 %vm189_vm0, %v7239_v4 }
0x1d0b   :  { %6069 = vmatprep.subr.bf16.mxu0 %v6255_v54  ;;  %6054 = vmatpush3.bf16.msra.mxu1 %v4131_v56 }
0x1d0c   :  { %6075 = vmatprep.subr.bf16.mxu1 %v6256_v57 }
0x1d0e   :  { %6070 = vmatpush3.bf16.msra.mxu0 %v6255_v54 }
0x1d0f   :  { %6083 = vmatprep.subr.bf16.mxu0 %v6712_v2 }
0x1d11   :  { %6072 = vmatmul.mubr.msk.bf16.vlgmr.msra.gmra.mrb[108].mxu0 %vm189_vm0, %v7243_v14 }
0x1d12   :  { %6085 = vmatprep.mubr.msk.bf16.mxu0 %vm6713_vm1, %v6712_v2 }
0x1dd4   :  { %v4069_v60 = vpop.f32.mrb[100].mxu0 }
0x1dd5   :  { %v6045_v0 = vpop.f32.mrb[101].mxu0 }
0x1dd6   :  { %v4072_v58 = vpop.f32.mrb[102].mxu0 }
0x1dd7   :  { %v4120_v59 = vpack.c.bf16 %v4072_v58, %v4069_v60  ;;  %v6046_v61 = vpop.f32.mrb[103].mxu0 }
0x1dd9   :  { %6055 = vmatprep.mubr.msk.bf16.mxu1 %vm472_vm2, %v4120_v59 }
0x1ddc   :  { %v4113_v62 = vpop.f32.mrb[104].mxu1  ;;  %v6065_v63 = vpop.f32.mrb[104].mxu0 }
0x1ddd   :  { %v6051_v1 = vpop.f32.mrb[105].mxu1  ;;  %v4237_v3 = vpop.f32.mrb[105].mxu0 }
0x1dde   :  { %v4116_v5 = vpop.f32.mrb[106].mxu1  ;;  %v6066_v8 = vpop.f32.mrb[106].mxu0 }
0x1ddf   :  { %v4121_v9 = vpack.c.bf16 %v4116_v5, %v4113_v62  ;;  %v6052_v17 = vpop.f32.mrb[107].mxu1  ;;  %v4385_v7 = vpack.c.bf16 %v6066_v8, %v6065_v63  ;;  %v4240_v11 = vpop.f32.mrb[107].mxu0 }
0x1de0   :  { %v4384_v18 = vpack.c.bf16 %v4240_v11, %v4237_v3 }
0x1de1   :  { %6056 = vmatmul.mubr.msk.bf16.vlgmr.msra.gmra.mrb[92].mxu1 %vm472_vm2, %v4121_v9 }
0x1de2   :  { %6076 = vmatpush3.bf16.msra.mxu1 %v6256_v57  ;;  %6079 = vmatprep.mubr.msk.bf16.mxu1 %vm189_vm0, %v7239_v4 }
0x1de3   :  { %6077 = vmatprep.subr.bf16.mxu1 %v6257_v13 }
0x1de4   :  { %v6073_v19 = vpop.f32.mrb[108].mxu0 }
0x1de5   :  { %v4303_v20 = vpop.f32.mrb[109].mxu0 }
0x1de6   :  { %6078 = vmatpush3.bf16.msra.mxu1 %v6257_v13  ;;  %v6074_v21 = vpop.f32.mrb[110].mxu0 }
0x1de7   :  { %v4387_v16 = vpack.c.bf16 %v6074_v21, %v6073_v19  ;;  %v4306_v31 = vpop.f32.mrb[111].mxu0  ;;  %6089 = vmatprep.subr.bf16.mxu1 %v6712_v2 }
0x1de8   :  { %v4386_v33 = vpack.c.bf16 %v4306_v31, %v4303_v20 }
0x1de9   :  { %6080 = vmatmul.mubr.msk.bf16.vlgmr.msra.gmra.mrb[108].mxu1 %vm189_vm0, %v7243_v14  ;;  %v4441_v4 = vsel %vm472_vm2, %v4387_v16, 0 }
0x1dea   :  { %v4394_v34 = vsel %vm472_vm2, %v4386_v33, 0  ;;  %6091 = vmatprep.mubr.msk.bf16.mxu1 %vm6713_vm1, %v6712_v2 }
0x1deb   :  { %6084 = vmatpush3.bf16.xpose.msra.mxu0 %v4394_v34 }
0x1dec   :  { %6095 = vmatprep.subr.bf16.mxu0 %v6712_v2 }
0x1def   :  { %6090 = vmatpush3.bf16.xpose.msra.mxu1 %v4441_v4  ;;  %v4629_v4 = vld [vmem:[#allocation11 + $0x1c] sm:$0xf] }
0x1df0   :  { %6101 = vmatprep.subr.bf16.mxu1 %v6712_v2 }
0x1df2   :  { %6086 = vmatmul.mubr.msk.bf16.vlgmr.msra.gmra.mrb[112].mxu0 %vm472_vm2, %v4384_v18 }
0x1df3   :  { %6097 = vmatprep.mubr.msk.bf16.mxu0 %vm6713_vm1, %v6712_v2 }
0x1df6   :  { %6092 = vmatmul.mubr.msk.bf16.vlgmr.msra.gmra.mrb[112].mxu1 %vm472_vm2, %v4385_v7 }
0x1df7   :  { %6103 = vmatprep.mubr.msk.bf16.mxu1 %vm6713_vm1, %v6712_v2 }
0x1ebc   :  { %v6081_v14 = vpop.f32.mrb[108].mxu1 }
0x1ebd   :  { %v4369_v22 = vpop.f32.mrb[109].mxu1 }
0x1ebe   :  { %v6082_v23 = vpop.f32.mrb[110].mxu1 }
0x1ebf   :  { %v4389_v26 = vpack.c.bf16 %v6082_v23, %v6081_v14  ;;  %v4372_v28 = vpop.f32.mrb[111].mxu1  ;;  %v4637_v14 = vsel %vm1163_vm5, %v4629_v4, 0 }
0x1ec0   :  { %v4388_v29 = vpack.c.bf16 %v4372_v28, %v4369_v22 }
0x1ec1   :  { %6102 = vmatpush3.bf16.msra.mxu1 %v4389_v26 }
0x1ec2   :  { %6096 = vmatpush3.bf16.msra.mxu0 %v4388_v29  ;;  %6180 = vmatprep.subr.msk.bf16.mxu1 %vm1163_vm5, %v4629_v4 }
0x1ec5   :  { %v4430_v24 = vpop.f32.mrb[112].mxu0 }
0x1ec6   :  { %v4484_v25 = vmul.f32 0.35355338, %v4430_v24  ;;  %v6087_v27 = vpop.f32.mrb[113].mxu0 }
0x1ec7   :  { %v4433_v30 = vpop.f32.mrb[114].mxu0 }
0x1ec8   :  { %v4485_v32 = vmul.f32 0.35355338, %v4433_v30  ;;  %v6088_v36 = vpop.f32.mrb[115].mxu0  ;;  %v4492_v37 = vsel %vm575_vm4, %v4484_v25, -inf }
0x1ec9   :  { %v4477_v38 = vpop.f32.mrb[112].mxu1  ;;  %4493 = vmax.xlane.f32.xlu0 %v4492_v37 }
0x1eca   :  { %v4486_v40 = vmul.f32 0.35355338, %v4477_v38  ;;  %v6093_v43 = vpop.f32.mrb[113].mxu1  ;;  %v4489_v45 = vadd.f32 %v4485_v32, %v6978_v35 }
0x1ecb   :  { %v4480_v48 = vpop.f32.mrb[114].mxu1 }
0x1ecc   :  { %v4487_v44 = vmul.f32 0.35355338, %v4480_v48  ;;  %v6094_v46 = vpop.f32.mrb[115].mxu1  ;;  %v4498_v47 = vsel %vm575_vm4, %v4486_v40, -inf  ;;  %v4495_v49 = vsel %vm575_vm4, %v4489_v45, -inf }
0x1ecd   :  { %4499 = vmax.xlane.f32.xlu0 %v4498_v47  ;;  %4496 = vmax.xlane.f32.xlu1 %v4495_v49 }
0x1ece   :  { %v4491_v50 = vadd.f32 %v4487_v44, %v6978_v35 }
0x1ed0   :  { %v4501_v39 = vsel %vm575_vm4, %v4491_v50, -inf }
0x1ed1   :  { %4502 = vmax.xlane.f32.xlu1 %v4501_v39 }
0x1f56   :  { %v4494_v41 = vpop.xlane.xlu0 %4493 }
0x1f57   :  { %v4504_v42 = vsub.f32 %v4484_v25, %v4494_v41 }
0x1f59   :  { %v4508_v51 = vmul.f32 1.442695, %v4504_v42 }
0x1f5a   :  { %v4500_v52 = vpop.xlane.xlu0 %4499  ;;  %v4497_v53 = vpop.xlane.xlu1 %4496 }
0x1f5b   :  { %6414 = vpow2.f32 %v4508_v51  ;;  %v4506_v54 = vsub.f32 %v4486_v40, %v4500_v52  ;;  %v4505_v55 = vsub.f32 %v4489_v45, %v4497_v53 }
0x1f5d   :  { %v4512_v56 = vmul.f32 1.442695, %v4506_v54  ;;  %v4510_v57 = vmul.f32 1.442695, %v4505_v55 }
0x1f5e   :  { %v4503_v60 = vpop.xlane.xlu1 %4502 }
0x1f5f   :  { %6416 = vpow2.f32 %v4512_v56  ;;  %v4507_v0 = vsub.f32 %v4491_v50, %v4503_v60 }
0x1f60   :  { %6418 = vpow2.f32 %v4510_v57 }
0x1f61   :  { %v4514_v58 = vmul.f32 1.442695, %v4507_v0 }
0x1f63   :  { %6420 = vpow2.f32 %v4514_v58 }
0x1f65   :  { %v6415_v35 = vpop.eup %6414 }
0x1f66   :  { %v4516_v59 = vsel %vm575_vm4, %v6415_v35, 0.0 }
0x1f67   :  { %4517 = vadd.xlane.f32.xlu0 %v4516_v59 }
0x1f69   :  { %v6417_v61 = vpop.eup %6416 }
0x1f6a   :  { %v6419_v62 = vpop.eup %6418  ;;  %v4522_v63 = vsel %vm575_vm4, %v6417_v61, 0.0 }
0x1f6b   :  { %4523 = vadd.xlane.f32.xlu0 %v4522_v63  ;;  %v4519_v1 = vsel %vm575_vm4, %v6419_v62, 0.0  ;;  %v6259_v63 = vld [vmem:[#allocation13 + $0x18] sm:$0xff]  }
0x1f6c   :  { %4520 = vadd.xlane.f32.xlu1 %v4519_v1 }
0x1f6d   :  { %v6421_v3 = vpop.eup %6420 }
0x1f6e   :  { %v4525_v5 = vsel %vm575_vm4, %v6421_v3, 0.0 }
0x1f70   :  { %4526 = vadd.xlane.f32.xlu1 %v4525_v5 }
0x1ff4   :  { %v4518_v8 = vpop.xlane.xlu0 %4517 }
0x1ff5   :  { %6422 = vrcp.f32 %v4518_v8 }
0x1ff8   :  { %v4524_v9 = vpop.xlane.xlu0 %4523 }
0x1ff9   :  { %v4521_v17 = vpop.xlane.xlu1 %4520 }
0x1ffa   :  { %6424 = vrcp.f32 %v4521_v17 }
0x1ffb   :  { %6426 = vrcp.f32 %v4524_v9 }
0x1ffd   :  { %v4527_v7 = vpop.xlane.xlu1 %4526 }
0x1ffe   :  { %6428 = vrcp.f32 %v4527_v7 }
0x1fff   :  { %v6423_v11 = vpop.eup %6422 }
0x2000   :  { %v4532_v18 = vmul.f32 %v6423_v11, %v6415_v35 }
0x2004   :  { %v6425_v13 = vpop.eup %6424 }
0x2005   :  { %v4533_v19 = vmul.f32 %v6425_v13, %v6419_v62  ;;  %v6427_v20 = vpop.eup %6426  ;;  %v6258_v62 = vld [vmem:[#allocation13 + $0x10] sm:$0xff]  }
0x2006   :  { %v4534_v31 = vmul.f32 %v6427_v20, %v6417_v61  ;;  %6113 = vmatprep.subr.bf16.mxu0 %v6258_v62 }
0x2007   :  { %v4536_v21 = vpack.c.bf16 %v4533_v19, %v4532_v18 }
0x2008   :  { %v6429_v16 = vpop.eup %6428 }
0x2009   :  { %v4535_v33 = vmul.f32 %v6429_v16, %v6421_v3  ;;  %6098 = vmatmul.mubr.msk.bf16.vlgmr.msra.gmra.mrb[116].mxu0 %vm575_vm4, %v4536_v21  ;;  %v5403_v16 = vld [vmem:[%s7564_s8 + $0x1] ss:$0 sm:$0xff]  ;;  %s6715_s8 = smov [#allocation16]  }
0x200a   :  { %6114 = vmatpush3.bf16.msra.mxu0 %v6258_v62  ;;  %s5207_s21 = sshll.u32 %s6715_s8, 4  ;;  %s5208_s21 = int_to_ptr.vmem [resolvable:$true] %s5207_s21 }
0x200b   :  { %v4537_v34 = vpack.c.bf16 %v4535_v33, %v4534_v31  ;;  %6115 = vmatprep.subr.bf16.mxu0 %v6259_v63  ;;  %p6647_p9 = scmp.lt.s32.totalorder %s5208_s21, %s5208_s21 }
0x200d   :  { %6104 = vmatmul.mubr.msk.bf16.vlgmr.msra.gmra.mrb[116].mxu1 %vm575_vm4, %v4537_v34 }
0x200e   :  { %6108 = vmatpush3.bf16.msra.mxu1 %v4637_v14  ;;  %6116 = vmatpush3.bf16.msra.mxu0 %v6259_v63 }
0x200f   :  { %6141 = vmatprep.subr.bf16.mxu1 %v6712_v2 }
0x20dc   :  { %v4575_v22 = vpop.f32.mrb[116].mxu0 }
0x20dd   :  { %v6099_v23 = vpop.f32.mrb[117].mxu0 }
0x20de   :  { %v4578_v26 = vpop.f32.mrb[118].mxu0 }
0x20df   :  { %v4626_v28 = vpack.c.bf16 %v4578_v26, %v4575_v22  ;;  %v6100_v29 = vpop.f32.mrb[119].mxu0  ;;  %v5404_v22 = vld [vmem:[%s7565_s9 + $0x1] ss:$0 sm:$0xff]  ;;  %s6642_s9 = scalar_lea.vmem %s5208_s21, 256 }
0x20e0   :  { %v4619_v24 = vpop.f32.mrb[116].mxu1  ;;  %p6643_p8 = scmp.ne.s32.totalorder %s5208_s21, %s6642_s9  ;;  %p6648_p10 = scmp.lt.s32.totalorder %s6642_s9, %s6642_s9 }
0x20e1   :  { %v6105_v25 = vpop.f32.mrb[117].mxu1  ;;  %6109 = vmatprep.mubr.msk.bf16.mxu1 %vm472_vm2, %v4626_v28 }
0x20e2   :  { %v4622_v27 = vpop.f32.mrb[118].mxu1  ;;  %p6649_p11 = por %p6648_p10, %p6647_p9 }
0x20e3   :  { %v4627_v30 = vpack.c.bf16 %v4622_v27, %v4619_v24  ;;  %v6106_v32 = vpop.f32.mrb[119].mxu1 }
0x20e4   :  { %p6650_p12 = pnand %p6649_p11, %p6643_p8 }
0x20e5   :  { %6110 = vmatmul.mubr.msk.bf16.vlgmr.msra.gmra.mrb[92].mxu1 %vm472_vm2, %v4627_v30 }
0x20e6   :  { %6145 = vmatprep.mubr.msk.bf16.mxu1 %vm6713_vm1, %v6712_v2 }
0x21b8   :  { %v6111_v36 = vpop.f32.mrb[92].mxu1 }
0x21b9   :  { %v4673_v37 = vpop.f32.mrb[93].mxu1  ;;  %v7441_v45 = vadd.f32 %v6111_v36, %v7209_v10 }
0x21ba   :  { %v7438_v38 = vadd.f32 %v4673_v37, %v7206_v6  ;;  %v6112_v40 = vpop.f32.mrb[94].mxu1 }
0x21bb   :  { %v4676_v43 = vpop.f32.mrb[95].mxu1  ;;  %v7449_v46 = vadd.f32 %v6112_v40, %v7217_v15  ;;  %v4706_v6 = vsel %vm189_vm0, %v7441_v45, 0.0 }
0x21bc   :  { %v7444_v48 = vadd.f32 %v4676_v43, %v7212_v12  ;;  %v4700_v44 = vsel %vm189_vm0, %v7438_v38, 0.0  ;;  %v6260_v43 = vld [vmem:[%s7567_s11 + $0x40] sm:$0xff]  }
0x21bd   :  { %4701 = vadd.xlane.f32.xlu0 %v4700_v44  ;;  %v4709_v10 = vsel %vm189_vm0, %v7449_v46, 0.0  ;;  %6121 = vmatprep.subr.bf16.mxu0 %v6260_v43  ;;  %v6261_v44 = vld [vmem:[%s7567_s11 + $0x48] sm:$0xff]  }
0x21be   :  { %v4703_v47 = vsel %vm189_vm0, %v7444_v48, 0.0 }
0x21bf   :  { %4704 = vadd.xlane.f32.xlu1 %v4703_v47  ;;  %v6262_v47 = vld [vmem:[%s7567_s11 + $0x50] sm:$0xff]  }
0x21c1   :  { %4707 = vadd.xlane.f32.xlu0 %v4706_v6  ;;  %v6263_v6 = vld [vmem:[%s7567_s11 + $0x58] sm:$0xff]  }
0x21c3   :  { %4710 = vadd.xlane.f32.xlu1 %v4709_v10  ;;  %v6264_v10 = vld [vmem:[%s7567_s11 + $0x60] sm:$0xff]  }
0x224a   :  { %v4702_v12 = vpop.xlane.xlu0 %4701 }
0x224b   :  { %v4712_v49 = vmul.f32 0.03125, %v4702_v12  ;;  %v6265_v12 = vld [vmem:[%s7567_s11 + $0x68] sm:$0xff]  }
0x224c   :  { %v4705_v50 = vpop.xlane.xlu1 %4704 }
0x224d   :  { %v4716_v39 = vsub.f32 %v7438_v38, %v4712_v49  ;;  %v4713_v41 = vmul.f32 0.03125, %v4705_v50  ;;  %v6266_v49 = vld [vmem:[%s7567_s11 + $0x70] sm:$0xff]   ;;  %v6267_v50 = vld [vmem:[%s7567_s11 + $0x78] sm:$0xff]  }
0x224e   :  { %v4708_v15 = vpop.xlane.xlu0 %4707 }
0x224f   :  { %v4717_v42 = vsub.f32 %v7444_v48, %v4713_v41  ;;  %v4714_v51 = vmul.f32 0.03125, %v4708_v15  ;;  %v4720_v52 = vmul.f32 %v4716_v39, %v4716_v39 }
0x2250   :  { %v4711_v53 = vpop.xlane.xlu1 %4710 }
0x2251   :  { %v4718_v54 = vsub.f32 %v7441_v45, %v4714_v51  ;;  %v4715_v55 = vmul.f32 0.03125, %v4711_v53  ;;  %v4724_v56 = vsel %vm189_vm0, %v4720_v52, 0.0  ;;  %v4721_v57 = vmul.f32 %v4717_v42, %v4717_v42 }
0x2252   :  { %4725 = vadd.xlane.f32.xlu0 %v4724_v56 }
0x2253   :  { %v4719_v60 = vsub.f32 %v7449_v46, %v4715_v55  ;;  %v4727_v0 = vsel %vm189_vm0, %v4721_v57, 0.0  ;;  %v4722_v58 = vmul.f32 %v4718_v54, %v4718_v54 }
0x2254   :  { %4728 = vadd.xlane.f32.xlu1 %v4727_v0 }
0x2255   :  { %v4730_v35 = vsel %vm189_vm0, %v4722_v58, 0.0  ;;  %v4723_v59 = vmul.f32 %v4719_v60, %v4719_v60 }
0x2256   :  { %4731 = vadd.xlane.f32.xlu0 %v4730_v35 }
0x2257   :  { %v4733_v61 = vsel %vm189_vm0, %v4723_v59, 0.0 }
0x2258   :  { %4734 = vadd.xlane.f32.xlu1 %v4733_v61 }
0x22df   :  { %v4726_v1 = vpop.xlane.xlu0 %4725 }
0x22e0   :  { %v4736_v3 = vmul.f32 0.03125, %v4726_v1 }
0x22e1   :  { %v4729_v5 = vpop.xlane.xlu1 %4728 }
0x22e2   :  { %v4740_v8 = vadd.f32 1e-05, %v4736_v3  ;;  %v4737_v9 = vmul.f32 0.03125, %v4729_v5 }
0x22e3   :  { %v4732_v17 = vpop.xlane.xlu0 %4731 }
0x22e4   :  { %6430 = vrsqrt.f32 %v4740_v8  ;;  %v4741_v7 = vadd.f32 1e-05, %v4737_v9  ;;  %v4738_v11 = vmul.f32 0.03125, %v4732_v17 }
0x22e5   :  { %v4735_v13 = vpop.xlane.xlu1 %4734 }
0x22e6   :  { %6432 = vrsqrt.f32 %v4741_v7  ;;  %v4742_v18 = vadd.f32 1e-05, %v4738_v11  ;;  %v4739_v19 = vmul.f32 0.03125, %v4735_v13 }
0x22e8   :  { %6434 = vrsqrt.f32 %v4742_v18  ;;  %v4743_v20 = vadd.f32 1e-05, %v4739_v19 }
0x22ea   :  { %6436 = vrsqrt.f32 %v4743_v20 }
0x22ee   :  { %v6431_v21 = vpop.eup %6430 }
0x22ef   :  { %v4748_v31 = vmul.f32 %v6431_v21, %v4716_v39 }
0x22f0   :  { %v6433_v33 = vpop.eup %6432 }
0x22f1   :  { %v4749_v34 = vmul.f32 %v6433_v33, %v4717_v42  ;;  %v4758_v4 = vmul.f32 %v5403_v16, %v4748_v31 }
0x22f2   :  { %v6435_v14 = vpop.eup %6434 }
0x22f3   :  { %v4750_v23 = vmul.f32 %v6435_v14, %v4718_v54  ;;  %v4759_v26 = vmul.f32 %v5403_v16, %v4749_v34  ;;  %v4768_v25 = vadd.f32 %v5404_v22, %v4758_v4 }
0x22f4   :  { %v6437_v28 = vpop.eup %6436 }
0x22f5   :  { %v4760_v29 = vmul.f32 %v5403_v16, %v4750_v23  ;;  %v4751_v24 = vmul.f32 %v6437_v28, %v4719_v60  ;;  %v4769_v27 = vadd.f32 %v5404_v22, %v4759_v26 }
0x22f7   :  { %v4761_v30 = vmul.f32 %v5403_v16, %v4751_v24  ;;  %v4772_v32 = vpack.c.bf16 %v4769_v27, %v4768_v25  ;;  %v4770_v36 = vadd.f32 %v5404_v22, %v4760_v29 }
0x22f9   :  { %6117 = vmatprep.mubr.msk.bf16.mxu0 %vm189_vm0, %v4772_v32  ;;  %v4771_v37 = vadd.f32 %v5404_v22, %v4761_v30 }
0x22fb   :  { %v4773_v40 = vpack.c.bf16 %v4771_v37, %v4770_v36 }
0x22fd   :  { %6118 = vmatmul.mubr.msk.bf16.vlgmr.msra.gmra.mrb[120].mxu0 %vm189_vm0, %v4773_v40 }
0x22fe   :  { %6122 = vmatpush3.bf16.msra.mxu0 %v6260_v43 }
0x22ff   :  { %6123 = vmatprep.subr.bf16.mxu0 %v6261_v44 }
0x2302   :  { %6124 = vmatpush3.bf16.msra.mxu0 %v6261_v44 }
0x2303   :  { %6125 = vmatprep.subr.bf16.mxu0 %v6262_v47 }
0x2306   :  { %6126 = vmatpush3.bf16.msra.mxu0 %v6262_v47 }
0x2307   :  { %6127 = vmatprep.subr.bf16.mxu0 %v6263_v6 }
0x230a   :  { %6128 = vmatpush3.bf16.msra.mxu0 %v6263_v6 }
0x230b   :  { %6129 = vmatprep.subr.bf16.mxu0 %v6264_v10 }
0x230e   :  { %6130 = vmatpush3.bf16.msra.mxu0 %v6264_v10 }
0x230f   :  { %6131 = vmatprep.subr.bf16.mxu0 %v6265_v12 }
0x2312   :  { %6132 = vmatpush3.bf16.msra.mxu0 %v6265_v12 }
0x2313   :  { %6133 = vmatprep.subr.bf16.mxu0 %v6266_v49 }
0x2316   :  { %6134 = vmatpush3.bf16.msra.mxu0 %v6266_v49 }
0x2317   :  { %6135 = vmatprep.subr.bf16.mxu0 %v6267_v50 }
0x231a   :  { %6136 = vmatpush3.bf16.msra.mxu0 %v6267_v50 }
0x23d0   :  { %v6119_v39 = vpop.f32.mrb[120].mxu0 }
0x23d1   :  { %v4848_v41 = vmul.f32 %v6119_v39, %v6119_v39  ;;  %v4831_v15 = vpop.f32.mrb[121].mxu0 }
0x23d2   :  { %v4846_v42 = vmul.f32 %v4831_v15, %v4831_v15  ;;  %v6120_v51 = vpop.f32.mrb[122].mxu0 }
0x23d3   :  { %v4852_v52 = vmul.f32 %v6119_v39, %v4848_v41  ;;  %v4849_v53 = vmul.f32 %v6120_v51, %v6120_v51  ;;  %v4834_v54 = vpop.f32.mrb[123].mxu0 }
0x23d4   :  { %v4850_v55 = vmul.f32 %v4846_v42, %v4831_v15  ;;  %v4847_v56 = vmul.f32 %v4834_v54, %v4834_v54 }
0x23d5   :  { %v4856_v57 = vmul.f32 0.044715, %v4852_v52  ;;  %v4853_v60 = vmul.f32 %v6120_v51, %v4849_v53 }
0x23d6   :  { %v4854_v0 = vmul.f32 0.044715, %v4850_v55  ;;  %v4851_v58 = vmul.f32 %v4847_v56, %v4834_v54 }
0x23d7   :  { %v4860_v35 = vadd.f32 %v6119_v39, %v4856_v57  ;;  %v4857_v59 = vmul.f32 0.044715, %v4853_v60  ;;  %v6268_v60 = vld [vmem:[#allocation14] sm:$0xff]  }
0x23d8   :  { %v4858_v61 = vadd.f32 %v4854_v0, %v4831_v15  ;;  %v4855_v62 = vmul.f32 0.044715, %v4851_v58  ;;  %6142 = vmatpush3.bf16.msra.mxu1 %v6268_v60  ;;  %v6269_v0 = vld [vmem:[#allocation14 + $0x8] sm:$0xff]  }
0x23d9   :  { %v4864_v63 = vmul.f32 0.7978846, %v4860_v35  ;;  %v4861_v1 = vadd.f32 %v6120_v51, %v4857_v59  ;;  %6143 = vmatprep.subr.bf16.mxu1 %v6712_v2 }
0x23da   :  { %v4862_v3 = vmul.f32 0.7978846, %v4858_v61  ;;  %v4859_v5 = vadd.f32 %v4855_v62, %v4834_v54 }
0x23db   :  { %6438 = vtanh.f32 %v4864_v63  ;;  %v4865_v8 = vmul.f32 0.7978846, %v4861_v1 }
0x23dc   :  { %6440 = vtanh.f32 %v4862_v3  ;;  %v4863_v9 = vmul.f32 0.7978846, %v4859_v5  ;;  %6144 = vmatpush3.bf16.msra.mxu1 %v6269_v0 }
0x23dd   :  { %6442 = vtanh.f32 %v4865_v8 }
0x23de   :  { %6444 = vtanh.f32 %v4863_v9 }
0x23e5   :  { %v6439_v17 = vpop.eup %6438 }
0x23e6   :  { %v6441_v7 = vpop.eup %6440  ;;  %v4872_v11 = vadd.f32 1.0, %v6439_v17 }
0x23e7   :  { %v6443_v13 = vpop.eup %6442  ;;  %v4870_v18 = vadd.f32 1.0, %v6441_v7 }
0x23e8   :  { %v6445_v19 = vpop.eup %6444  ;;  %v4876_v20 = vmul.f32 0.5, %v4872_v11  ;;  %v4873_v21 = vadd.f32 1.0, %v6443_v13  ;;  %v5433_v13 = vld [vmem:[%s7568_s12] ss:$0 sm:$0xff] }
0x23e9   :  { %v4874_v16 = vmul.f32 0.5, %v4870_v18  ;;  %v4871_v31 = vadd.f32 1.0, %v6445_v19 }
0x23ea   :  { %v4877_v33 = vmul.f32 0.5, %v4873_v21  ;;  %v4880_v4 = vmul.f32 %v6119_v39, %v4876_v20 }
0x23eb   :  { %v4875_v34 = vmul.f32 0.5, %v4871_v31  ;;  %v4878_v22 = vmul.f32 %v4874_v16, %v4831_v15 }
0x23ec   :  { %v4881_v14 = vmul.f32 %v6120_v51, %v4877_v33  ;;  %v5434_v33 = vld [vmem:[%s7569_s13] ss:$0 sm:$0xff] }
0x23ed   :  { %v4879_v23 = vmul.f32 %v4875_v34, %v4834_v54 }
0x23ee   :  { %v4883_v26 = vpack.c.bf16 %v4881_v14, %v4880_v4 }
0x23ef   :  { %v4882_v28 = vpack.c.bf16 %v4879_v23, %v4878_v22 }
0x23f1   :  { %6137 = vmatprep.mubr.bf16.mxu0 %v4882_v28 }
0x23f2   :  { %6138 = vmatmul.mubr.bf16.vlgmr.msra.gmra.mrb[124].mxu0 %v4883_v26 }
0x24c5   :  { %v6139_v29 = vpop.f32.mrb[124].mxu0 }
0x24c6   :  { %v4983_v24 = vpop.f32.mrb[125].mxu0  ;;  %v5000_v32 = vadd.f32 %v6139_v29, %v7441_v45 }
0x24c7   :  { %v4998_v25 = vadd.f32 %v4983_v24, %v7438_v38  ;;  %v6140_v27 = vpop.f32.mrb[126].mxu0 }
0x24c8   :  { %v4986_v30 = vpop.f32.mrb[127].mxu0  ;;  %v5001_v40 = vadd.f32 %v6140_v27, %v7449_v46  ;;  %v5010_v44 = vsel %vm189_vm0, %v5000_v32, 0.0 }
0x24c9   :  { %v4999_v36 = vadd.f32 %v4986_v30, %v7444_v48  ;;  %v5004_v37 = vsel %vm189_vm0, %v4998_v25, 0.0 }
0x24ca   :  { %5005 = vadd.xlane.f32.xlu0 %v5004_v37  ;;  %v5013_v47 = vsel %vm189_vm0, %v5001_v40, 0.0 }
0x24cb   :  { %v5007_v43 = vsel %vm189_vm0, %v4999_v36, 0.0 }
0x24cc   :  { %5008 = vadd.xlane.f32.xlu1 %v5007_v43 }
0x24ce   :  { %5011 = vadd.xlane.f32.xlu0 %v5010_v44 }
0x24d0   :  { %5014 = vadd.xlane.f32.xlu1 %v5013_v47 }
0x2557   :  { %v5006_v38 = vpop.xlane.xlu0 %5005 }
0x2558   :  { %v5016_v6 = vmul.f32 0.03125, %v5006_v38 }
0x2559   :  { %v5009_v10 = vpop.xlane.xlu1 %5008 }
0x255a   :  { %v5020_v45 = vsub.f32 %v4998_v25, %v5016_v6  ;;  %v5017_v12 = vmul.f32 0.03125, %v5009_v10 }
0x255b   :  { %v5012_v48 = vpop.xlane.xlu0 %5011 }
0x255c   :  { %v5021_v49 = vsub.f32 %v4999_v36, %v5017_v12  ;;  %v5018_v50 = vmul.f32 0.03125, %v5012_v48  ;;  %v5024_v39 = vmul.f32 %v5020_v45, %v5020_v45 }
0x255d   :  { %v5015_v41 = vpop.xlane.xlu1 %5014 }
0x255e   :  { %v5022_v46 = vsub.f32 %v5000_v32, %v5018_v50  ;;  %v5019_v15 = vmul.f32 0.03125, %v5015_v41  ;;  %v5028_v42 = vsel %vm189_vm0, %v5024_v39, 0.0  ;;  %v5025_v51 = vmul.f32 %v5021_v49, %v5021_v49  ;;  %v5173_v39 = vld [vmem:[%s7571_s15 + $0x8] sm:$0xff] }
0x255f   :  { %5029 = vadd.xlane.f32.xlu0 %v5028_v42 }
0x2560   :  { %v5023_v52 = vsub.f32 %v5001_v40, %v5019_v15  ;;  %v5031_v53 = vsel %vm189_vm0, %v5025_v51, 0.0  ;;  %v5026_v54 = vmul.f32 %v5022_v46, %v5022_v46 }
0x2561   :  { %5032 = vadd.xlane.f32.xlu1 %v5031_v53 }
0x2562   :  { %v5034_v55 = vsel %vm189_vm0, %v5026_v54, 0.0  ;;  %v5027_v56 = vmul.f32 %v5023_v52, %v5023_v52 }
0x2563   :  { %5035 = vadd.xlane.f32.xlu0 %v5034_v55 }
0x2564   :  { %v5037_v57 = vsel %vm189_vm0, %v5027_v56, 0.0  ;;  %v5182_v56 = vld [vmem:[%s7572_s16] sm:$0xff] }
0x2565   :  { %5038 = vadd.xlane.f32.xlu1 %v5037_v57 }
0x25ec   :  { %v5030_v58 = vpop.xlane.xlu0 %5029 }
0x25ed   :  { %v5040_v35 = vmul.f32 0.03125, %v5030_v58  ;;  %v5183_v58 = vld [vmem:[%s7572_s16 + $0x8] sm:$0xff] }
0x25ee   :  { %v5033_v59 = vpop.xlane.xlu1 %5032 }
0x25ef   :  { %v5044_v61 = vadd.f32 1e-05, %v5040_v35  ;;  %v5041_v62 = vmul.f32 0.03125, %v5033_v59 }
0x25f0   :  { %v5036_v63 = vpop.xlane.xlu0 %5035 }
0x25f1   :  { %6446 = vrsqrt.f32 %v5044_v61  ;;  %v5045_v1 = vadd.f32 1e-05, %v5041_v62  ;;  %v5042_v3 = vmul.f32 0.03125, %v5036_v63 }
0x25f2   :  { %v5039_v5 = vpop.xlane.xlu1 %5038 }
0x25f3   :  { %6448 = vrsqrt.f32 %v5045_v1  ;;  %v5046_v8 = vadd.f32 1e-05, %v5042_v3  ;;  %v5043_v9 = vmul.f32 0.03125, %v5039_v5 }
0x25f5   :  { %6450 = vrsqrt.f32 %v5046_v8  ;;  %v5047_v17 = vadd.f32 1e-05, %v5043_v9 }
0x25f7   :  { %6452 = vrsqrt.f32 %v5047_v17 }
0x25fb   :  { %v6447_v7 = vpop.eup %6446 }
0x25fc   :  { %v5052_v2 = vmul.f32 %v6447_v7, %v5020_v45 }
0x25fd   :  { %v6449_v11 = vpop.eup %6448 }
0x25fe   :  { %v5053_v18 = vmul.f32 %v6449_v11, %v5021_v49  ;;  %v5062_v20 = vmul.f32 %v5433_v13, %v5052_v2  ;;  %v5172_v49 = vld [vmem:[%s7571_s15] sm:$0xff] }
0x25ff   :  { %v6451_v19 = vpop.eup %6450 }
0x2600   :  { %v5063_v21 = vmul.f32 %v5433_v13, %v5053_v18  ;;  %v5054_v16 = vmul.f32 %v6451_v19, %v5022_v46  ;;  %v5072_v22 = vadd.f32 %v5434_v33, %v5062_v20 }
0x2601   :  { %v6453_v31 = vpop.eup %6452 }
0x2602   :  { %v5073_v34 = vadd.f32 %v5434_v33, %v5063_v21  ;;  %v5064_v4 = vmul.f32 %v5433_v13, %v5054_v16  ;;  %v5055_v14 = vmul.f32 %v6453_v31, %v5023_v52  ;;  %v5081_v24 = vrot.slane %v5072_v22, 7 }
0x2604   :  { %v5074_v23 = vadd.f32 %v5434_v33, %v5064_v4  ;;  %v5065_v26 = vmul.f32 %v5433_v13, %v5055_v14  ;;  %v5082_v28 = vrot.slane %v5073_v34, 7 }
0x2606   :  { %v5075_v29 = vadd.f32 %v5434_v33, %v5065_v26  ;;  %v5084_v25 = vrot.slane %v5074_v23, 7  ;;  %v5083_v30 = vsel %vm5080_vm6, %v5081_v24, %v5082_v28 }
0x2608   :  { %v5085_v27 = vrot.slane %v5075_v29, 7 }
0x260a   :  { %v5086_v32 = vsel %vm5080_vm6, %v5084_v25, %v5085_v27 }
0x260b   :  { %v5089_v36 = vpack.c.bf16 %v5086_v32, %v5083_v30 }
0x260d   :  { %6146 = vmatmul.mubr.msk.bf16.vlgmr.msra.gmra.mrb[120].mxu1 %vm189_vm0, %v5089_v36 }
0x26e0   :  { %v5143_v37 = vpop.f32.mrb[120].mxu1 }
0x26e1   :  { %5150 = vst [vmem:[#allocation16] sm:$0xff] %v5143_v37  ;;  %5152 = vmax.xlane.f32.xlu0 %v5143_v37  ;;  %v6147_v40 = vpop.f32.mrb[121].mxu1  ;;  %v5174_v41 = vmul.f32 %v5172_v49, %v5143_v37 }
0x26e2   :  { %v5146_v43 = vpop.f32.mrb[122].mxu1 }
0x26e3   :  { %5151 = vst [vmem:[#allocation16 + $0x8] sm:$0xff] %v5146_v43  ;;  %5154 = vmax.xlane.f32.xlu1 %v5146_v43  ;;  %v6148_v44 = vpop.f32.mrb[123].mxu1  ;;  %v5175_v46 = vmul.f32 %v5173_v39, %v5146_v43 }
0x276e   :  { %v5153_v47 = vpop.xlane.xlu0 %5152 }
0x276f   :  { %v5156_v38 = vsub.f32 %v5143_v37, %v5153_v47 }
0x2770   :  { %v5155_v6 = vpop.xlane.xlu1 %5154 }
0x2771   :  { %v5158_v10 = vmul.f32 1.442695, %v5156_v38  ;;  %v5157_v45 = vsub.f32 %v5146_v43, %v5155_v6 }
0x2773   :  { %6454 = vpow2.f32 %v5158_v10  ;;  %v5160_v12 = vmul.f32 1.442695, %v5157_v45 }
0x2775   :  { %6456 = vpow2.f32 %v5160_v12 }
0x277d   :  { %v6455_v48 = vpop.eup %6454 }
0x277e   :  { %5162 = vadd.xlane.f32.xlu0 %v6455_v48 }
0x277f   :  { %v6457_v50 = vpop.eup %6456 }
0x2780   :  { %5164 = vadd.xlane.f32.xlu1 %v6457_v50 }
0x2782   :  { %5176 = vadd.xlane.f32.xlu0 %v5174_v41 }
0x2784   :  { %5178 = vadd.xlane.f32.xlu1 %v5175_v46 }
0x280b   :  { %v5163_v15 = vpop.xlane.xlu0 %5162 }
0x280c   :  { %6458 = vlog2.f32 %v5163_v15 }
0x280d   :  { %v5165_v42 = vpop.xlane.xlu1 %5164 }
0x280e   :  { %6460 = vlog2.f32 %v5165_v42 }
0x280f   :  { %v5177_v57 = vpop.xlane.xlu0 %5176 }
0x2811   :  { %v5179_v35 = vpop.xlane.xlu1 %5178 }
0x2816   :  { %v6459_v51 = vpop.eup %6458 }
0x2817   :  { %v5167_v52 = vmul.f32 0.6931472, %v6459_v51 }
0x2818   :  { %v6461_v53 = vpop.eup %6460 }
0x2819   :  { %v5169_v54 = vmul.f32 0.6931472, %v6461_v53  ;;  %v5170_v55 = vadd.f32 %v5167_v52, %v5153_v47 }
0x281b   :  { %v5180_v60 = vsub.f32 %v5170_v55, %v5177_v57  ;;  %v5171_v0 = vadd.f32 %v5169_v54, %v5155_v6 }
0x281d   :  { %v5184_v59 = vmul.f32 %v5182_v56, %v5180_v60  ;;  %v5181_v61 = vsub.f32 %v5171_v0, %v5179_v35 }
0x281f   :  { %v5185_v62 = vmul.f32 %v5183_v58, %v5181_v61  ;;  %v5187_v63 = vsel %vm5186_vm7, %v5184_v59, 0.0 }
0x2821   :  { %v5188_v1 = vsel %vm5186_vm7, %v5185_v62, 0.0 }
0x2822   :  { %v5189_v3 = vadd.f32 %v5188_v1, %v5187_v63 }
0x2824   :  { %5190 = vadd.xlane.f32.xlu0 %v5189_v3 }
0x2825   :  { %6653 = shalt.err (!%p6650_p12)
}
0x2826   :  { %s7591_s17 = sld [smem:[#allocation29_spill]] }
0x282c   :  { %s6654_s22 = scalar_lea.hbm %s7591_s17, 256 }
0x282d   :  { %p6655_p13 = scmp.ne.s32.totalorder %s7591_s17, %s6654_s22  ;;  %p6658_p0 = scmp.lt.u32.totalorder %s6654_s22, %s7591_s17 }
0x282f   :  { %p6660_p1 = pnand %p6658_p0, %p6655_p13 }
0x2831   :  { %6663 = shalt.err (!%p6660_p1)
}
0x2832   :  { %5213 = dma.vmem_to_hbm [thread:$0]  %s5208_s21, 256, %s7591_s17, [#allocation4], %s7589_s19, %s7589_s19, %s6702_s24   ;;  %vm5200_vm8 = vcmask 0  }
0x2833   :  { %s6716_s14 = smov [#allocation17]  }
0x2834   :  { %s5220_s0 = sshll.u32 %s6716_s14, 4  ;;  %s5221_s0 = int_to_ptr.vmem [resolvable:$true] %s5220_s0 }
0x2835   :  { %s6664_s23 = scalar_lea.vmem %s5221_s0, 16  ;;  %s6668_s11 = scalar_lea.vmem %s5221_s0, 32 }
0x2836   :  { %p6665_p2 = scmp.ne.s32.totalorder %s5221_s0, %s6664_s23  ;;  %p6669_p3 = scmp.lt.s32.totalorder %s5221_s0, %s5221_s0 }
0x2837   :  { %p6670_p4 = scmp.lt.s32.totalorder %s6668_s11, %s6664_s23 }
0x2839   :  { %p6671_p5 = por %p6670_p4, %p6669_p3 }
0x283b   :  { %p6672_p6 = pnand %p6671_p5, %p6665_p2 }
0x28b1   :  { %v5191_v5 = vpop.xlane.xlu0 %5190 }
0x28b2   :  { %v5192_v8 = vrot.slane %v5191_v5, 4 }
0x28b4   :  { %v5193_v9 = vadd.f32 %v5192_v8, %v5191_v5 }
0x28b6   :  { %v5194_v17 = vrot.slane %v5193_v9, 2 }
0x28b8   :  { %v5195_v7 = vadd.f32 %v5194_v17, %v5193_v9 }
0x28ba   :  { %v5196_v2 = vrot.slane %v5195_v7, 1 }
0x28bc   :  { %v5197_v11 = vadd.f32 %v5196_v2, %v5195_v7 }
0x28be   :  { %6181 = vpush %v5197_v11 }
0x28ef   :  { %s6182_s28 = spop %6181 }
0x28f0   :  { %v5199_v13 = vstv %s6182_s28 }
0x28f1   :  { %5201 = vst.msk [vmem:[#allocation17] sm:$0x1] %vm5200_vm8, %v5199_v13 }
0x28f2   :  { %6675 = shalt.err (!%p6672_p6)
}
0x28f3   :  { %s7592_s27 = sld [smem:[#allocation30_spill]] }
0x28f9   :  { %s6676_s18 = scalar_lea.hbm %s7592_s27, 16 }
0x28fa   :  { %p6677_p7 = scmp.ne.s32.totalorder %s7592_s27, %s6676_s18  ;;  %p6680_p8 = scmp.lt.u32.totalorder %s6676_s18, %s7592_s27 }
0x28fc   :  { %p6682_p9 = pnand %p6680_p8, %p6677_p7 }
0x28fe   :  { %6685 = shalt.err (!%p6682_p9)
}
0x28ff   :  { %5223 = dma.vmem_to_hbm [thread:$0]  %s5221_s0, 16, %s7592_s27, [#allocation18]  }
0x2900   :  { %6696 = dma.done.wait [#allocation4], 256  }
0x2901   :  { %6697 = vsyncadd [#allocation4], 4294967040 }
0x2902   :  { %6698 = dma.done.wait [#allocation18], 16  }
0x2903   :  { %6699 = vsyncadd [#allocation18], 4294967280 }
0x2904   :  { %5230 = vsyncpa [#allocation3], 1 }
0x2905   :  { %5231 = vsyncpa [#allocation6], 1 }
0x2906   :  { %5232 = vsyncpa [#allocation9], 1 }
0x2907   :  { %5233 = vsyncpa [#allocation12], 1 }
0x2908   :  { %5234 = vsyncpa [#allocation15], 1 }
0x2909   :  { %5235 = vsyncpa [#allocation4], 1 }
0x290a   :  { %5236 = vsyncpa [#allocation18], 1 }

</bundles_post_ra>
